<compile_context>
chip_gen: v7x
topology: tpu7x:2x2x1
jax: 0.10.0
libtpu: 0.0.40
codegen_flags: <defaults>
</compile_context>

<pallas_src>
import functools

import jax
import jax.numpy as jnp
from jax import lax
from jax.experimental import pallas as pl
from jax.experimental.pallas import tpu as pltpu

_LANE = 128
_EPS = 1e-5


def _round_up(n, m):
    return ((n + m - 1) // m) * m


def _tensorcores_per_chip():
    # v7x exposes 2 TensorCores per chip; v5e/v6e have 1.
    try:
        kind = jax.devices()[0].device_kind.lower()
    except Exception:
        return 1
    return 2 if ("v7" in kind or "7x" in kind) else 1


def _choose_tiling(n_rows):
    # One grid step per TensorCore (per-step overhead dominates this tiny
    # kernel); only extremely large tables get split into 256-row tiles to
    # limit live elementwise state (perf review: prefer 256 over 512).
    steps = _tensorcores_per_chip()
    tm = _round_up(max(-(-n_rows // steps), 8), 8)
    if tm > 1024:
        tm = 256
    m_pad = _round_up(n_rows, tm)
    return tm, m_pad


# ---------------------------------------------------------------------------
# Fused kernel: one tile of rows through the whole DynamicPosBias MLP.
# ---------------------------------------------------------------------------
def _dpb_kernel(x_ref, wp_ref, bp_ref,
                g1_ref, e1_ref, w1_ref, b1_ref,
                g2_ref, e2_ref, w2_ref, b2_ref,
                g3_ref, e3_ref, w3_ref, b3_ref,
                o_ref, *, pos_dim, residual):
    f32 = jnp.float32
    dp = w1_ref.shape[0]
    inv_n = 1.0 / float(pos_dim)

    # Mask only needed for the variance term when pos_dim < dp; padded
    # activation columns are exactly zero, so the mean needs no mask and the
    # padded output columns come out zero via zero-padded gamma/beta/weights.
    if dp > pos_dim:
        col = lax.broadcasted_iota(jnp.int32, (1, dp), 1)
        mask = (col < pos_dim).astype(f32)
    else:
        mask = None

    def ln_relu_fc(h, g_ref, e_ref, w_ref, b_ref):
        mean = jnp.sum(h, axis=-1, keepdims=True) * inv_n
        xc = h - mean
        xc_v = xc if mask is None else xc * mask
        var = jnp.sum(xc_v * xc_v, axis=-1, keepdims=True) * inv_n
        y = xc * lax.rsqrt(var + _EPS) * g_ref[...] + e_ref[...]
        y = jnp.maximum(y, 0.0)                                   # ReLU
        return jnp.dot(y, w_ref[...], preferred_element_type=f32) + b_ref[...]

    x = x_ref[...]
    # First linear (in_features = 2): two broadcasted VPU FMAs instead of a
    # 2/128-useful-lane MXU matmul on a 64x-padded input.
    pos = (x[:, 0:1] * wp_ref[0:1, :]
           + x[:, 1:2] * wp_ref[1:2, :]
           + bp_ref[...])
    if residual:
        pos = pos + ln_relu_fc(pos, g1_ref, e1_ref, w1_ref, b1_ref)
        pos = pos + ln_relu_fc(pos, g2_ref, e2_ref, w2_ref, b2_ref)
        out = ln_relu_fc(pos, g3_ref, e3_ref, w3_ref, b3_ref)
    else:
        pos = ln_relu_fc(pos, g1_ref, e1_ref, w1_ref, b1_ref)
        pos = ln_relu_fc(pos, g2_ref, e2_ref, w2_ref, b2_ref)
        out = ln_relu_fc(pos, g3_ref, e3_ref, w3_ref, b3_ref)
    o_ref[...] = out.astype(o_ref.dtype)


# ---------------------------------------------------------------------------
# Wrapper: pad hidden/output dims to lane multiples, tile rows, call kernel.
# ---------------------------------------------------------------------------
def dynamic_pos_bias_forward(biases, params, *, num_heads, residual):
    n_rows, two = biases.shape
    assert two == 2
    pos_dim = params["fc1_w"].shape[0]

    dp = _round_up(pos_dim, _LANE)     # lane-dense hidden width
    hp = _round_up(num_heads, _LANE)   # lane-dense output width
    tm, m_pad = _choose_tiling(n_rows)
    grid = m_pad // tm

    f32 = jnp.float32
    # Rows padded for the tile grid; the 2-wide feature dim stays unpadded.
    x = jnp.pad(biases.astype(f32), ((0, m_pad - n_rows), (0, 0)))

    def pad_w(w, in_d, out_d):
        # torch Linear weight (out, in) -> padded (in_d, out_d)
        wt = w.T.astype(f32)
        return jnp.pad(wt, ((0, in_d - wt.shape[0]), (0, out_d - wt.shape[1])))

    def pad_v(v, out_d):
        return jnp.pad(v.astype(f32), (0, out_d - v.shape[0])).reshape(1, out_d)

    wp = pad_w(params["proj_w"], 2, dp);  bp = pad_v(params["proj_b"], dp)
    w1 = pad_w(params["fc1_w"], dp, dp);  b1 = pad_v(params["fc1_b"], dp)
    w2 = pad_w(params["fc2_w"], dp, dp);  b2 = pad_v(params["fc2_b"], dp)
    w3 = pad_w(params["fc3_w"], dp, hp);  b3 = pad_v(params["fc3_b"], hp)
    g1 = pad_v(params["ln1_g"], dp); e1 = pad_v(params["ln1_b"], dp)
    g2 = pad_v(params["ln2_g"], dp); e2 = pad_v(params["ln2_b"], dp)
    g3 = pad_v(params["ln3_g"], dp); e3 = pad_v(params["ln3_b"], dp)

    def row_spec(shape):
        return pl.BlockSpec(shape, lambda i: (i, 0))

    def full_spec(shape):
        return pl.BlockSpec(shape, lambda i: (0, 0))

    flops = 2 * m_pad * (2 * dp + 2 * dp * dp + dp * hp)
    bytes_accessed = 4 * (m_pad * 2 + 2 * dp + 2 * dp * dp + dp * hp
                          + 7 * dp + hp + m_pad * hp)

    out = pl.pallas_call(
        functools.partial(_dpb_kernel, pos_dim=pos_dim, residual=residual),
        out_shape=jax.ShapeDtypeStruct((m_pad, hp), f32),
        grid_spec=pl.GridSpec(
            grid=(grid,),
            in_specs=[
                row_spec((tm, 2)),                        # biases rows (unpadded K)
                full_spec((2, dp)), full_spec((1, dp)),   # pos_proj
                full_spec((1, dp)), full_spec((1, dp)),   # ln1 gamma/beta
                full_spec((dp, dp)), full_spec((1, dp)),  # fc1
                full_spec((1, dp)), full_spec((1, dp)),   # ln2 gamma/beta
                full_spec((dp, dp)), full_spec((1, dp)),  # fc2
                full_spec((1, dp)), full_spec((1, dp)),   # ln3 gamma/beta
                full_spec((dp, hp)), full_spec((1, hp)),  # fc3
            ],
            out_specs=row_spec((tm, hp)),
        ),
        compiler_params=pltpu.CompilerParams(
            dimension_semantics=("parallel",) if grid > 1 else ("arbitrary",)),
        cost_estimate=pl.CostEstimate(
            flops=flops, transcendentals=3 * m_pad,
            bytes_accessed=bytes_accessed),
    )(x, wp, bp, g1, e1, w1, b1, g2, e2, w2, b2, g3, e3, w3, b3)

    # TODO(synk): downstream consumers could index the padded lane-dense
    # output directly and avoid this extra slice copy.
    return out[:n_rows, :num_heads]


# ---------------------------------------------------------------------------
# Parameter init (PyTorch Linear conventions) and pure-JAX reference.
# ---------------------------------------------------------------------------
def _init_params(key, dim, num_heads, dtype=jnp.float32):
    pos_dim = dim // 4
    ks = jax.random.split(key, 7)

    def lin(k, fan_in, fan_out):
        kw, kb = jax.random.split(k)
        bound = 1.0 / (fan_in ** 0.5)
        w = jax.random.uniform(kw, (fan_out, fan_in), dtype, -bound, bound)
        b = jax.random.uniform(kb, (fan_out,), dtype, -bound, bound)
        return w, b

    def ln_params(k):
        kg, kb = jax.random.split(k)
        g = 1.0 + 0.1 * jax.random.normal(kg, (pos_dim,), dtype)
        b = 0.1 * jax.random.normal(kb, (pos_dim,), dtype)
        return g, b

    proj_w, proj_b = lin(ks[0], 2, pos_dim)
    fc1_w, fc1_b = lin(ks[1], pos_dim, pos_dim)
    fc2_w, fc2_b = lin(ks[2], pos_dim, pos_dim)
    fc3_w, fc3_b = lin(ks[3], pos_dim, num_heads)
    ln1_g, ln1_b = ln_params(ks[4])
    ln2_g, ln2_b = ln_params(ks[5])
    ln3_g, ln3_b = ln_params(ks[6])
    return dict(proj_w=proj_w, proj_b=proj_b,
                ln1_g=ln1_g, ln1_b=ln1_b, fc1_w=fc1_w, fc1_b=fc1_b,
                ln2_g=ln2_g, ln2_b=ln2_b, fc2_w=fc2_w, fc2_b=fc2_b,
                ln3_g=ln3_g, ln3_b=ln3_b, fc3_w=fc3_w, fc3_b=fc3_b)


def _ref_forward(biases, params, residual):
    def ln(x, g, b):
        mean = x.mean(-1, keepdims=True)
        var = ((x - mean) ** 2).mean(-1, keepdims=True)
        return (x - mean) / jnp.sqrt(var + _EPS) * g + b

    def blk(x, g, b, w, bb):
        return jnp.maximum(ln(x, g, b), 0.0) @ w.T + bb

    pos = biases @ params["proj_w"].T + params["proj_b"]
    if residual:
        pos = pos + blk(pos, params["ln1_g"], params["ln1_b"],
                        params["fc1_w"], params["fc1_b"])
        pos = pos + blk(pos, params["ln2_g"], params["ln2_b"],
                        params["fc2_w"], params["fc2_b"])
        pos = blk(pos, params["ln3_g"], params["ln3_b"],
                  params["fc3_w"], params["fc3_b"])
    else:
        pos = blk(pos, params["ln1_g"], params["ln1_b"],
                  params["fc1_w"], params["fc1_b"])
        pos = blk(pos, params["ln2_g"], params["ln2_b"],
                  params["fc2_w"], params["fc2_b"])
        pos = blk(pos, params["ln3_g"], params["ln3_b"],
                  params["fc3_w"], params["fc3_b"])
    return pos


if __name__ == "__main__":
    # Small config: dim=32 -> pos_dim=8, num_heads=4, group_size=8
    # -> biases table of (2*8-1)^2 = 225 relative coordinates.
    dim, num_heads, group_size = 32, 4, 8

    ph = jnp.arange(1 - group_size, group_size, dtype=jnp.float32)
    pw = jnp.arange(1 - group_size, group_size, dtype=jnp.float32)
    bh, bw = jnp.meshgrid(ph, pw, indexing="ij")
    biases = jnp.stack([bh.reshape(-1), bw.reshape(-1)], axis=-1)  # (225, 2)

    params = _init_params(jax.random.PRNGKey(0), dim, num_heads)

    for residual in (True, False):
        out = dynamic_pos_bias_forward(biases, params,
                                       num_heads=num_heads, residual=residual)
        out = jax.block_until_ready(out)
        ref = _ref_forward(biases, params, residual)
        assert out.shape == (biases.shape[0], num_heads), out.shape
        err = float(jnp.max(jnp.abs(out - ref)))
        assert jnp.allclose(out, ref, atol=1e-4, rtol=1e-4), (residual, err)

    print("KERNEL_OK")
</pallas_src>

<mosaic_0001>
module attributes {stable_mosaic.version = 11 : i64} {
  func.func @_dpb_kernel(%arg0: i32, %arg1: memref<232x2xf32, #tpu.memory_space<vmem>>, %arg2: memref<2x128xf32, #tpu.memory_space<vmem>>, %arg3: memref<1x128xf32, #tpu.memory_space<vmem>>, %arg4: memref<1x128xf32, #tpu.memory_space<vmem>>, %arg5: memref<1x128xf32, #tpu.memory_space<vmem>>, %arg6: memref<128x128xf32, #tpu.memory_space<vmem>>, %arg7: memref<1x128xf32, #tpu.memory_space<vmem>>, %arg8: memref<1x128xf32, #tpu.memory_space<vmem>>, %arg9: memref<1x128xf32, #tpu.memory_space<vmem>>, %arg10: memref<128x128xf32, #tpu.memory_space<vmem>>, %arg11: memref<1x128xf32, #tpu.memory_space<vmem>>, %arg12: memref<1x128xf32, #tpu.memory_space<vmem>>, %arg13: memref<1x128xf32, #tpu.memory_space<vmem>>, %arg14: memref<128x128xf32, #tpu.memory_space<vmem>>, %arg15: memref<1x128xf32, #tpu.memory_space<vmem>>, %arg16: memref<232x128xf32, #tpu.memory_space<vmem>>) attributes {dimension_semantics = [#tpu.dimension_semantics<arbitrary>], iteration_bounds = array<i64: 1>, scalar_prefetch = 0 : i64, scratch_operands = 0 : i64, tpu.core_type = #tpu.core_type<tc>, window_params = [{transform_indices = @transform_0, window_bounds = array<i64: 232, 2>}, {pipeline_mode = #tpu.pipeline_mode<synchronous>, transform_indices = @transform_1, window_bounds = array<i64: 2, 128>}, {pipeline_mode = #tpu.pipeline_mode<synchronous>, transform_indices = @transform_2, window_bounds = array<i64: 1, 128>}, {pipeline_mode = #tpu.pipeline_mode<synchronous>, transform_indices = @transform_3, window_bounds = array<i64: 1, 128>}, {pipeline_mode = #tpu.pipeline_mode<synchronous>, transform_indices = @transform_4, window_bounds = array<i64: 1, 128>}, {pipeline_mode = #tpu.pipeline_mode<synchronous>, transform_indices = @transform_5, window_bounds = array<i64: 128, 128>}, {pipeline_mode = #tpu.pipeline_mode<synchronous>, transform_indices = @transform_6, window_bounds = array<i64: 1, 128>}, {pipeline_mode = #tpu.pipeline_mode<synchronous>, transform_indices = @transform_7, window_bounds = array<i64: 1, 128>}, {pipeline_mode = #tpu.pipeline_mode<synchronous>, transform_indices = @transform_8, window_bounds = array<i64: 1, 128>}, {pipeline_mode = #tpu.pipeline_mode<synchronous>, transform_indices = @transform_9, window_bounds = array<i64: 128, 128>}, {pipeline_mode = #tpu.pipeline_mode<synchronous>, transform_indices = @transform_10, window_bounds = array<i64: 1, 128>}, {pipeline_mode = #tpu.pipeline_mode<synchronous>, transform_indices = @transform_11, window_bounds = array<i64: 1, 128>}, {pipeline_mode = #tpu.pipeline_mode<synchronous>, transform_indices = @transform_12, window_bounds = array<i64: 1, 128>}, {pipeline_mode = #tpu.pipeline_mode<synchronous>, transform_indices = @transform_13, window_bounds = array<i64: 128, 128>}, {pipeline_mode = #tpu.pipeline_mode<synchronous>, transform_indices = @transform_14, window_bounds = array<i64: 1, 128>}, {transform_indices = @transform_15, window_bounds = array<i64: 232, 128>}]} {
    %0 = tpu.iota {dimensions = array<i32: 1>} : vector<1x128xi32>
    %c8_i32 = arith.constant 8 : i32
    %1 = vector.broadcast %c8_i32 : i32 to vector<1x128xi32>
    %2 = arith.cmpi slt, %0, %1 : vector<1x128xi32>
    %3 = arith.extui %2 : vector<1x128xi1> to vector<1x128xi32>
    %4 = arith.sitofp %3 : vector<1x128xi32> to vector<1x128xf32>
    %c0 = arith.constant 0 : index
    %c0_0 = arith.constant 0 : index
    %5 = vector.load %arg1[%c0, %c0_0] : memref<232x2xf32, #tpu.memory_space<vmem>>, vector<232x2xf32>
    %6 = vector.extract_strided_slice %5 {offsets = [0, 0], sizes = [232, 1], strides = [1, 1]} : vector<232x2xf32> to vector<232x1xf32>
    %c0_1 = arith.constant 0 : index
    %c0_2 = arith.constant 0 : index
    %7 = vector.load %arg2[%c0_1, %c0_2] : memref<2x128xf32, #tpu.memory_space<vmem>>, vector<1x128xf32>
    %8 = vector.broadcast %6 : vector<232x1xf32> to vector<232x128xf32>
    %9 = vector.broadcast %7 : vector<1x128xf32> to vector<232x128xf32>
    %10 = arith.mulf %8, %9 : vector<232x128xf32>
    %11 = vector.extract_strided_slice %5 {offsets = [0, 1], sizes = [232, 1], strides = [1, 1]} : vector<232x2xf32> to vector<232x1xf32>
    %c1 = arith.constant 1 : index
    %c0_3 = arith.constant 0 : index
    %12 = vector.load %arg2[%c1, %c0_3] : memref<2x128xf32, #tpu.memory_space<vmem>>, vector<1x128xf32>
    %13 = vector.broadcast %11 : vector<232x1xf32> to vector<232x128xf32>
    %14 = vector.broadcast %12 : vector<1x128xf32> to vector<232x128xf32>
    %15 = arith.mulf %13, %14 : vector<232x128xf32>
    %16 = arith.addf %10, %15 : vector<232x128xf32>
    %c0_4 = arith.constant 0 : index
    %c0_5 = arith.constant 0 : index
    %17 = vector.load %arg3[%c0_4, %c0_5] : memref<1x128xf32, #tpu.memory_space<vmem>>, vector<1x128xf32>
    %18 = vector.broadcast %17 : vector<1x128xf32> to vector<232x128xf32>
    %19 = arith.addf %16, %18 : vector<232x128xf32>
    %cst = arith.constant dense<0.000000e+00> : vector<232xf32>
    %20 = vector.multi_reduction <add>, %19, %cst [1] : vector<232x128xf32> to vector<232xf32>
    %21 = vector.shape_cast %20 : vector<232xf32> to vector<232x1xf32>
    %cst_6 = arith.constant 1.250000e-01 : f32
    %22 = vector.broadcast %cst_6 : f32 to vector<232x1xf32>
    %23 = arith.mulf %21, %22 : vector<232x1xf32>
    %24 = vector.broadcast %23 : vector<232x1xf32> to vector<232x128xf32>
    %25 = arith.subf %19, %24 : vector<232x128xf32>
    %26 = vector.broadcast %4 : vector<1x128xf32> to vector<232x128xf32>
    %27 = arith.mulf %25, %26 : vector<232x128xf32>
    %28 = arith.mulf %27, %27 : vector<232x128xf32>
    %cst_7 = arith.constant dense<0.000000e+00> : vector<232xf32>
    %29 = vector.multi_reduction <add>, %28, %cst_7 [1] : vector<232x128xf32> to vector<232xf32>
    %30 = vector.shape_cast %29 : vector<232xf32> to vector<232x1xf32>
    %cst_8 = arith.constant 1.250000e-01 : f32
    %31 = vector.broadcast %cst_8 : f32 to vector<232x1xf32>
    %32 = arith.mulf %30, %31 : vector<232x1xf32>
    %cst_9 = arith.constant 9.99999974E-6 : f32
    %33 = vector.broadcast %cst_9 : f32 to vector<232x1xf32>
    %34 = arith.addf %32, %33 : vector<232x1xf32>
    %35 = math.rsqrt %34 : vector<232x1xf32>
    %36 = vector.broadcast %35 : vector<232x1xf32> to vector<232x128xf32>
    %37 = arith.mulf %25, %36 : vector<232x128xf32>
    %c0_10 = arith.constant 0 : index
    %c0_11 = arith.constant 0 : index
    %38 = vector.load %arg4[%c0_10, %c0_11] : memref<1x128xf32, #tpu.memory_space<vmem>>, vector<1x128xf32>
    %39 = vector.broadcast %38 : vector<1x128xf32> to vector<232x128xf32>
    %40 = arith.mulf %37, %39 : vector<232x128xf32>
    %c0_12 = arith.constant 0 : index
    %c0_13 = arith.constant 0 : index
    %41 = vector.load %arg5[%c0_12, %c0_13] : memref<1x128xf32, #tpu.memory_space<vmem>>, vector<1x128xf32>
    %42 = vector.broadcast %41 : vector<1x128xf32> to vector<232x128xf32>
    %43 = arith.addf %40, %42 : vector<232x128xf32>
    %cst_14 = arith.constant 0.000000e+00 : f32
    %44 = vector.broadcast %cst_14 : f32 to vector<232x128xf32>
    %45 = arith.maximumf %43, %44 : vector<232x128xf32>
    %c0_15 = arith.constant 0 : index
    %c0_16 = arith.constant 0 : index
    %46 = vector.load %arg6[%c0_15, %c0_16] : memref<128x128xf32, #tpu.memory_space<vmem>>, vector<128x128xf32>
    %cst_17 = arith.constant dense<0.000000e+00> : vector<232x128xf32>
    %47 = tpu.matmul %45, %46, %cst_17 {dimension_numbers = #tpu.dot_dimension_numbers<[1], [0], [0], [1], [0, 0, 1, 1], [], []>} : vector<232x128xf32>, vector<128x128xf32>, vector<232x128xf32> -> vector<232x128xf32>
    %c0_18 = arith.constant 0 : index
    %c0_19 = arith.constant 0 : index
    %48 = vector.load %arg7[%c0_18, %c0_19] : memref<1x128xf32, #tpu.memory_space<vmem>>, vector<1x128xf32>
    %49 = vector.broadcast %48 : vector<1x128xf32> to vector<232x128xf32>
    %50 = arith.addf %47, %49 : vector<232x128xf32>
    %51 = arith.addf %19, %50 : vector<232x128xf32>
    %cst_20 = arith.constant dense<0.000000e+00> : vector<232xf32>
    %52 = vector.multi_reduction <add>, %51, %cst_20 [1] : vector<232x128xf32> to vector<232xf32>
    %53 = vector.shape_cast %52 : vector<232xf32> to vector<232x1xf32>
    %cst_21 = arith.constant 1.250000e-01 : f32
    %54 = vector.broadcast %cst_21 : f32 to vector<232x1xf32>
    %55 = arith.mulf %53, %54 : vector<232x1xf32>
    %56 = vector.broadcast %55 : vector<232x1xf32> to vector<232x128xf32>
    %57 = arith.subf %51, %56 : vector<232x128xf32>
    %58 = vector.broadcast %4 : vector<1x128xf32> to vector<232x128xf32>
    %59 = arith.mulf %57, %58 : vector<232x128xf32>
    %60 = arith.mulf %59, %59 : vector<232x128xf32>
    %cst_22 = arith.constant dense<0.000000e+00> : vector<232xf32>
    %61 = vector.multi_reduction <add>, %60, %cst_22 [1] : vector<232x128xf32> to vector<232xf32>
    %62 = vector.shape_cast %61 : vector<232xf32> to vector<232x1xf32>
    %cst_23 = arith.constant 1.250000e-01 : f32
    %63 = vector.broadcast %cst_23 : f32 to vector<232x1xf32>
    %64 = arith.mulf %62, %63 : vector<232x1xf32>
    %cst_24 = arith.constant 9.99999974E-6 : f32
    %65 = vector.broadcast %cst_24 : f32 to vector<232x1xf32>
    %66 = arith.addf %64, %65 : vector<232x1xf32>
    %67 = math.rsqrt %66 : vector<232x1xf32>
    %68 = vector.broadcast %67 : vector<232x1xf32> to vector<232x128xf32>
    %69 = arith.mulf %57, %68 : vector<232x128xf32>
    %c0_25 = arith.constant 0 : index
    %c0_26 = arith.constant 0 : index
    %70 = vector.load %arg8[%c0_25, %c0_26] : memref<1x128xf32, #tpu.memory_space<vmem>>, vector<1x128xf32>
    %71 = vector.broadcast %70 : vector<1x128xf32> to vector<232x128xf32>
    %72 = arith.mulf %69, %71 : vector<232x128xf32>
    %c0_27 = arith.constant 0 : index
    %c0_28 = arith.constant 0 : index
    %73 = vector.load %arg9[%c0_27, %c0_28] : memref<1x128xf32, #tpu.memory_space<vmem>>, vector<1x128xf32>
    %74 = vector.broadcast %73 : vector<1x128xf32> to vector<232x128xf32>
    %75 = arith.addf %72, %74 : vector<232x128xf32>
    %cst_29 = arith.constant 0.000000e+00 : f32
    %76 = vector.broadcast %cst_29 : f32 to vector<232x128xf32>
    %77 = arith.maximumf %75, %76 : vector<232x128xf32>
    %c0_30 = arith.constant 0 : index
    %c0_31 = arith.constant 0 : index
    %78 = vector.load %arg10[%c0_30, %c0_31] : memref<128x128xf32, #tpu.memory_space<vmem>>, vector<128x128xf32>
    %cst_32 = arith.constant dense<0.000000e+00> : vector<232x128xf32>
    %79 = tpu.matmul %77, %78, %cst_32 {dimension_numbers = #tpu.dot_dimension_numbers<[1], [0], [0], [1], [0, 0, 1, 1], [], []>} : vector<232x128xf32>, vector<128x128xf32>, vector<232x128xf32> -> vector<232x128xf32>
    %c0_33 = arith.constant 0 : index
    %c0_34 = arith.constant 0 : index
    %80 = vector.load %arg11[%c0_33, %c0_34] : memref<1x128xf32, #tpu.memory_space<vmem>>, vector<1x128xf32>
    %81 = vector.broadcast %80 : vector<1x128xf32> to vector<232x128xf32>
    %82 = arith.addf %79, %81 : vector<232x128xf32>
    %83 = arith.addf %51, %82 : vector<232x128xf32>
    %cst_35 = arith.constant dense<0.000000e+00> : vector<232xf32>
    %84 = vector.multi_reduction <add>, %83, %cst_35 [1] : vector<232x128xf32> to vector<232xf32>
    %85 = vector.shape_cast %84 : vector<232xf32> to vector<232x1xf32>
    %cst_36 = arith.constant 1.250000e-01 : f32
    %86 = vector.broadcast %cst_36 : f32 to vector<232x1xf32>
    %87 = arith.mulf %85, %86 : vector<232x1xf32>
    %88 = vector.broadcast %87 : vector<232x1xf32> to vector<232x128xf32>
    %89 = arith.subf %83, %88 : vector<232x128xf32>
    %90 = vector.broadcast %4 : vector<1x128xf32> to vector<232x128xf32>
    %91 = arith.mulf %89, %90 : vector<232x128xf32>
    %92 = arith.mulf %91, %91 : vector<232x128xf32>
    %cst_37 = arith.constant dense<0.000000e+00> : vector<232xf32>
    %93 = vector.multi_reduction <add>, %92, %cst_37 [1] : vector<232x128xf32> to vector<232xf32>
    %94 = vector.shape_cast %93 : vector<232xf32> to vector<232x1xf32>
    %cst_38 = arith.constant 1.250000e-01 : f32
    %95 = vector.broadcast %cst_38 : f32 to vector<232x1xf32>
    %96 = arith.mulf %94, %95 : vector<232x1xf32>
    %cst_39 = arith.constant 9.99999974E-6 : f32
    %97 = vector.broadcast %cst_39 : f32 to vector<232x1xf32>
    %98 = arith.addf %96, %97 : vector<232x1xf32>
    %99 = math.rsqrt %98 : vector<232x1xf32>
    %100 = vector.broadcast %99 : vector<232x1xf32> to vector<232x128xf32>
    %101 = arith.mulf %89, %100 : vector<232x128xf32>
    %c0_40 = arith.constant 0 : index
    %c0_41 = arith.constant 0 : index
    %102 = vector.load %arg12[%c0_40, %c0_41] : memref<1x128xf32, #tpu.memory_space<vmem>>, vector<1x128xf32>
    %103 = vector.broadcast %102 : vector<1x128xf32> to vector<232x128xf32>
    %104 = arith.mulf %101, %103 : vector<232x128xf32>
    %c0_42 = arith.constant 0 : index
    %c0_43 = arith.constant 0 : index
    %105 = vector.load %arg13[%c0_42, %c0_43] : memref<1x128xf32, #tpu.memory_space<vmem>>, vector<1x128xf32>
    %106 = vector.broadcast %105 : vector<1x128xf32> to vector<232x128xf32>
    %107 = arith.addf %104, %106 : vector<232x128xf32>
    %cst_44 = arith.constant 0.000000e+00 : f32
    %108 = vector.broadcast %cst_44 : f32 to vector<232x128xf32>
    %109 = arith.maximumf %107, %108 : vector<232x128xf32>
    %c0_45 = arith.constant 0 : index
    %c0_46 = arith.constant 0 : index
    %110 = vector.load %arg14[%c0_45, %c0_46] : memref<128x128xf32, #tpu.memory_space<vmem>>, vector<128x128xf32>
    %cst_47 = arith.constant dense<0.000000e+00> : vector<232x128xf32>
    %111 = tpu.matmul %109, %110, %cst_47 {dimension_numbers = #tpu.dot_dimension_numbers<[1], [0], [0], [1], [0, 0, 1, 1], [], []>} : vector<232x128xf32>, vector<128x128xf32>, vector<232x128xf32> -> vector<232x128xf32>
    %c0_48 = arith.constant 0 : index
    %c0_49 = arith.constant 0 : index
    %112 = vector.load %arg15[%c0_48, %c0_49] : memref<1x128xf32, #tpu.memory_space<vmem>>, vector<1x128xf32>
    %113 = vector.broadcast %112 : vector<1x128xf32> to vector<232x128xf32>
    %114 = arith.addf %111, %113 : vector<232x128xf32>
    %c0_50 = arith.constant 0 : index
    %c0_51 = arith.constant 0 : index
    %115 = vector.load %arg16[%c0_50, %c0_51] : memref<232x128xf32, #tpu.memory_space<vmem>>, vector<232x128xf32>
    tpu.vector_store %arg16[%c0_50, %c0_51], %114 {strides = array<i32>} : memref<232x128xf32, #tpu.memory_space<vmem>>, vector<232x128xf32>,
    return
  }
  func.func @transform_0(%arg0: i32) -> (i32, i32) {
    %c0_i32 = arith.constant 0 : i32
    %c0_i32_0 = arith.constant 0 : i32
    return %arg0, %c0_i32 : i32, i32
  }
  func.func @transform_1(%arg0: i32) -> (i32, i32) {
    %c0_i32 = arith.constant 0 : i32
    %c0_i32_0 = arith.constant 0 : i32
    %c0_i32_1 = arith.constant 0 : i32
    return %c0_i32, %c0_i32_0 : i32, i32
  }
  func.func @transform_2(%arg0: i32) -> (i32, i32) {
    %c0_i32 = arith.constant 0 : i32
    %c0_i32_0 = arith.constant 0 : i32
    %c0_i32_1 = arith.constant 0 : i32
    return %c0_i32, %c0_i32_0 : i32, i32
  }
  func.func @transform_3(%arg0: i32) -> (i32, i32) {
    %c0_i32 = arith.constant 0 : i32
    %c0_i32_0 = arith.constant 0 : i32
    %c0_i32_1 = arith.constant 0 : i32
    return %c0_i32, %c0_i32_0 : i32, i32
  }
  func.func @transform_4(%arg0: i32) -> (i32, i32) {
    %c0_i32 = arith.constant 0 : i32
    %c0_i32_0 = arith.constant 0 : i32
    %c0_i32_1 = arith.constant 0 : i32
    return %c0_i32, %c0_i32_0 : i32, i32
  }
  func.func @transform_5(%arg0: i32) -> (i32, i32) {
    %c0_i32 = arith.constant 0 : i32
    %c0_i32_0 = arith.constant 0 : i32
    %c0_i32_1 = arith.constant 0 : i32
    return %c0_i32, %c0_i32_0 : i32, i32
  }
  func.func @transform_6(%arg0: i32) -> (i32, i32) {
    %c0_i32 = arith.constant 0 : i32
    %c0_i32_0 = arith.constant 0 : i32
    %c0_i32_1 = arith.constant 0 : i32
    return %c0_i32, %c0_i32_0 : i32, i32
  }
  func.func @transform_7(%arg0: i32) -> (i32, i32) {
    %c0_i32 = arith.constant 0 : i32
    %c0_i32_0 = arith.constant 0 : i32
    %c0_i32_1 = arith.constant 0 : i32
    return %c0_i32, %c0_i32_0 : i32, i32
  }
  func.func @transform_8(%arg0: i32) -> (i32, i32) {
    %c0_i32 = arith.constant 0 : i32
    %c0_i32_0 = arith.constant 0 : i32
    %c0_i32_1 = arith.constant 0 : i32
    return %c0_i32, %c0_i32_0 : i32, i32
  }
  func.func @transform_9(%arg0: i32) -> (i32, i32) {
    %c0_i32 = arith.constant 0 : i32
    %c0_i32_0 = arith.constant 0 : i32
    %c0_i32_1 = arith.constant 0 : i32
    return %c0_i32, %c0_i32_0 : i32, i32
  }
  func.func @transform_10(%arg0: i32) -> (i32, i32) {
    %c0_i32 = arith.constant 0 : i32
    %c0_i32_0 = arith.constant 0 : i32
    %c0_i32_1 = arith.constant 0 : i32
    return %c0_i32, %c0_i32_0 : i32, i32
  }
  func.func @transform_11(%arg0: i32) -> (i32, i32) {
    %c0_i32 = arith.constant 0 : i32
    %c0_i32_0 = arith.constant 0 : i32
    %c0_i32_1 = arith.constant 0 : i32
    return %c0_i32, %c0_i32_0 : i32, i32
  }
  func.func @transform_12(%arg0: i32) -> (i32, i32) {
    %c0_i32 = arith.constant 0 : i32
    %c0_i32_0 = arith.constant 0 : i32
    %c0_i32_1 = arith.constant 0 : i32
    return %c0_i32, %c0_i32_0 : i32, i32
  }
  func.func @transform_13(%arg0: i32) -> (i32, i32) {
    %c0_i32 = arith.constant 0 : i32
    %c0_i32_0 = arith.constant 0 : i32
    %c0_i32_1 = arith.constant 0 : i32
    return %c0_i32, %c0_i32_0 : i32, i32
  }
  func.func @transform_14(%arg0: i32) -> (i32, i32) {
    %c0_i32 = arith.constant 0 : i32
    %c0_i32_0 = arith.constant 0 : i32
    %c0_i32_1 = arith.constant 0 : i32
    return %c0_i32, %c0_i32_0 : i32, i32
  }
  func.func @transform_15(%arg0: i32) -> (i32, i32) {
    %c0_i32 = arith.constant 0 : i32
    %c0_i32_0 = arith.constant 0 : i32
    return %arg0, %c0_i32 : i32, i32
  }
}

</mosaic_0001>

<bundles_post_ra>
// kernel: tpu_custom_call.1
= control target key start
LH: loop header
LB: loop body
LE: loop exit
PB: predicated region body
PF: predicated region fallthrough
CT: control target
= control target key end

     0   :  { %20 = vsyncpa [#allocation3], 0  ;;  %s5474_s0 = inlined_call_operand.vmem [shape: f32[232,2], index: 0, kind: input, shape index: {}]   ;;  %s5475_s1 = inlined_call_operand.vmem [shape: f32[2,128], index: 1, kind: input, shape index: {}]   ;;  %s5476_s2 = inlined_call_operand.hbm [shape: f32[1,128], index: 2, kind: input, shape index: {}]   ;;  %s5477_s3 = inlined_call_operand.hbm [shape: f32[1,128], index: 3, kind: input, shape index: {}]   ;;  %s5478_s4 = inlined_call_operand.hbm [shape: f32[1,128], index: 4, kind: input, shape index: {}]   ;;  %s5479_s5 = inlined_call_operand.vmem [shape: f32[128,128], index: 5, kind: input, shape index: {}]   ;;  %s5480_s6 = inlined_call_operand.hbm [shape: f32[1,128], index: 6, kind: input, shape index: {}]   ;;  %s5481_s7 = inlined_call_operand.vmem [shape: f32[1,128], index: 7, kind: input, shape index: {}]   ;;  %s5482_s8 = inlined_call_operand.vmem [shape: f32[1,128], index: 8, kind: input, shape index: {}]   ;;  %s5483_s9 = inlined_call_operand.vmem [shape: f32[128,128], index: 9, kind: input, shape index: {}]   ;;  %s5484_s10 = inlined_call_operand.vmem [shape: f32[1,128], index: 10, kind: input, shape index: {}]   ;;  %s5485_s11 = inlined_call_operand.vmem [shape: f32[1,128], index: 11, kind: input, shape index: {}]   ;;  %s5486_s12 = inlined_call_operand.vmem [shape: f32[1,128], index: 12, kind: input, shape index: {}]   ;;  %s5487_s13 = inlined_call_operand.hbm [shape: f32[128,128], index: 13, kind: input, shape index: {}]   ;;  %s5488_s14 = inlined_call_operand.vmem [shape: f32[1,128], index: 14, kind: input, shape index: {}]   ;;  %s5489_s15 = inlined_call_operand.hbm [shape: f32[232,128], index: 15, kind: output, shape index: {}]  }
   0x1   :  { %21 = vsyncpa [#allocation6], 0 }
   0x2   :  { %22 = vsyncpa [#allocation9], 0 }
   0x3   :  { %23 = vsyncpa [#allocation4], 0  ;;  %s3621_s18 = smov [#allocation5]   ;;  %s3622_s20 = smov [#allocation8]  }
   0x4   :  { %s44_s19 = sshll.u32 %s3621_s18, 4  ;;  %s66_s21 = sshll.u32 %s3622_s20, 4  ;;  %s45_s19 = int_to_ptr.vmem [resolvable:$true] %s44_s19  ;;  %s67_s21 = int_to_ptr.vmem [resolvable:$true] %s66_s21 }
   0x5   :  { %s3481_s24 = scalar_lea.hbm %s5477_s3, 16 }
   0x6   :  { %p3482_p0 = scmp.ne.s32.totalorder %s5477_s3, %s3481_s24  ;;  %p3485_p1 = scmp.lt.u32.totalorder %s3481_s24, %s5477_s3 }
   0x8   :  { %p3487_p2 = pnand %p3485_p1, %p3482_p0 }
   0xa   :  { %3490 = shalt.err (!%p3487_p2)
}
   0xb   :  { %s3491_s29 = scalar_lea.vmem %s45_s19, 16  ;;  %s3495_s30 = scalar_lea.vmem %s45_s19, 32 }
   0xc   :  { %p3492_p3 = scmp.ne.s32.totalorder %s45_s19, %s3491_s29  ;;  %p3496_p4 = scmp.lt.s32.totalorder %s45_s19, %s45_s19 }
   0xd   :  { %p3497_p5 = scmp.lt.s32.totalorder %s3495_s30, %s3491_s29 }
   0xf   :  { %p3498_p6 = por %p3497_p5, %p3496_p4 }
  0x11   :  { %p3499_p7 = pnand %p3498_p6, %p3492_p3 }
  0x13   :  { %3502 = shalt.err (!%p3499_p7)
}
  0x14   :  { %47 = dma.hbm_to_vmem [thread:$0]  %s5477_s3, 16, %s45_s19, [#allocation6]  }
  0x15   :  { %s3503_s22 = scalar_lea.hbm %s5480_s6, 16 }
  0x16   :  { %p3504_p8 = scmp.ne.s32.totalorder %s5480_s6, %s3503_s22  ;;  %p3507_p9 = scmp.lt.u32.totalorder %s3503_s22, %s5480_s6 }
  0x18   :  { %p3509_p10 = pnand %p3507_p9, %p3504_p8 }
  0x1a   :  { %3512 = shalt.err (!%p3509_p10)
}
  0x1b   :  { %s3513_s27 = scalar_lea.vmem %s67_s21, 16  ;;  %s3517_s28 = scalar_lea.vmem %s67_s21, 32 }
  0x1c   :  { %p3514_p11 = scmp.ne.s32.totalorder %s67_s21, %s3513_s27  ;;  %p3518_p12 = scmp.lt.s32.totalorder %s67_s21, %s67_s21 }
  0x1d   :  { %p3519_p13 = scmp.lt.s32.totalorder %s3517_s28, %s3513_s27 }
  0x1f   :  { %p3520_p0 = por %p3519_p13, %p3518_p12 }
  0x21   :  { %p3521_p1 = pnand %p3520_p0, %p3514_p11 }
  0x23   :  { %3524 = shalt.err (!%p3521_p1)
}
  0x24   :  { %69 = dma.hbm_to_vmem [thread:$0]  %s5480_s6, 16, %s67_s21, [#allocation9]  }
  0x25   :  { %s3623_s29 = smov [#allocation2]   ;;  %s3624_s16 = smov [#allocation7]  }
  0x26   :  { %s34_s30 = sshll.u32 %s3623_s29, 4  ;;  %s54_s17 = sshll.u32 %s3624_s16, 4  ;;  %s35_s30 = int_to_ptr.vmem [resolvable:$true] %s34_s30  ;;  %s55_s17 = int_to_ptr.vmem [resolvable:$true] %s54_s17 }
  0x27   :  { %s3525_s22 = scalar_lea.hbm %s5476_s2, 16 }
  0x28   :  { %p3526_p2 = scmp.ne.s32.totalorder %s5476_s2, %s3525_s22  ;;  %p3529_p3 = scmp.lt.u32.totalorder %s3525_s22, %s5476_s2 }
  0x2a   :  { %p3531_p4 = pnand %p3529_p3, %p3526_p2 }
  0x2c   :  { %3534 = shalt.err (!%p3531_p4)
}
  0x2d   :  { %s3535_s6 = scalar_lea.vmem %s35_s30, 16  ;;  %s3539_s21 = scalar_lea.vmem %s35_s30, 32 }
  0x2e   :  { %p3536_p5 = scmp.ne.s32.totalorder %s35_s30, %s3535_s6  ;;  %p3540_p6 = scmp.lt.s32.totalorder %s35_s30, %s35_s30 }
  0x2f   :  { %p3541_p7 = scmp.lt.s32.totalorder %s3539_s21, %s3535_s6 }
  0x31   :  { %p3542_p8 = por %p3541_p7, %p3540_p6 }
  0x33   :  { %p3543_p9 = pnand %p3542_p8, %p3536_p5 }
  0x35   :  { %3546 = shalt.err (!%p3543_p9)
}
  0x36   :  { %37 = dma.hbm_to_vmem [thread:$0]  %s5476_s2, 16, %s35_s30, [#allocation3]  }
  0x37   :  { %s3547_s29 = scalar_lea.hbm %s5478_s4, 16 }
  0x38   :  { %p3548_p10 = scmp.ne.s32.totalorder %s5478_s4, %s3547_s29  ;;  %p3551_p11 = scmp.lt.u32.totalorder %s3547_s29, %s5478_s4 }
  0x3a   :  { %p3553_p12 = pnand %p3551_p11, %p3548_p10 }
  0x3c   :  { %3556 = shalt.err (!%p3553_p12)
}
  0x3d   :  { %s3557_s23 = scalar_lea.vmem %s55_s17, 16  ;;  %s3561_s24 = scalar_lea.vmem %s55_s17, 32 }
  0x3e   :  { %p3558_p13 = scmp.ne.s32.totalorder %s55_s17, %s3557_s23  ;;  %p3562_p0 = scmp.lt.s32.totalorder %s55_s17, %s55_s17 }
  0x3f   :  { %p3563_p1 = scmp.lt.s32.totalorder %s3561_s24, %s3557_s23 }
  0x41   :  { %p3564_p2 = por %p3563_p1, %p3562_p0 }
  0x43   :  { %p3565_p3 = pnand %p3564_p2, %p3558_p13 }
  0x45   :  { %3568 = shalt.err (!%p3565_p3)
}
  0x46   :  { %57 = dma.hbm_to_vmem [thread:$0]  %s5478_s4, 16, %s55_s17, [#allocation6]  }
  0x47   :  { %s3625_s25 = smov [#allocation10]   ;;  %s3569_s27 = scalar_lea.hbm %s5487_s13, 2048 }
  0x48   :  { %s87_s26 = sshll.u32 %s3625_s25, 4  ;;  %p3570_p4 = scmp.ne.s32.totalorder %s5487_s13, %s3569_s27  ;;  %s88_s26 = int_to_ptr.vmem [resolvable:$true] %s87_s26 }
  0x49   :  { %p3573_p5 = scmp.lt.u32.totalorder %s3569_s27, %s5487_s13 }
  0x4b   :  { %p3575_p6 = pnand %p3573_p5, %p3570_p4 }
  0x4d   :  { %3578 = shalt.err (!%p3575_p6)
}
  0x4e   :  { %s3579_s16 = scalar_lea.vmem %s88_s26, 2048  ;;  %p3584_p8 = scmp.lt.s32.totalorder %s88_s26, %s88_s26 }
  0x4f   :  { %p3580_p7 = scmp.ne.s32.totalorder %s88_s26, %s3579_s16  ;;  %p3585_p9 = scmp.lt.s32.totalorder %s3579_s16, %s3579_s16 }
  0x51   :  { %p3586_p10 = por %p3585_p9, %p3584_p8 }
  0x53   :  { %p3587_p11 = pnand %p3586_p10, %p3580_p7 }
  0x55   :  { %3590 = shalt.err (!%p3587_p11)
}
  0x56   :  { %s3626_s4 = smov 128   ;;  %s3627_s17 = smov 8  }
  0x57   :  { %93 = dma.hbm_to_vmem [thread:$0]  %s5487_s13, 2048, %s88_s26, [#allocation9], %s3626_s4, %s3626_s4, %s3627_s17  }
  0x58   :  { %3613 = dma.done.wait [#allocation3], 16  }
  0x59   :  { %3614 = vsyncadd [#allocation3], 4294967280 }
  0x5a   :  { %3615 = dma.done.wait [#allocation6], 32  }
  0x5b   :  { %3616 = vsyncadd [#allocation6], 4294967264 }
  0x5c   :  { %3617 = dma.done.wait [#allocation9], 2064  }
  0x5d   :  { %3618 = vsyncadd [#allocation9], 4294965232  ;;  %v3628_v0 = vmov 0   ;;  %v117_v1 = vld [vmem:[%s5474_s0 + $0x8] sm:$0xff]  ;;  %v116_v2 = vld [vmem:[%s5474_s0] sm:$0xff]  ;;  %v3629_v3 = vmov 1  }
  0x5e   :  { %3299 = vset.pattern.permute.xlu1 %v3628_v0  ;;  %3297 = vset.pattern.permute.xlu0 %v3628_v0  ;;  %v118_v4 = vld [vmem:[%s5474_s0 + $0x10] sm:$0xff]  ;;  %v119_v5 = vld [vmem:[%s5474_s0 + $0x18] sm:$0xff]  ;;  %v120_v6 = vld [vmem:[%s5474_s0 + $0x20] sm:$0xff]  ;;  %vm3632_vm1 = vmmov 0  }
  0x5f   :  { %153 = vperm.xlu1 %3299, %v117_v1   ;;  %148 = vperm.xlu0 %3297, %v116_v2   ;;  %v121_v7 = vld [vmem:[%s5474_s0 + $0x28] sm:$0xff]  ;;  %v122_v8 = vld [vmem:[%s5474_s0 + $0x30] sm:$0xff]  ;;  %v123_v9 = vld [vmem:[%s5474_s0 + $0x38] sm:$0xff] }
  0x60   :  { %v3809_v10 = vld [vmem:[%s5474_s0 + $0x40] sm:$0xff]  ;;  %v3815_v11 = vld [vmem:[%s5474_s0 + $0x48] sm:$0xff]  ;;  %v3821_v12 = vld [vmem:[%s5474_s0 + $0x50] sm:$0xff] }
  0x61   :  { %v3827_v13 = vld [vmem:[%s5474_s0 + $0x58] sm:$0xff]  ;;  %v3833_v16 = vld [vmem:[%s5475_s1] ss:$0 sm:$0xff]  ;;  %v3838_v17 = vld [vmem:[%s5475_s1 + $0x1] ss:$0 sm:$0xff] }
  0x62   :  { %v3844_v24 = vld [vmem:[#allocation2] ss:$0 sm:$0xff] }
  0x63   :  { %3300 = vset.pattern.permute.xlu1 %v3629_v3  ;;  %3298 = vset.pattern.permute.xlu0 %v3629_v3 }
  0x64   :  { %330 = vperm.xlu1 %3300, %v117_v1   ;;  %326 = vperm.xlu0 %3298, %v116_v2   ;;  %v128_v2 = vld [vmem:[%s5474_s0 + $0x60] sm:$0xff] }
  0x68   :  { %3301 = vset.pattern.permute.xlu1 %v3628_v0  ;;  %334 = vperm.xlu0 %3298, %v118_v4  }
  0x69   :  { %158 = vperm.xlu1 %3301, %v118_v4   ;;  %v129_v4 = vld [vmem:[%s5474_s0 + $0x68] sm:$0xff] }
  0x6c   :  { %338 = vperm.xlu0 %3298, %v119_v5  }
  0x6d   :  { %163 = vperm.xlu1 %3301, %v119_v5   ;;  %v130_v5 = vld [vmem:[%s5474_s0 + $0x70] sm:$0xff] }
  0x70   :  { %342 = vperm.xlu0 %3298, %v120_v6  }
  0x71   :  { %168 = vperm.xlu1 %3301, %v120_v6   ;;  %v131_v6 = vld [vmem:[%s5474_s0 + $0x78] sm:$0xff] }
  0x74   :  { %346 = vperm.xlu0 %3298, %v121_v7  }
  0x75   :  { %173 = vperm.xlu1 %3301, %v121_v7   ;;  %v132_v7 = vld [vmem:[%s5474_s0 + $0x80] sm:$0xff] }
  0x78   :  { %350 = vperm.xlu0 %3298, %v122_v8  }
  0x79   :  { %178 = vperm.xlu1 %3301, %v122_v8   ;;  %v133_v8 = vld [vmem:[%s5474_s0 + $0x88] sm:$0xff] }
  0x7c   :  { %354 = vperm.xlu0 %3298, %v123_v9  }
  0x7d   :  { %183 = vperm.xlu1 %3301, %v123_v9   ;;  %v134_v9 = vld [vmem:[%s5474_s0 + $0x90] sm:$0xff] }
  0x80   :  { %358 = vperm.xlu0 %3298, %v3809_v10  }
  0x84   :  { %362 = vperm.xlu0 %3298, %v3815_v11  }
  0x88   :  { %366 = vperm.xlu0 %3298, %v3821_v12  }
  0x8c   :  { %370 = vperm.xlu0 %3298, %v3827_v13  }
  0xde   :  { %v154_v14 = vpop.permute.xlu1 %153  ;;  %v149_v15 = vpop.permute.xlu0 %148 }
  0xdf   :  { %v296_v20 = vmul.f32 %v3833_v16, %v154_v14  ;;  %v295_v21 = vmul.f32 %v3833_v16, %v149_v15  ;;  %v137_v14 = vld [vmem:[%s5474_s0 + $0xa8] sm:$0xff] }
  0xe0   :  { %v141_v15 = vld [vmem:[%s5474_s0 + $0xc8] sm:$0xff] }
  0xe3   :  { %v331_v18 = vpop.permute.xlu1 %330  ;;  %v327_v19 = vpop.permute.xlu0 %326 }
  0xe4   :  { %v446_v22 = vmul.f32 %v3838_v17, %v331_v18  ;;  %v445_v23 = vmul.f32 %v3838_v17, %v327_v19  ;;  %v142_v18 = vld [vmem:[%s5474_s0 + $0xd0] sm:$0xff] }
  0xe6   :  { %v475_v25 = vadd.f32 %v446_v22, %v296_v20  ;;  %v474_v26 = vadd.f32 %v445_v23, %v295_v21 }
  0xe7   :  { %v335_v27 = vpop.permute.xlu0 %334 }
  0xe8   :  { %v447_v28 = vmul.f32 %v3838_v17, %v335_v27  ;;  %v159_v29 = vpop.permute.xlu1 %158  ;;  %v3848_v30 = vadd.f32 %v3844_v24, %v475_v25  ;;  %v3851_v31 = vadd.f32 %v3844_v24, %v474_v26 }
  0xe9   :  { %v297_v32 = vmul.f32 %v3833_v16, %v159_v29 }
  0xea   :  { %541 = vadd.xlane.f32.xlu0 %v3848_v30  ;;  %539 = vadd.xlane.f32.xlu1 %v3851_v31 }
  0xeb   :  { %v476_v33 = vadd.f32 %v447_v28, %v297_v32  ;;  %v339_v34 = vpop.permute.xlu0 %338 }
  0xec   :  { %v448_v35 = vmul.f32 %v3838_v17, %v339_v34  ;;  %v164_v36 = vpop.permute.xlu1 %163 }
  0xed   :  { %v298_v37 = vmul.f32 %v3833_v16, %v164_v36  ;;  %v3859_v38 = vadd.f32 %v3844_v24, %v476_v33 }
  0xef   :  { %v477_v39 = vadd.f32 %v448_v35, %v298_v37  ;;  %543 = vadd.xlane.f32.xlu1 %v3859_v38  ;;  %v343_v40 = vpop.permute.xlu0 %342 }
  0xf0   :  { %v449_v41 = vmul.f32 %v3838_v17, %v343_v40  ;;  %v169_v42 = vpop.permute.xlu1 %168 }
  0xf1   :  { %v299_v43 = vmul.f32 %v3833_v16, %v169_v42  ;;  %v3865_v44 = vadd.f32 %v3844_v24, %v477_v39 }
  0xf3   :  { %v478_v45 = vadd.f32 %v449_v41, %v299_v43  ;;  %545 = vadd.xlane.f32.xlu0 %v3865_v44  ;;  %v347_v46 = vpop.permute.xlu0 %346  ;;  %v138_v43 = vld [vmem:[%s5474_s0 + $0xb0] sm:$0xff] }
  0xf4   :  { %v450_v47 = vmul.f32 %v3838_v17, %v347_v46  ;;  %v174_v48 = vpop.permute.xlu1 %173 }
  0xf5   :  { %v300_v49 = vmul.f32 %v3833_v16, %v174_v48  ;;  %v3871_v50 = vadd.f32 %v3844_v24, %v478_v45  ;;  %v143_v48 = vld [vmem:[%s5474_s0 + $0xd8] sm:$0xff] }
  0xf7   :  { %v479_v51 = vadd.f32 %v450_v47, %v300_v49  ;;  %547 = vadd.xlane.f32.xlu1 %v3871_v50  ;;  %v351_v52 = vpop.permute.xlu0 %350 }
  0xf8   :  { %v451_v53 = vmul.f32 %v3838_v17, %v351_v52  ;;  %v179_v54 = vpop.permute.xlu1 %178  ;;  %v144_v52 = vld [vmem:[%s5474_s0 + $0xe0] sm:$0xff] }
  0xf9   :  { %v301_v55 = vmul.f32 %v3833_v16, %v179_v54  ;;  %v3877_v56 = vadd.f32 %v3844_v24, %v479_v51 }
  0xfb   :  { %v480_v57 = vadd.f32 %v451_v53, %v301_v55  ;;  %549 = vadd.xlane.f32.xlu1 %v3877_v56  ;;  %v355_v58 = vpop.permute.xlu0 %354 }
  0xfc   :  { %v452_v59 = vmul.f32 %v3838_v17, %v355_v58  ;;  %v184_v60 = vpop.permute.xlu1 %183 }
  0xfd   :  { %v302_v61 = vmul.f32 %v3833_v16, %v184_v60  ;;  %v3883_v62 = vadd.f32 %v3844_v24, %v480_v57 }
  0xff   :  { %v481_v63 = vadd.f32 %v452_v59, %v302_v61  ;;  %551 = vadd.xlane.f32.xlu0 %v3883_v62  ;;  %v359_v23 = vpop.permute.xlu0 %358 }
 0x100   :  { %v453_v27 = vmul.f32 %v3838_v17, %v359_v23 }
 0x101   :  { %v3887_v1 = vadd.f32 %v3844_v24, %v481_v63 }
 0x103   :  { %553 = vadd.xlane.f32.xlu1 %v3887_v1  ;;  %v363_v29 = vpop.permute.xlu0 %362 }
 0x104   :  { %v454_v34 = vmul.f32 %v3838_v17, %v363_v29 }
 0x107   :  { %v367_v40 = vpop.permute.xlu0 %366 }
 0x10b   :  { %v371_v41 = vpop.permute.xlu0 %370 }
 0x114   :  { %188 = vperm.xlu1 %3301, %v3809_v10   ;;  %v135_v10 = vld [vmem:[%s5474_s0 + $0x98] sm:$0xff] }
 0x115   :  { %374 = vperm.xlu0 %3298, %v128_v2  }
 0x118   :  { %193 = vperm.xlu1 %3301, %v3815_v11   ;;  %v136_v11 = vld [vmem:[%s5474_s0 + $0xa0] sm:$0xff] }
 0x119   :  { %378 = vperm.xlu0 %3298, %v129_v4  }
 0x11c   :  { %198 = vperm.xlu1 %3301, %v3821_v12   ;;  %v139_v12 = vld [vmem:[%s5474_s0 + $0xb8] sm:$0xff] }
 0x11d   :  { %382 = vperm.xlu0 %3298, %v130_v5  }
 0x120   :  { %203 = vperm.xlu1 %3301, %v3827_v13   ;;  %v140_v13 = vld [vmem:[%s5474_s0 + $0xc0] sm:$0xff] }
 0x121   :  { %386 = vperm.xlu0 %3298, %v131_v6  }
 0x124   :  { %208 = vperm.xlu1 %3301, %v128_v2  }
 0x125   :  { %390 = vperm.xlu0 %3298, %v132_v7  }
 0x128   :  { %213 = vperm.xlu1 %3301, %v129_v4   ;;  %v455_v4 = vmul.f32 %v3838_v17, %v367_v40 }
 0x129   :  { %394 = vperm.xlu0 %3298, %v133_v8  }
 0x12c   :  { %218 = vperm.xlu1 %3301, %v130_v5  }
 0x12d   :  { %398 = vperm.xlu0 %3298, %v134_v9  }
 0x130   :  { %223 = vperm.xlu1 %3301, %v131_v6  }
 0x131   :  { %402 = vperm.xlu0 %3298, %v135_v10  }
 0x134   :  { %228 = vperm.xlu1 %3301, %v132_v7  }
 0x135   :  { %406 = vperm.xlu0 %3298, %v136_v11  }
 0x138   :  { %233 = vperm.xlu1 %3301, %v133_v8  }
 0x139   :  { %418 = vperm.xlu0 %3298, %v139_v12  }
 0x13c   :  { %243 = vperm.xlu1 %3301, %v135_v10  }
 0x13d   :  { %422 = vperm.xlu0 %3298, %v140_v13  }
 0x140   :  { %253 = vperm.xlu1 %3301, %v137_v14  }
 0x141   :  { %426 = vperm.xlu0 %3298, %v141_v15  }
 0x144   :  { %268 = vperm.xlu1 %3301, %v140_v13  }
 0x145   :  { %3302 = vset.pattern.permute.xlu0 %v3628_v0 }
 0x148   :  { %278 = vperm.xlu1 %3301, %v142_v18  }
 0x14c   :  { %3303 = vset.pattern.permute.xlu1 %v3629_v3 }
 0x177   :  { %v3938_v19 = vpop.xlane.xlu1 %539  ;;  %v3960_v42 = vpop.xlane.xlu0 %541 }
 0x17c   :  { %v3940_v20 = vpop.xlane.xlu1 %543 }
 0x180   :  { %v3965_v45 = vpop.xlane.xlu0 %545 }
 0x184   :  { %v3942_v21 = vpop.xlane.xlu1 %547 }
 0x188   :  { %v3944_v22 = vpop.xlane.xlu1 %549 }
 0x18c   :  { %v3967_v47 = vpop.xlane.xlu0 %551 }
 0x190   :  { %v3946_v25 = vpop.xlane.xlu1 %553 }
 0x194   :  { %v189_v26 = vpop.permute.xlu1 %188  ;;  %v375_v51 = vpop.permute.xlu0 %374 }
 0x195   :  { %v303_v28 = vmul.f32 %v3833_v16, %v189_v26  ;;  %v457_v8 = vmul.f32 %v3838_v17, %v375_v51  ;;  %v598_v51 = vmul.f32 0.125, %v3960_v42 }
 0x197   :  { %v482_v32 = vadd.f32 %v453_v27, %v303_v28 }
 0x198   :  { %v194_v33 = vpop.permute.xlu1 %193  ;;  %v379_v54 = vpop.permute.xlu0 %378 }
 0x199   :  { %v304_v35 = vmul.f32 %v3833_v16, %v194_v33  ;;  %v3953_v36 = vadd.f32 %v3844_v24, %v482_v32 }
 0x19b   :  { %v483_v37 = vadd.f32 %v454_v34, %v304_v35  ;;  %555 = vadd.xlane.f32.xlu0 %v3953_v36  ;;  %v597_v34 = vmul.f32 0.125, %v3938_v19 }
 0x19c   :  { %v199_v46 = vpop.permute.xlu1 %198  ;;  %v383_v57 = vpop.permute.xlu0 %382 }
 0x19d   :  { %v3957_v39 = vadd.f32 %v3844_v24, %v483_v37  ;;  %v305_v2 = vmul.f32 %v3833_v16, %v199_v46  ;;  %v459_v37 = vmul.f32 %v3838_v17, %v383_v57  ;;  %v5492_v57 = vmov 0.0  }
 0x19e   :  { %2871 = vmatprep.mubr.msk.f32.mxu0 %vm3632_vm1, %v5492_v57  ;;  %2916 = vmatprep.mubr.msk.f32.mxu1 %vm3632_vm1, %v5492_v57 }
 0x19f   :  { %557 = vadd.xlane.f32.xlu1 %v3957_v39  ;;  %v484_v5 = vadd.f32 %v455_v4, %v305_v2 }
 0x1a0   :  { %v204_v49 = vpop.permute.xlu1 %203  ;;  %v387_v59 = vpop.permute.xlu0 %386 }
 0x1a4   :  { %v209_v53 = vpop.permute.xlu1 %208  ;;  %v391_v61 = vpop.permute.xlu0 %390 }
 0x1a5   :  { %v307_v6 = vmul.f32 %v3833_v16, %v209_v53  ;;  %v460_v53 = vmul.f32 %v3838_v17, %v387_v59  ;;  %v4029_v59 = vsub.f32 %v3848_v30, %v598_v51  ;;  %v461_v4 = vmul.f32 %v3838_v17, %v391_v61 }
 0x1a6   :  { %v604_v51 = vmul.f32 0.125, %v3946_v25 }
 0x1a8   :  { %v214_v55 = vpop.permute.xlu1 %213 }
 0x1a9   :  { %v308_v13 = vmul.f32 %v3833_v16, %v214_v55 }
 0x1ac   :  { %v219_v58 = vpop.permute.xlu1 %218 }
 0x1ad   :  { %v309_v32 = vmul.f32 %v3833_v16, %v219_v58 }
 0x1af   :  { %v488_v46 = vadd.f32 %v459_v37, %v309_v32  ;;  %v990_v32 = vld [vmem:[%s5479_s5 + $0x10] sm:$0xff]  ;;  %v603_v37 = vmul.f32 0.125, %v3967_v47 }
 0x1b0   :  { %410 = vperm.xlu1 %3303, %v137_v14   ;;  %v224_v60 = vpop.permute.xlu1 %223  ;;  %v3988_v14 = vadd.f32 %v3844_v24, %v484_v5 }
 0x1b1   :  { %238 = vperm.xlu0 %3302, %v134_v9   ;;  %v306_v9 = vmul.f32 %v3833_v16, %v204_v49  ;;  %v4026_v42 = vadd.f32 %v3844_v24, %v488_v46  ;;  %v992_v46 = vld [vmem:[%s5479_s5 + $0x20] sm:$0xff] }
 0x1b4   :  { %414 = vperm.xlu1 %3303, %v138_v43   ;;  %v229_v63 = vpop.permute.xlu1 %228 }
 0x1b5   :  { %248 = vperm.xlu0 %3302, %v136_v11   ;;  %v456_v11 = vmul.f32 %v3838_v17, %v371_v41  ;;  %v311_v2 = vmul.f32 %v3833_v16, %v229_v63 }
 0x1b8   :  { %430 = vperm.xlu1 %3303, %v142_v18   ;;  %v234_v7 = vpop.permute.xlu1 %233  ;;  %v485_v18 = vadd.f32 %v456_v11, %v306_v9 }
 0x1b9   :  { %258 = vperm.xlu0 %3302, %v138_v43   ;;  %v312_v23 = vmul.f32 %v3833_v16, %v234_v7 }
 0x1ba   :  { %v4003_v43 = vadd.f32 %v3844_v24, %v485_v18  ;;  %v989_v18 = vld [vmem:[%s5479_s5 + $0x8] sm:$0xff] }
 0x1bc   :  { %434 = vperm.xlu1 %3303, %v143_v48   ;;  %v244_v26 = vpop.permute.xlu1 %243 }
 0x1bd   :  { %263 = vperm.xlu0 %3302, %v139_v12   ;;  %v486_v12 = vadd.f32 %v457_v8, %v307_v6  ;;  %v314_v41 = vmul.f32 %v3833_v16, %v244_v26  ;;  %v490_v6 = vadd.f32 %v461_v4, %v311_v2  ;;  %v5490_v26 = vmov 0.0|0.0   ;;  %v995_v2 = vld [vmem:[%s5479_s5 + $0x38] sm:$0xff] }
 0x1be   :  { %3196 = vmatprep.subr.bf16.mxu0 %v5490_v26  ;;  %3268 = vmatprep.subr.bf16.mxu1 %v5490_v26 }
 0x1bf   :  { %v3996_v33 = vadd.f32 %v3844_v24, %v486_v12  ;;  %v601_v12 = vmul.f32 0.125, %v3942_v21 }
 0x1c0   :  { %3304 = vset.pattern.permute.xlu1 %v3628_v0  ;;  %v395_v0 = vpop.permute.xlu0 %394 }
 0x1c1   :  { %273 = vperm.xlu0 %3302, %v141_v15   ;;  %288 = vperm.xlu1 %3304, %v144_v52   ;;  %v458_v15 = vmul.f32 %v3838_v17, %v379_v54  ;;  %v462_v29 = vmul.f32 %v3838_v17, %v395_v0  ;;  %v599_v0 = vmul.f32 0.125, %v3940_v20  ;;  %v600_v20 = vmul.f32 0.125, %v3965_v45 }
 0x1c2   :  { %v4069_v21 = vsub.f32 %v3871_v50, %v601_v12 }
 0x1c3   :  { %v487_v28 = vadd.f32 %v458_v15, %v308_v13  ;;  %v491_v40 = vadd.f32 %v462_v29, %v312_v23  ;;  %v4044_v8 = vsub.f32 %v3859_v38, %v599_v0  ;;  %v4054_v11 = vsub.f32 %v3865_v44, %v600_v20  ;;  %v988_v15 = vld [vmem:[%s5479_s5] sm:$0xff]  ;;  %v997_v20 = vld [vmem:[%s5479_s5 + $0x48] sm:$0xff] }
 0x1c4   :  { %v3983_v10 = vpop.permute.xlu0 %398  ;;  %v3197_v23 = vpack.c.bf16 %v989_v18, %v988_v15  ;;  %v4111_v0 = vsub.f32 %v3887_v1, %v604_v51 }
 0x1c5   :  { %283 = vperm.xlu0 %3302, %v143_v48   ;;  %3305 = vset.pattern.permute.xlu1 %v3629_v3  ;;  %v310_v48 = vmul.f32 %v3833_v16, %v224_v60  ;;  %v4009_v19 = vadd.f32 %v3844_v24, %v487_v28  ;;  %v4018_v55 = vadd.f32 %v3844_v24, %v491_v40 }
 0x1c6   :  { %438 = vperm.xlu1 %3305, %v144_v52   ;;  %v4013_v52 = vsub.f32 %v3851_v31, %v597_v34  ;;  %3198 = vmatpush3.bf16.msra.mxu0 %v3197_v23  ;;  %v991_v34 = vld [vmem:[%s5479_s5 + $0x18] sm:$0xff] }
 0x1c7   :  { %5511 = vst [vmem:[#allocation16_spill] sm:$0xff] %v4018_v55  ;;  %v489_v60 = vadd.f32 %v460_v53, %v310_v48  ;;  %3276 = vmatpush3.bf16.msra.mxu1 %v3197_v23  ;;  %3199 = vmatprep.subr.bf16.mxu0 %v5490_v26  ;;  %v993_v48 = vld [vmem:[%s5479_s5 + $0x28] sm:$0xff]  ;;  %v1000_v23 = vld [vmem:[%s5479_s5 + $0x60] sm:$0xff] }
 0x1c8   :  { %v403_v35 = vpop.permute.xlu0 %402  ;;  %3269 = vmatprep.subr.bf16.mxu1 %v5490_v26  ;;  %v3203_v47 = vpack.c.bf16 %v993_v48, %v992_v46 }
 0x1c9   :  { %3306 = vset.pattern.permute.xlu0 %v3629_v3  ;;  %v111_v3 = vlaneseq  ;;  %v464_v49 = vmul.f32 %v3838_v17, %v403_v35  ;;  %v4041_v7 = vadd.f32 %v3844_v24, %v489_v60  ;;  %v994_v60 = vld [vmem:[%s5479_s5 + $0x30] sm:$0xff] }
 0x1ca   :  { %v3206_v25 = vpack.c.bf16 %v995_v2, %v994_v60 }
 0x1cb   :  { %v112_v27 = vand.u32 127, %v111_v3  ;;  %v493_v54 = vadd.f32 %v464_v49, %v314_v41  ;;  %v4051_v3 = vadd.f32 %v3844_v24, %v490_v6  ;;  %v4097_v49 = vsub.f32 %v3883_v62, %v603_v37  ;;  %v996_v6 = vld [vmem:[%s5479_s5 + $0x40] sm:$0xff] }
 0x1cd   :  { %vm113_vm0 = vcmp.lt.s32.totalorder %v112_v27, 8  ;;  %v4035_v5 = vadd.f32 %v3844_v24, %v493_v54  ;;  %v602_v27 = vmul.f32 0.125, %v3944_v22  ;;  %v3200_v22 = vpack.c.bf16 %v991_v34, %v990_v32  ;;  %v1002_v32 = vld [vmem:[%s5479_s5 + $0x70] sm:$0xff]  ;;  %v1003_v34 = vld [vmem:[%s5479_s5 + $0x78] sm:$0xff] }
 0x1ce   :  { %v4021_v58 = vsel %vm113_vm0, 1.0, %v5492_v57 }
 0x1cf   :  { %5512 = vst [vmem:[#allocation17_spill] sm:$0xff] %v4035_v5  ;;  %v655_v63 = vmul.f32 %v4021_v58, %v4013_v52  ;;  %v656_v9 = vmul.f32 %v4021_v58, %v4029_v59  ;;  %v657_v45 = vmul.f32 %v4021_v58, %v4044_v8  ;;  %v658_v29 = vmul.f32 %v4021_v58, %v4054_v11 }
 0x1d0   :  { %v4083_v35 = vsub.f32 %v3877_v56, %v602_v27  ;;  %v659_v41 = vmul.f32 %v4021_v58, %v4069_v21  ;;  %3201 = vmatpush3.bf16.msra.mxu0 %v3200_v22  ;;  %3277 = vmatpush3.bf16.msra.mxu1 %v3200_v22  ;;  %v662_v12 = vmul.f32 %v4021_v58, %v4111_v0  ;;  %v1001_v27 = vld [vmem:[%s5479_s5 + $0x68] sm:$0xff] }
 0x1d1   :  { %v684_v61 = vmul.f32 %v655_v63, %v655_v63  ;;  %v685_v13 = vmul.f32 %v656_v9, %v656_v9  ;;  %v686_v28 = vmul.f32 %v657_v45, %v657_v45  ;;  %v687_v40 = vmul.f32 %v658_v29, %v658_v29  ;;  %3202 = vmatprep.subr.bf16.mxu0 %v5490_v26  ;;  %v999_v45 = vld [vmem:[%s5479_s5 + $0x58] sm:$0xff] }
 0x1d2   :  { %3270 = vmatprep.subr.bf16.mxu1 %v5490_v26  ;;  %v688_v53 = vmul.f32 %v659_v41, %v659_v41  ;;  %v660_v54 = vmul.f32 %v4021_v58, %v4083_v35  ;;  %v661_v63 = vmul.f32 %v4021_v58, %v4097_v49  ;;  %v691_v18 = vmul.f32 %v662_v12, %v662_v12 }
 0x1d3   :  { %v3215_v29 = vpack.c.bf16 %v1001_v27, %v1000_v23  ;;  %v3218_v22 = vpack.c.bf16 %v1003_v34, %v1002_v32 }
 0x1d4   :  { %3204 = vmatpush3.bf16.msra.mxu0 %v3203_v47  ;;  %3278 = vmatpush3.bf16.msra.mxu1 %v3203_v47  ;;  %v689_v4 = vmul.f32 %v660_v54, %v660_v54  ;;  %v690_v9 = vmul.f32 %v661_v63, %v661_v63 }
 0x1d5   :  { %3205 = vmatprep.subr.bf16.mxu0 %v5490_v26  ;;  %3271 = vmatprep.subr.bf16.mxu1 %v5490_v26 }
 0x1d8   :  { %3207 = vmatpush3.bf16.msra.mxu0 %v3206_v25  ;;  %3279 = vmatpush3.bf16.msra.mxu1 %v3206_v25 }
 0x1d9   :  { %3208 = vmatprep.subr.bf16.mxu0 %v5490_v26  ;;  %3272 = vmatprep.subr.bf16.mxu1 %v5490_v26 }
 0x1e4   :  { %559 = vadd.xlane.f32.xlu0 %v3988_v14 }
 0x1e8   :  { %563 = vadd.xlane.f32.xlu0 %v3996_v33 }
 0x1ea   :  { %561 = vadd.xlane.f32.xlu1 %v4003_v43 }
 0x1ec   :  { %565 = vadd.xlane.f32.xlu0 %v4009_v19 }
 0x1ee   :  { %573 = vadd.xlane.f32.xlu1 %v4018_v55 }
 0x1f0   :  { %567 = vadd.xlane.f32.xlu0 %v4026_v42 }
 0x1f2   :  { %577 = vadd.xlane.f32.xlu1 %v4035_v5 }
 0x1f4   :  { %569 = vadd.xlane.f32.xlu0 %v4041_v7 }
 0x1f6   :  { %713 = vadd.xlane.f32.xlu1 %v684_v61  ;;  %v3209_v61 = vpack.c.bf16 %v997_v20, %v996_v6  ;;  %v463_v6 = vmul.f32 %v3838_v17, %v3983_v10 }
 0x1f8   :  { %571 = vadd.xlane.f32.xlu0 %v4051_v3  ;;  %3210 = vmatpush3.bf16.msra.mxu0 %v3209_v61 }
 0x1f9   :  { %3280 = vmatpush3.bf16.msra.mxu1 %v3209_v61  ;;  %3211 = vmatprep.subr.bf16.mxu0 %v5490_v26 }
 0x1fa   :  { %715 = vadd.xlane.f32.xlu1 %v685_v13  ;;  %v998_v13 = vld [vmem:[%s5479_s5 + $0x50] sm:$0xff]  ;;  %3273 = vmatprep.subr.bf16.mxu1 %v5490_v26 }
 0x1fb   :  { %v3212_v15 = vpack.c.bf16 %v999_v45, %v998_v13 }
 0x1fd   :  { %3213 = vmatpush3.bf16.msra.mxu0 %v3212_v15  ;;  %3281 = vmatpush3.bf16.msra.mxu1 %v3212_v15 }
 0x1fe   :  { %717 = vadd.xlane.f32.xlu1 %v686_v28  ;;  %3214 = vmatprep.subr.bf16.mxu0 %v5490_v26  ;;  %v407_v28 = vpop.permute.xlu0 %406 }
 0x1ff   :  { %3274 = vmatprep.subr.bf16.mxu1 %v5490_v26  ;;  %v465_v12 = vmul.f32 %v3838_v17, %v407_v28 }
 0x201   :  { %3216 = vmatpush3.bf16.msra.mxu0 %v3215_v29  ;;  %3282 = vmatpush3.bf16.msra.mxu1 %v3215_v29 }
 0x202   :  { %719 = vadd.xlane.f32.xlu1 %v687_v40  ;;  %3217 = vmatprep.subr.bf16.mxu0 %v5490_v26  ;;  %v419_v37 = vpop.permute.xlu0 %418  ;;  %v254_v40 = vpop.permute.xlu1 %253 }
 0x203   :  { %3275 = vmatprep.subr.bf16.mxu1 %v5490_v26  ;;  %v316_v23 = vmul.f32 %v3833_v16, %v254_v40 }
 0x205   :  { %3219 = vmatpush3.bf16.msra.mxu0 %v3218_v22  ;;  %3283 = vmatpush3.bf16.msra.mxu1 %v3218_v22 }
 0x206   :  { %721 = vadd.xlane.f32.xlu1 %v688_v53  ;;  %3220 = vmatprep.subr.bf16.mxu1 %v5490_v26  ;;  %v423_v41 = vpop.permute.xlu0 %422  ;;  %v269_v46 = vpop.permute.xlu1 %268 }
 0x207   :  { %3244 = vmatprep.subr.bf16.mxu0 %v5490_v26 }
 0x20a   :  { %723 = vadd.xlane.f32.xlu1 %v689_v4  ;;  %v427_v48 = vpop.permute.xlu0 %426  ;;  %v279_v47 = vpop.permute.xlu1 %278 }
 0x20e   :  { %725 = vadd.xlane.f32.xlu1 %v690_v9 }
 0x212   :  { %727 = vadd.xlane.f32.xlu1 %v691_v18 }
 0x228   :  { %v556_v51 = vpop.xlane.xlu0 %555 }
 0x229   :  { %v605_v53 = vmul.f32 0.125, %v556_v51 }
 0x22b   :  { %v4156_v54 = vsub.f32 %v3953_v36, %v605_v53 }
 0x22c   :  { %v558_v60 = vpop.xlane.xlu1 %557 }
 0x22d   :  { %v663_v2 = vmul.f32 %v4021_v58, %v4156_v54 }
 0x22f   :  { %v692_v25 = vmul.f32 %v663_v2, %v663_v2 }
 0x230   :  { %v411_v4 = vpop.permute.xlu1 %410  ;;  %v239_v63 = vpop.permute.xlu0 %238 }
 0x231   :  { %v313_v20 = vmul.f32 %v3833_v16, %v239_v63  ;;  %729 = vadd.xlane.f32.xlu1 %v692_v25  ;;  %v466_v13 = vmul.f32 %v3838_v17, %v411_v4  ;;  %v468_v25 = vmul.f32 %v3838_v17, %v419_v37  ;;  %v319_v4 = vmul.f32 %v3833_v16, %v269_v46 }
 0x233   :  { %v492_v61 = vadd.f32 %v463_v6, %v313_v20  ;;  %v495_v29 = vadd.f32 %v466_v13, %v316_v23 }
 0x234   :  { %v249_v9 = vpop.permute.xlu0 %248  ;;  %v415_v18 = vpop.permute.xlu1 %414 }
 0x235   :  { %v315_v45 = vmul.f32 %v3833_v16, %v249_v9  ;;  %v4167_v15 = vadd.f32 %v3844_v24, %v492_v61  ;;  %v467_v32 = vmul.f32 %v3838_v17, %v415_v18  ;;  %v4179_v40 = vadd.f32 %v3844_v24, %v495_v29 }
 0x236   :  { %v469_v9 = vmul.f32 %v3838_v17, %v423_v41  ;;  %v470_v18 = vmul.f32 %v3838_v17, %v427_v48 }
 0x237   :  { %v494_v27 = vadd.f32 %v465_v12, %v315_v45  ;;  %575 = vadd.xlane.f32.xlu0 %v4167_v15 }
 0x238   :  { %v259_v10 = vpop.permute.xlu0 %258  ;;  %v431_v22 = vpop.permute.xlu1 %430  ;;  %v498_v12 = vadd.f32 %v469_v9, %v319_v4 }
 0x239   :  { %v317_v34 = vmul.f32 %v3833_v16, %v259_v10  ;;  %v4174_v28 = vadd.f32 %v3844_v24, %v494_v27  ;;  %v471_v46 = vmul.f32 %v3838_v17, %v431_v22  ;;  %v321_v10 = vmul.f32 %v3833_v16, %v279_v47 }
 0x23a   :  { %v4197_v27 = vadd.f32 %v3844_v24, %v498_v12 }
 0x23b   :  { %579 = vadd.xlane.f32.xlu0 %v4174_v28  ;;  %v496_v53 = vadd.f32 %v467_v32, %v317_v34  ;;  %v500_v32 = vadd.f32 %v471_v46, %v321_v10 }
 0x23c   :  { %v264_v51 = vpop.permute.xlu0 %263  ;;  %v435_v20 = vpop.permute.xlu1 %434 }
 0x23d   :  { %v318_v2 = vmul.f32 %v3833_v16, %v264_v51  ;;  %v4185_v6 = vadd.f32 %v3844_v24, %v496_v53  ;;  %v472_v48 = vmul.f32 %v3838_v17, %v435_v20  ;;  %v4210_v47 = vadd.f32 %v3844_v24, %v500_v32 }
 0x23f   :  { %581 = vadd.xlane.f32.xlu0 %v4179_v40  ;;  %v497_v63 = vadd.f32 %v468_v25, %v318_v2  ;;  %v606_v2 = vmul.f32 0.125, %v558_v60  ;;  %5513 = vst [vmem:[#allocation18_spill] sm:$0xff] %v4210_v47 }
 0x240   :  { %v274_v61 = vpop.permute.xlu0 %273  ;;  %v289_v37 = vpop.permute.xlu1 %288 }
 0x241   :  { %v320_v13 = vmul.f32 %v3833_v16, %v274_v61  ;;  %v4191_v45 = vadd.f32 %v3844_v24, %v497_v63  ;;  %v323_v22 = vmul.f32 %v3833_v16, %v289_v37  ;;  %v4214_v63 = vsub.f32 %v3957_v39, %v606_v2 }
 0x243   :  { %583 = vadd.xlane.f32.xlu0 %v4185_v6  ;;  %v499_v23 = vadd.f32 %v470_v18, %v320_v13 }
 0x244   :  { %v284_v41 = vpop.permute.xlu0 %283 }
 0x245   :  { %v439_v29 = vpop.permute.xlu1 %438  ;;  %v322_v34 = vmul.f32 %v3833_v16, %v284_v41  ;;  %v4203_v51 = vadd.f32 %v3844_v24, %v499_v23 }
 0x246   :  { %v473_v53 = vmul.f32 %v3838_v17, %v439_v29  ;;  %v664_v17 = vmul.f32 %v4021_v58, %v4214_v63 }
 0x247   :  { %585 = vadd.xlane.f32.xlu0 %v4191_v45  ;;  %v501_v25 = vadd.f32 %v472_v48, %v322_v34 }
 0x248   :  { %v502_v4 = vadd.f32 %v473_v53, %v323_v22  ;;  %v693_v60 = vmul.f32 %v664_v17, %v664_v17 }
 0x249   :  { %v4217_v61 = vadd.f32 %v3844_v24, %v501_v25 }
 0x24a   :  { %v4221_v16 = vadd.f32 %v3844_v24, %v502_v4 }
 0x24b   :  { %587 = vadd.xlane.f32.xlu0 %v4197_v27  ;;  %5514 = vst [vmem:[#allocation19_spill] sm:$0xff] %v4217_v61 }
 0x24c   :  { %5515 = vst [vmem:[#allocation20_spill] sm:$0xff] %v4221_v16 }
 0x24f   :  { %589 = vadd.xlane.f32.xlu0 %v4203_v51 }
 0x253   :  { %591 = vadd.xlane.f32.xlu0 %v4210_v47 }
 0x257   :  { %593 = vadd.xlane.f32.xlu0 %v4217_v61 }
 0x25b   :  { %595 = vadd.xlane.f32.xlu0 %v4221_v16 }
 0x25f   :  { %731 = vadd.xlane.f32.xlu0 %v693_v60 }
 0x271   :  { %v560_v20 = vpop.xlane.xlu0 %559 }
 0x272   :  { %v607_v9 = vmul.f32 0.125, %v560_v20 }
 0x274   :  { %v4227_v12 = vsub.f32 %v3988_v14, %v607_v9 }
 0x275   :  { %v564_v13 = vpop.xlane.xlu0 %563 }
 0x276   :  { %v609_v37 = vmul.f32 0.125, %v564_v13  ;;  %v665_v18 = vmul.f32 %v4021_v58, %v4227_v12 }
 0x277   :  { %v562_v46 = vpop.xlane.xlu1 %561 }
 0x278   :  { %v4232_v24 = vsub.f32 %v3996_v33, %v609_v37  ;;  %v608_v23 = vmul.f32 0.125, %v562_v46  ;;  %v694_v41 = vmul.f32 %v665_v18, %v665_v18 }
 0x279   :  { %v566_v10 = vpop.xlane.xlu0 %565 }
 0x27a   :  { %v4235_v29 = vsub.f32 %v4003_v43, %v608_v23  ;;  %v610_v32 = vmul.f32 0.125, %v566_v10  ;;  %733 = vadd.xlane.f32.xlu1 %v694_v41  ;;  %v667_v34 = vmul.f32 %v4021_v58, %v4232_v24 }
 0x27b   :  { %v574_v48 = vpop.xlane.xlu1 %573 }
 0x27c   :  { %v4240_v22 = vsub.f32 %v4009_v19, %v610_v32  ;;  %v696_v53 = vmul.f32 %v667_v34, %v667_v34  ;;  %v666_v2 = vmul.f32 %v4021_v58, %v4235_v29  ;;  %v614_v20 = vmul.f32 0.125, %v574_v48 }
 0x27d   :  { %v568_v25 = vpop.xlane.xlu0 %567 }
 0x27e   :  { %v611_v4 = vmul.f32 0.125, %v568_v25  ;;  %737 = vadd.xlane.f32.xlu1 %v696_v53  ;;  %v695_v17 = vmul.f32 %v666_v2, %v666_v2  ;;  %v668_v60 = vmul.f32 %v4021_v58, %v4240_v22  ;;  %v4252_v41 = vsub.f32 %v4018_v55, %v614_v20 }
 0x27f   :  { %v578_v9 = vpop.xlane.xlu1 %577 }
 0x280   :  { %v4247_v13 = vsub.f32 %v4026_v42, %v611_v4  ;;  %735 = vadd.xlane.f32.xlu0 %v695_v17  ;;  %v697_v46 = vmul.f32 %v668_v60, %v668_v60  ;;  %v616_v10 = vmul.f32 0.125, %v578_v9  ;;  %v672_v9 = vmul.f32 %v4021_v58, %v4252_v41 }
 0x281   :  { %v570_v37 = vpop.xlane.xlu0 %569 }
 0x282   :  { %v612_v18 = vmul.f32 0.125, %v570_v37  ;;  %v669_v23 = vmul.f32 %v4021_v58, %v4247_v13  ;;  %v4260_v60 = vsub.f32 %v4035_v5, %v616_v10 }
 0x283   :  { %v714_v32 = vpop.xlane.xlu1 %713 }
 0x284   :  { %v4255_v34 = vsub.f32 %v4041_v7, %v612_v18  ;;  %v771_v48 = vmul.f32 0.125, %v714_v32  ;;  %739 = vadd.xlane.f32.xlu0 %v697_v46  ;;  %v698_v53 = vmul.f32 %v669_v23, %v669_v23  ;;  %v674_v26 = vmul.f32 %v4021_v58, %v4260_v60 }
 0x285   :  { %v572_v2 = vpop.xlane.xlu0 %571 }
 0x286   :  { %v800_v25 = vadd.f32 1e-05, %v771_v48  ;;  %v613_v4 = vmul.f32 0.125, %v572_v2  ;;  %741 = vadd.xlane.f32.xlu1 %v698_v53  ;;  %v670_v17 = vmul.f32 %v4021_v58, %v4255_v34  ;;  %v701_v53 = vmul.f32 %v672_v9, %v672_v9 }
 0x287   :  { %v716_v20 = vpop.xlane.xlu1 %715 }
 0x288   :  { %3307 = vrsqrt.f32 %v800_v25  ;;  %v4265_v37 = vsub.f32 %v4051_v3, %v613_v4  ;;  %v772_v18 = vmul.f32 0.125, %v716_v20  ;;  %v699_v46 = vmul.f32 %v670_v17, %v670_v17 }
 0x289   :  { %v703_v17 = vmul.f32 %v674_v26, %v674_v26 }
 0x28a   :  { %v801_v23 = vadd.f32 1e-05, %v772_v18  ;;  %743 = vadd.xlane.f32.xlu0 %v699_v46  ;;  %v671_v32 = vmul.f32 %v4021_v58, %v4265_v37  ;;  %v4271_v46 = vld [vmem:[#allocation5] ss:$0 sm:$0xff] }
 0x28b   :  { %v718_v48 = vpop.xlane.xlu1 %717 }
 0x28c   :  { %3309 = vrsqrt.f32 %v801_v23  ;;  %v773_v10 = vmul.f32 0.125, %v718_v48  ;;  %v700_v2 = vmul.f32 %v671_v32, %v671_v32  ;;  %v4274_v32 = vld [vmem:[#allocation7] ss:$0 sm:$0xff] }
 0x28e   :  { %v802_v57 = vadd.f32 1e-05, %v773_v10  ;;  %747 = vadd.xlane.f32.xlu0 %v701_v53  ;;  %745 = vadd.xlane.f32.xlu1 %v700_v2 }
 0x28f   :  { %v720_v25 = vpop.xlane.xlu1 %719 }
 0x290   :  { %3311 = vrsqrt.f32 %v802_v57  ;;  %v774_v4 = vmul.f32 0.125, %v720_v25 }
 0x292   :  { %v3308_v20 = vpop.eup %3307  ;;  %v803_v18 = vadd.f32 1e-05, %v774_v4  ;;  %751 = vadd.xlane.f32.xlu0 %v703_v17 }
 0x293   :  { %v722_v5 = vpop.xlane.xlu1 %721  ;;  %v858_v9 = vmul.f32 %v3308_v20, %v4013_v52 }
 0x294   :  { %3313 = vrsqrt.f32 %v803_v18  ;;  %v775_v23 = vmul.f32 0.125, %v722_v5 }
 0x295   :  { %v894_v48 = vmul.f32 %v4271_v46, %v858_v9 }
 0x296   :  { %v3310_v53 = vpop.eup %3309  ;;  %v804_v10 = vadd.f32 1e-05, %v775_v23  ;;  %v5516_v23 = vmov 0.0  }
 0x297   :  { %v724_v2 = vpop.xlane.xlu1 %723  ;;  %v930_v57 = vadd.f32 %v4274_v32, %v894_v48  ;;  %v859_v26 = vmul.f32 %v3310_v53, %v4029_v59 }
 0x298   :  { %3315 = vrsqrt.f32 %v804_v10  ;;  %v776_v25 = vmul.f32 0.125, %v724_v2 }
 0x299   :  { %v959_v4 = vmax.f32 %v930_v57, 0.0  ;;  %v895_v17 = vmul.f32 %v4271_v46, %v859_v26 }
 0x29a   :  { %v3312_v55 = vpop.eup %3311  ;;  %v805_v52 = vadd.f32 1e-05, %v776_v25 }
 0x29b   :  { %2872 = vmatmul.mubr.f32.vlgmr.msra.gmra.mrb[0].mxu0 %v959_v4  ;;  %v726_v5 = vpop.xlane.xlu1 %725  ;;  %v931_v20 = vadd.f32 %v4274_v32, %v895_v17  ;;  %v860_v18 = vmul.f32 %v3312_v55, %v4044_v8 }
 0x29c   :  { %3317 = vrsqrt.f32 %v805_v52  ;;  %v777_v9 = vmul.f32 0.125, %v726_v5  ;;  %2874 = vmatprep.mubr.msk.f32.mxu0 %vm3632_vm1, %v5516_v23 }
 0x29d   :  { %v960_v48 = vmax.f32 %v931_v20, 0.0  ;;  %v896_v59 = vmul.f32 %v4271_v46, %v860_v18 }
 0x29e   :  { %v3314_v53 = vpop.eup %3313  ;;  %v806_v10 = vadd.f32 1e-05, %v777_v9 }
 0x29f   :  { %2875 = vmatmul.mubr.f32.gmra.mrb[2].mxu0 %v960_v48  ;;  %v728_v2 = vpop.xlane.xlu1 %727  ;;  %v932_v57 = vadd.f32 %v4274_v32, %v896_v59  ;;  %v861_v26 = vmul.f32 %v3314_v53, %v4054_v11 }
 0x2a0   :  { %3319 = vrsqrt.f32 %v806_v10  ;;  %v778_v25 = vmul.f32 0.125, %v728_v2  ;;  %2877 = vmatprep.mubr.msk.f32.mxu0 %vm3632_vm1, %v5516_v23 }
 0x2a1   :  { %v961_v55 = vmax.f32 %v932_v57, 0.0  ;;  %v897_v8 = vmul.f32 %v4271_v46, %v861_v26 }
 0x2a2   :  { %v3316_v4 = vpop.eup %3315  ;;  %v807_v17 = vadd.f32 1e-05, %v778_v25 }
 0x2a3   :  { %2878 = vmatmul.mubr.f32.gmra.mrb[4].mxu0 %v961_v55  ;;  %v933_v52 = vadd.f32 %v4274_v32, %v897_v8  ;;  %v862_v5 = vmul.f32 %v3316_v4, %v4069_v21 }
 0x2a4   :  { %3321 = vrsqrt.f32 %v807_v17  ;;  %2880 = vmatprep.mubr.msk.f32.mxu0 %vm3632_vm1, %v5516_v23 }
 0x2a5   :  { %v962_v11 = vmax.f32 %v933_v52, 0.0  ;;  %v898_v20 = vmul.f32 %v4271_v46, %v862_v5 }
 0x2a6   :  { %v3318_v18 = vpop.eup %3317 }
 0x2a7   :  { %2881 = vmatmul.mubr.f32.gmra.mrb[6].mxu0 %v962_v11  ;;  %v934_v9 = vadd.f32 %v4274_v32, %v898_v20  ;;  %v863_v48 = vmul.f32 %v3318_v18, %v4083_v35 }
 0x2a8   :  { %2883 = vmatprep.mubr.msk.f32.mxu0 %vm3632_vm1, %v5516_v23 }
 0x2a9   :  { %v963_v59 = vmax.f32 %v934_v9, 0.0  ;;  %v899_v53 = vmul.f32 %v4271_v46, %v863_v48 }
 0x2aa   :  { %v3320_v21 = vpop.eup %3319 }
 0x2ab   :  { %2884 = vmatmul.mubr.f32.gmra.mrb[8].mxu0 %v963_v59  ;;  %v935_v10 = vadd.f32 %v4274_v32, %v899_v53  ;;  %v864_v2 = vmul.f32 %v3320_v21, %v4097_v49 }
 0x2ac   :  { %2886 = vmatprep.mubr.msk.f32.mxu0 %vm3632_vm1, %v5516_v23 }
 0x2ad   :  { %v964_v57 = vmax.f32 %v935_v10, 0.0  ;;  %v900_v26 = vmul.f32 %v4271_v46, %v864_v2 }
 0x2ae   :  { %v3322_v25 = vpop.eup %3321 }
 0x2af   :  { %2887 = vmatmul.mubr.f32.gmra.mrb[10].mxu0 %v964_v57  ;;  %v936_v35 = vadd.f32 %v4274_v32, %v900_v26  ;;  %v865_v55 = vmul.f32 %v3322_v25, %v4111_v0 }
 0x2b0   :  { %2889 = vmatprep.mubr.msk.f32.mxu0 %vm3632_vm1, %v5516_v23 }
 0x2b1   :  { %v965_v8 = vmax.f32 %v936_v35, 0.0  ;;  %v901_v4 = vmul.f32 %v4271_v46, %v865_v55 }
 0x2b3   :  { %2890 = vmatmul.mubr.f32.gmra.mrb[12].mxu0 %v965_v8  ;;  %v937_v49 = vadd.f32 %v4274_v32, %v901_v4 }
 0x2b4   :  { %2892 = vmatprep.mubr.msk.f32.mxu0 %vm3632_vm1, %v5516_v23 }
 0x2b5   :  { %v966_v17 = vmax.f32 %v937_v49, 0.0 }
 0x2b7   :  { %2893 = vmatmul.mubr.f32.gmra.mrb[14].mxu0 %v966_v17 }
 0x2b8   :  { %2895 = vmatprep.mubr.msk.f32.mxu0 %vm3632_vm1, %v5516_v23 }
 0x2be   :  { %v730_v52 = vpop.xlane.xlu1 %729 }
 0x2bf   :  { %v779_v5 = vmul.f32 0.125, %v730_v52 }
 0x2c1   :  { %v808_v0 = vadd.f32 1e-05, %v779_v5 }
 0x2c3   :  { %3323 = vrsqrt.f32 %v808_v0 }
 0x2c4   :  { %v576_v11 = vpop.xlane.xlu0 %575 }
 0x2c5   :  { %v615_v20 = vmul.f32 0.125, %v576_v11 }
 0x2c7   :  { %v4316_v18 = vsub.f32 %v4167_v15, %v615_v20 }
 0x2c8   :  { %v580_v9 = vpop.xlane.xlu0 %579 }
 0x2c9   :  { %v617_v48 = vmul.f32 0.125, %v580_v9  ;;  %v673_v59 = vmul.f32 %v4021_v58, %v4316_v18 }
 0x2cb   :  { %v4321_v53 = vsub.f32 %v4174_v28, %v617_v48  ;;  %v702_v21 = vmul.f32 %v673_v59, %v673_v59 }
 0x2cc   :  { %v582_v10 = vpop.xlane.xlu0 %581 }
 0x2cd   :  { %v3324_v2 = vpop.eup %3323  ;;  %v618_v57 = vmul.f32 0.125, %v582_v10  ;;  %749 = vadd.xlane.f32.xlu1 %v702_v21  ;;  %v675_v26 = vmul.f32 %v4021_v58, %v4321_v53 }
 0x2ce   :  { %v866_v25 = vmul.f32 %v3324_v2, %v4156_v54 }
 0x2cf   :  { %v4327_v35 = vsub.f32 %v4179_v40, %v618_v57  ;;  %v704_v55 = vmul.f32 %v675_v26, %v675_v26 }
 0x2d0   :  { %v584_v8 = vpop.xlane.xlu0 %583  ;;  %v902_v4 = vmul.f32 %v4271_v46, %v866_v25 }
 0x2d1   :  { %v619_v49 = vmul.f32 0.125, %v584_v8  ;;  %753 = vadd.xlane.f32.xlu1 %v704_v55  ;;  %v676_v17 = vmul.f32 %v4021_v58, %v4327_v35 }
 0x2d2   :  { %v938_v52 = vadd.f32 %v4274_v32, %v902_v4 }
 0x2d3   :  { %v4334_v5 = vsub.f32 %v4185_v6, %v619_v49  ;;  %v705_v0 = vmul.f32 %v676_v17, %v676_v17 }
 0x2d4   :  { %v586_v11 = vpop.xlane.xlu0 %585  ;;  %v967_v54 = vmax.f32 %v938_v52, 0.0 }
 0x2d5   :  { %v620_v20 = vmul.f32 0.125, %v586_v11  ;;  %755 = vadd.xlane.f32.xlu0 %v705_v0  ;;  %v677_v9 = vmul.f32 %v4021_v58, %v4334_v5 }
 0x2d6   :  { %2896 = vmatmul.mubr.f32.gmra.mrb[16].mxu0 %v967_v54 }
 0x2d7   :  { %v4339_v48 = vsub.f32 %v4191_v45, %v620_v20  ;;  %v706_v59 = vmul.f32 %v677_v9, %v677_v9  ;;  %2898 = vmatprep.mubr.msk.f32.mxu0 %vm3632_vm1, %v5516_v23 }
 0x2d8   :  { %v588_v21 = vpop.xlane.xlu0 %587 }
 0x2d9   :  { %v621_v10 = vmul.f32 0.125, %v588_v21  ;;  %757 = vadd.xlane.f32.xlu1 %v706_v59  ;;  %v678_v2 = vmul.f32 %v4021_v58, %v4339_v48 }
 0x2db   :  { %v4346_v57 = vsub.f32 %v4197_v27, %v621_v10  ;;  %v707_v26 = vmul.f32 %v678_v2, %v678_v2 }
 0x2dc   :  { %v590_v25 = vpop.xlane.xlu0 %589 }
 0x2dd   :  { %v622_v55 = vmul.f32 0.125, %v590_v25  ;;  %759 = vadd.xlane.f32.xlu0 %v707_v26  ;;  %v679_v8 = vmul.f32 %v4021_v58, %v4346_v57 }
 0x2df   :  { %v4351_v4 = vsub.f32 %v4203_v51, %v622_v55  ;;  %v708_v49 = vmul.f32 %v679_v8, %v679_v8 }
 0x2e0   :  { %v592_v17 = vpop.xlane.xlu0 %591 }
 0x2e1   :  { %v623_v52 = vmul.f32 0.125, %v592_v17  ;;  %761 = vadd.xlane.f32.xlu1 %v708_v49  ;;  %v680_v0 = vmul.f32 %v4021_v58, %v4351_v4 }
 0x2e3   :  { %v4356_v11 = vsub.f32 %v4210_v47, %v623_v52  ;;  %v709_v54 = vmul.f32 %v680_v0, %v680_v0 }
 0x2e4   :  { %v594_v20 = vpop.xlane.xlu0 %593 }
 0x2e5   :  { %v624_v9 = vmul.f32 0.125, %v594_v20  ;;  %763 = vadd.xlane.f32.xlu0 %v709_v54  ;;  %v681_v59 = vmul.f32 %v4021_v58, %v4356_v11 }
 0x2e7   :  { %v4361_v21 = vsub.f32 %v4217_v61, %v624_v9  ;;  %v710_v10 = vmul.f32 %v681_v59, %v681_v59 }
 0x2e8   :  { %v596_v2 = vpop.xlane.xlu0 %595 }
 0x2e9   :  { %v625_v26 = vmul.f32 0.125, %v596_v2  ;;  %765 = vadd.xlane.f32.xlu1 %v710_v10  ;;  %v682_v25 = vmul.f32 %v4021_v58, %v4361_v21 }
 0x2eb   :  { %v4366_v55 = vsub.f32 %v4221_v16, %v625_v26  ;;  %v711_v8 = vmul.f32 %v682_v25, %v682_v25 }
 0x2ec   :  { %v732_v49 = vpop.xlane.xlu0 %731 }
 0x2ed   :  { %v780_v17 = vmul.f32 0.125, %v732_v49  ;;  %767 = vadd.xlane.f32.xlu0 %v711_v8  ;;  %v683_v52 = vmul.f32 %v4021_v58, %v4366_v55 }
 0x2ef   :  { %v809_v0 = vadd.f32 1e-05, %v780_v17  ;;  %v712_v54 = vmul.f32 %v683_v52, %v683_v52 }
 0x2f1   :  { %3325 = vrsqrt.f32 %v809_v0  ;;  %769 = vadd.xlane.f32.xlu1 %v712_v54 }
 0x2fb   :  { %v3326_v20 = vpop.eup %3325 }
 0x2fc   :  { %v867_v9 = vmul.f32 %v3326_v20, %v4214_v63 }
 0x2fe   :  { %v903_v59 = vmul.f32 %v4271_v46, %v867_v9 }
 0x300   :  { %v939_v10 = vadd.f32 %v4274_v32, %v903_v59 }
 0x302   :  { %v968_v2 = vmax.f32 %v939_v10, 0.0 }
 0x304   :  { %2899 = vmatmul.mubr.f32.gmra.mrb[18].mxu0 %v968_v2 }
 0x305   :  { %2901 = vmatprep.mubr.msk.f32.mxu0 %vm3632_vm1, %v5516_v23 }
 0x307   :  { %v734_v26 = vpop.xlane.xlu1 %733 }
 0x308   :  { %v781_v25 = vmul.f32 0.125, %v734_v26 }
 0x30a   :  { %v810_v8 = vadd.f32 1e-05, %v781_v25 }
 0x30b   :  { %v738_v49 = vpop.xlane.xlu1 %737 }
 0x30c   :  { %3327 = vrsqrt.f32 %v810_v8  ;;  %v783_v17 = vmul.f32 0.125, %v738_v49 }
 0x30d   :  { %v736_v52 = vpop.xlane.xlu0 %735 }
 0x30e   :  { %v812_v0 = vadd.f32 1e-05, %v783_v17  ;;  %v782_v54 = vmul.f32 0.125, %v736_v52 }
 0x310   :  { %3329 = vrsqrt.f32 %v812_v0  ;;  %v811_v63 = vadd.f32 1e-05, %v782_v54 }
 0x311   :  { %v740_v20 = vpop.xlane.xlu0 %739 }
 0x312   :  { %3331 = vrsqrt.f32 %v811_v63  ;;  %v784_v9 = vmul.f32 0.125, %v740_v20 }
 0x313   :  { %v742_v59 = vpop.xlane.xlu1 %741 }
 0x314   :  { %v813_v10 = vadd.f32 1e-05, %v784_v9  ;;  %v785_v2 = vmul.f32 0.125, %v742_v59 }
 0x316   :  { %v3328_v16 = vpop.eup %3327  ;;  %3333 = vrsqrt.f32 %v813_v10  ;;  %v814_v61 = vadd.f32 1e-05, %v785_v2 }
 0x317   :  { %v744_v47 = vpop.xlane.xlu0 %743  ;;  %v868_v26 = vmul.f32 %v3328_v16, %v4227_v12 }
 0x318   :  { %3335 = vrsqrt.f32 %v814_v61  ;;  %v786_v25 = vmul.f32 0.125, %v744_v47 }
 0x319   :  { %v904_v8 = vmul.f32 %v4271_v46, %v868_v26 }
 0x31a   :  { %v3330_v49 = vpop.eup %3329  ;;  %v815_v17 = vadd.f32 1e-05, %v786_v25 }
 0x31b   :  { %v746_v52 = vpop.xlane.xlu1 %745  ;;  %v748_v0 = vpop.xlane.xlu0 %747  ;;  %v940_v54 = vadd.f32 %v4274_v32, %v904_v8  ;;  %v870_v63 = vmul.f32 %v3330_v49, %v4232_v24 }
 0x31c   :  { %v3332_v20 = vpop.eup %3331  ;;  %3337 = vrsqrt.f32 %v815_v17  ;;  %v787_v9 = vmul.f32 0.125, %v746_v52  ;;  %v788_v59 = vmul.f32 0.125, %v748_v0 }
 0x31d   :  { %v969_v10 = vmax.f32 %v940_v54, 0.0  ;;  %v869_v2 = vmul.f32 %v3332_v20, %v4235_v29  ;;  %v906_v12 = vmul.f32 %v4271_v46, %v870_v63 }
 0x31e   :  { %v816_v16 = vadd.f32 1e-05, %v787_v9  ;;  %v817_v61 = vadd.f32 1e-05, %v788_v59 }
 0x31f   :  { %2902 = vmatmul.mubr.f32.gmra.mrb[20].mxu0 %v969_v10  ;;  %v905_v47 = vmul.f32 %v4271_v46, %v869_v2  ;;  %v942_v29 = vadd.f32 %v4274_v32, %v906_v12 }
 0x320   :  { %v3334_v26 = vpop.eup %3333  ;;  %3339 = vrsqrt.f32 %v816_v16  ;;  %2904 = vmatprep.mubr.msk.f32.mxu0 %vm3632_vm1, %v5516_v23 }
 0x321   :  { %3341 = vrsqrt.f32 %v817_v61  ;;  %v941_v24 = vadd.f32 %v4274_v32, %v905_v47  ;;  %v871_v25 = vmul.f32 %v3334_v26, %v4240_v22  ;;  %v971_v54 = vmax.f32 %v942_v29, 0.0 }
 0x322   :  { %v3336_v8 = vpop.eup %3335 }
 0x323   :  { %v970_v49 = vmax.f32 %v941_v24, 0.0  ;;  %v907_v17 = vmul.f32 %v4271_v46, %v871_v25  ;;  %v872_v52 = vmul.f32 %v3336_v8, %v4247_v13 }
 0x325   :  { %2905 = vmatmul.mubr.f32.gmra.mrb[22].mxu0 %v970_v49  ;;  %v943_v63 = vadd.f32 %v4274_v32, %v907_v17  ;;  %v908_v22 = vmul.f32 %v4271_v46, %v872_v52  ;;  %v752_v49 = vpop.xlane.xlu0 %751 }
 0x326   :  { %v3338_v0 = vpop.eup %3337  ;;  %2907 = vmatprep.mubr.msk.f32.mxu0 %vm3632_vm1, %v5516_v23  ;;  %v790_v29 = vmul.f32 0.125, %v752_v49 }
 0x327   :  { %v873_v20 = vmul.f32 %v3338_v0, %v4255_v34  ;;  %v972_v10 = vmax.f32 %v943_v63, 0.0  ;;  %v944_v16 = vadd.f32 %v4274_v32, %v908_v22 }
 0x328   :  { %v819_v17 = vadd.f32 1e-05, %v790_v29 }
 0x329   :  { %2908 = vmatmul.mubr.f32.gmra.mrb[24].mxu0 %v971_v54  ;;  %v909_v9 = vmul.f32 %v4271_v46, %v873_v20  ;;  %v973_v24 = vmax.f32 %v944_v16, 0.0 }
 0x32a   :  { %v3340_v59 = vpop.eup %3339  ;;  %2910 = vmatprep.mubr.msk.f32.mxu0 %vm3632_vm1, %v5516_v23  ;;  %3343 = vrsqrt.f32 %v819_v17 }
 0x32b   :  { %v3342_v13 = vpop.eup %3341  ;;  %v945_v2 = vadd.f32 %v4274_v32, %v909_v9  ;;  %v874_v61 = vmul.f32 %v3340_v59, %v4265_v37 }
 0x32c   :  { %v875_v47 = vmul.f32 %v3342_v13, %v4252_v41 }
 0x32d   :  { %2911 = vmatmul.mubr.f32.gmra.mrb[26].mxu0 %v972_v10  ;;  %v974_v34 = vmax.f32 %v945_v2, 0.0  ;;  %v910_v12 = vmul.f32 %v4271_v46, %v874_v61 }
 0x32e   :  { %2913 = vmatprep.mubr.msk.f32.mxu0 %vm3632_vm1, %v5516_v23  ;;  %v911_v26 = vmul.f32 %v4271_v46, %v875_v47 }
 0x32f   :  { %2917 = vmatmul.mubr.f32.vlgmr.msra.gmra.mrb[0].mxu1 %v974_v34  ;;  %v946_v25 = vadd.f32 %v4274_v32, %v910_v12 }
 0x330   :  { %2919 = vmatprep.mubr.msk.f32.mxu1 %vm3632_vm1, %v5516_v23  ;;  %v947_v41 = vadd.f32 %v4274_v32, %v911_v26 }
 0x331   :  { %2914 = vmatmul.mubr.f32.gmra.mrb[28].mxu0 %v973_v24  ;;  %v975_v37 = vmax.f32 %v946_v25, 0.0  ;;  %v4417_v25 = vld [vmem:[#allocation8] ss:$0 sm:$0xff] }
 0x332   :  { %3109 = vmatprep.mubr.msk.f32.mxu0 %vm3632_vm1, %v5516_v23  ;;  %v976_v8 = vmax.f32 %v947_v41, 0.0 }
 0x333   :  { %2920 = vmatmul.mubr.f32.gmra.mrb[2].mxu1 %v975_v37 }
 0x334   :  { %2922 = vmatprep.mubr.msk.f32.mxu1 %vm3632_vm1, %v5516_v23  ;;  %v3344_v13 = vpop.eup %3343 }
 0x335   :  { %v877_v61 = vmul.f32 %v3344_v13, %v4260_v60 }
 0x337   :  { %2923 = vmatmul.mubr.f32.gmra.mrb[4].mxu1 %v976_v8  ;;  %v913_v41 = vmul.f32 %v4271_v46, %v877_v61 }
 0x338   :  { %2925 = vmatprep.mubr.msk.f32.mxu1 %vm3632_vm1, %v5516_v23 }
 0x35a   :  { %v750_v52 = vpop.xlane.xlu1 %749 }
 0x35b   :  { %v789_v0 = vmul.f32 0.125, %v750_v52 }
 0x35d   :  { %v818_v54 = vadd.f32 1e-05, %v789_v0 }
 0x35e   :  { %v754_v63 = vpop.xlane.xlu1 %753 }
 0x35f   :  { %3345 = vrsqrt.f32 %v818_v54  ;;  %v791_v20 = vmul.f32 0.125, %v754_v63 }
 0x361   :  { %v820_v22 = vadd.f32 1e-05, %v791_v20  ;;  %v949_v20 = vadd.f32 %v4274_v32, %v913_v41 }
 0x362   :  { %v756_v9 = vpop.xlane.xlu0 %755 }
 0x363   :  { %3347 = vrsqrt.f32 %v820_v22  ;;  %v792_v59 = vmul.f32 0.125, %v756_v9 }
 0x365   :  { %v821_v10 = vadd.f32 1e-05, %v792_v59 }
 0x366   :  { %v758_v2 = vpop.xlane.xlu1 %757 }
 0x367   :  { %3349 = vrsqrt.f32 %v821_v10  ;;  %v793_v16 = vmul.f32 0.125, %v758_v2 }
 0x369   :  { %v3346_v47 = vpop.eup %3345  ;;  %v822_v34 = vadd.f32 1e-05, %v793_v16 }
 0x36a   :  { %v760_v12 = vpop.xlane.xlu0 %759  ;;  %v876_v26 = vmul.f32 %v3346_v47, %v4316_v18 }
 0x36b   :  { %3351 = vrsqrt.f32 %v822_v34  ;;  %v794_v24 = vmul.f32 0.125, %v760_v12  ;;  %v978_v34 = vmax.f32 %v949_v20, 0.0 }
 0x36c   :  { %v912_v37 = vmul.f32 %v4271_v46, %v876_v26 }
 0x36d   :  { %v3348_v8 = vpop.eup %3347  ;;  %v823_v49 = vadd.f32 1e-05, %v794_v24 }
 0x36e   :  { %v1077_v29 = vpop.f32.mrb[0].mxu0  ;;  %v762_v17 = vpop.xlane.xlu1 %761  ;;  %v948_v52 = vadd.f32 %v4274_v32, %v912_v37  ;;  %v878_v60 = vmul.f32 %v3348_v8, %v4321_v53 }
 0x36f   :  { %3353 = vrsqrt.f32 %v823_v49  ;;  %v1078_v0 = vadd.f32 %v4417_v25, %v1077_v29  ;;  %v795_v18 = vmul.f32 0.125, %v762_v17  ;;  %v2873_v54 = vpop.f32.mrb[1].mxu0 }
 0x370   :  { %v977_v63 = vmax.f32 %v948_v52, 0.0  ;;  %v914_v22 = vmul.f32 %v4271_v46, %v878_v60 }
 0x371   :  { %v3350_v9 = vpop.eup %3349  ;;  %v4427_v59 = vadd.f32 %v1078_v0, %v3851_v31  ;;  %v824_v13 = vadd.f32 1e-05, %v795_v18 }
 0x372   :  { %v1082_v10 = vpop.f32.mrb[2].mxu0  ;;  %2926 = vmatmul.mubr.f32.gmra.mrb[6].mxu1 %v977_v63  ;;  %v764_v2 = vpop.xlane.xlu0 %763  ;;  %v879_v53 = vmul.f32 %v3350_v9, %v4327_v35  ;;  %v950_v31 = vadd.f32 %v4274_v32, %v914_v22 }
 0x373   :  { %3355 = vrsqrt.f32 %v824_v13  ;;  %v1083_v16 = vadd.f32 %v4417_v25, %v1082_v10  ;;  %v796_v61 = vmul.f32 0.125, %v764_v2  ;;  %v2876_v47 = vpop.f32.mrb[3].mxu0  ;;  %1250 = vadd.xlane.f32.xlu0 %v4427_v59  ;;  %2928 = vmatprep.mubr.msk.f32.mxu1 %vm3632_vm1, %v5516_v23 }
 0x374   :  { %v915_v12 = vmul.f32 %v4271_v46, %v879_v53  ;;  %v979_v52 = vmax.f32 %v950_v31, 0.0 }
 0x375   :  { %v3352_v26 = vpop.eup %3351  ;;  %v4437_v24 = vadd.f32 %v1083_v16, %v3848_v30  ;;  %v825_v35 = vadd.f32 1e-05, %v796_v61 }
 0x376   :  { %v1087_v37 = vpop.f32.mrb[4].mxu0  ;;  %v766_v41 = vpop.xlane.xlu1 %765  ;;  %2929 = vmatmul.mubr.f32.gmra.mrb[8].mxu1 %v978_v34  ;;  %v880_v8 = vmul.f32 %v3352_v26, %v4334_v5  ;;  %v951_v30 = vadd.f32 %v4274_v32, %v915_v12 }
 0x377   :  { %3357 = vrsqrt.f32 %v825_v35  ;;  %v1088_v49 = vadd.f32 %v4417_v25, %v1087_v37  ;;  %v797_v29 = vmul.f32 0.125, %v766_v41  ;;  %v2879_v17 = vpop.f32.mrb[5].mxu0  ;;  %1252 = vadd.xlane.f32.xlu1 %v4437_v24  ;;  %2931 = vmatprep.mubr.msk.f32.mxu1 %vm3632_vm1, %v5516_v23 }
 0x378   :  { %v916_v60 = vmul.f32 %v4271_v46, %v880_v8  ;;  %v980_v10 = vmax.f32 %v951_v30, 0.0 }
 0x379   :  { %v3354_v0 = vpop.eup %3353  ;;  %v4447_v18 = vadd.f32 %v1088_v49, %v3859_v38  ;;  %v826_v5 = vadd.f32 1e-05, %v797_v29 }
 0x37a   :  { %v1092_v54 = vpop.f32.mrb[6].mxu0  ;;  %2932 = vmatmul.mubr.f32.gmra.mrb[10].mxu1 %v979_v52  ;;  %v768_v63 = vpop.xlane.xlu0 %767  ;;  %v881_v20 = vmul.f32 %v3354_v0, %v4339_v48  ;;  %v952_v38 = vadd.f32 %v4274_v32, %v916_v60 }
 0x37b   :  { %3359 = vrsqrt.f32 %v826_v5  ;;  %v1093_v22 = vadd.f32 %v4417_v25, %v1092_v54  ;;  %v798_v9 = vmul.f32 0.125, %v768_v63  ;;  %v2882_v13 = vpop.f32.mrb[7].mxu0  ;;  %1254 = vadd.xlane.f32.xlu0 %v4447_v18  ;;  %2934 = vmatprep.mubr.msk.f32.mxu1 %vm3632_vm1, %v5516_v23 }
 0x37c   :  { %v917_v2 = vmul.f32 %v4271_v46, %v881_v20  ;;  %v981_v35 = vmax.f32 %v952_v38, 0.0 }
 0x37d   :  { %v3356_v53 = vpop.eup %3355  ;;  %v4457_v16 = vadd.f32 %v1093_v22, %v3865_v44  ;;  %v827_v48 = vadd.f32 1e-05, %v798_v9 }
 0x37e   :  { %v1097_v61 = vpop.f32.mrb[8].mxu0  ;;  %v770_v47 = vpop.xlane.xlu1 %769  ;;  %2935 = vmatmul.mubr.f32.gmra.mrb[12].mxu1 %v980_v10  ;;  %v882_v34 = vmul.f32 %v3356_v53, %v4346_v57  ;;  %v953_v44 = vadd.f32 %v4274_v32, %v917_v2 }
 0x37f   :  { %3361 = vrsqrt.f32 %v827_v48  ;;  %v1098_v31 = vadd.f32 %v4417_v25, %v1097_v61  ;;  %v799_v12 = vmul.f32 0.125, %v770_v47  ;;  %v2885_v26 = vpop.f32.mrb[9].mxu0  ;;  %1256 = vadd.xlane.f32.xlu1 %v4457_v16  ;;  %2937 = vmatprep.mubr.msk.f32.mxu1 %vm3632_vm1, %v5516_v23 }
 0x380   :  { %v918_v37 = vmul.f32 %v4271_v46, %v882_v34  ;;  %v982_v30 = vmax.f32 %v953_v44, 0.0 }
 0x381   :  { %v3358_v41 = vpop.eup %3357  ;;  %v4467_v8 = vadd.f32 %v1098_v31, %v3871_v50  ;;  %v828_v57 = vadd.f32 1e-05, %v799_v12 }
 0x382   :  { %v1102_v49 = vpop.f32.mrb[10].mxu0  ;;  %2938 = vmatmul.mubr.f32.gmra.mrb[14].mxu1 %v981_v35  ;;  %v883_v29 = vmul.f32 %v3358_v41, %v4351_v4  ;;  %v954_v60 = vadd.f32 %v4274_v32, %v918_v37 }
 0x383   :  { %3363 = vrsqrt.f32 %v828_v57  ;;  %v1103_v17 = vadd.f32 %v4417_v25, %v1102_v49  ;;  %v2888_v52 = vpop.f32.mrb[11].mxu0  ;;  %1258 = vadd.xlane.f32.xlu0 %v4467_v8  ;;  %2940 = vmatprep.mubr.msk.f32.mxu1 %vm3632_vm1, %v5516_v23 }
 0x384   :  { %v919_v50 = vmul.f32 %v4271_v46, %v883_v29  ;;  %v983_v22 = vmax.f32 %v954_v60, 0.0 }
 0x385   :  { %v3360_v0 = vpop.eup %3359  ;;  %v4477_v5 = vadd.f32 %v1103_v17, %v3877_v56 }
 0x386   :  { %v1107_v54 = vpop.f32.mrb[12].mxu0  ;;  %2941 = vmatmul.mubr.f32.gmra.mrb[16].mxu1 %v982_v30  ;;  %v884_v4 = vmul.f32 %v3360_v0, %v4356_v11  ;;  %v955_v9 = vadd.f32 %v4274_v32, %v919_v50 }
 0x387   :  { %v1108_v63 = vadd.f32 %v4417_v25, %v1107_v54  ;;  %v2891_v20 = vpop.f32.mrb[13].mxu0  ;;  %1260 = vadd.xlane.f32.xlu1 %v4477_v5  ;;  %2943 = vmatprep.mubr.msk.f32.mxu1 %vm3632_vm1, %v5516_v23 }
 0x388   :  { %v920_v13 = vmul.f32 %v4271_v46, %v884_v4  ;;  %v984_v48 = vmax.f32 %v955_v9, 0.0 }
 0x389   :  { %v3362_v10 = vpop.eup %3361  ;;  %v4487_v56 = vadd.f32 %v1108_v63, %v3883_v62 }
 0x38a   :  { %v1112_v38 = vpop.f32.mrb[14].mxu0  ;;  %2944 = vmatmul.mubr.f32.gmra.mrb[18].mxu1 %v983_v22  ;;  %v885_v11 = vmul.f32 %v3362_v10, %v4361_v21  ;;  %v956_v61 = vadd.f32 %v4274_v32, %v920_v13 }
 0x38b   :  { %v1113_v2 = vadd.f32 %v4417_v25, %v1112_v38  ;;  %v2894_v53 = vpop.f32.mrb[15].mxu0  ;;  %1262 = vadd.xlane.f32.xlu0 %v4487_v56  ;;  %2946 = vmatprep.mubr.msk.f32.mxu1 %vm3632_vm1, %v5516_v23 }
 0x38c   :  { %v921_v47 = vmul.f32 %v4271_v46, %v885_v11  ;;  %v985_v31 = vmax.f32 %v956_v61, 0.0 }
 0x38d   :  { %v3364_v34 = vpop.eup %3363  ;;  %v4497_v62 = vadd.f32 %v1113_v2, %v3887_v1 }
 0x38e   :  { %2947 = vmatmul.mubr.f32.gmra.mrb[20].mxu1 %v984_v48  ;;  %v886_v21 = vmul.f32 %v3364_v34, %v4366_v55  ;;  %v957_v12 = vadd.f32 %v4274_v32, %v921_v47 }
 0x38f   :  { %1264 = vadd.xlane.f32.xlu1 %v4497_v62  ;;  %2949 = vmatprep.mubr.msk.f32.mxu1 %vm3632_vm1, %v5516_v23 }
 0x390   :  { %v922_v26 = vmul.f32 %v4271_v46, %v886_v21  ;;  %v986_v35 = vmax.f32 %v957_v12, 0.0 }
 0x392   :  { %2950 = vmatmul.mubr.f32.gmra.mrb[22].mxu1 %v985_v31  ;;  %v958_v1 = vadd.f32 %v4274_v32, %v922_v26  ;;  %v5520_v26 = vld [vmem:[#allocation16_spill] sm:$0xff] }
 0x393   :  { %2952 = vmatprep.mubr.msk.f32.mxu1 %vm3632_vm1, %v5516_v23 }
 0x394   :  { %v987_v55 = vmax.f32 %v958_v1, 0.0 }
 0x396   :  { %2953 = vmatmul.mubr.f32.gmra.mrb[24].mxu1 %v986_v35 }
 0x397   :  { %2955 = vmatprep.mubr.msk.f32.mxu1 %vm3632_vm1, %v5516_v23 }
 0x39a   :  { %2956 = vmatmul.mubr.f32.gmra.mrb[26].mxu1 %v987_v55 }
 0x39b   :  { %2990 = vmatprep.mubr.msk.f32.mxu1 %vm3632_vm1, %v5516_v23 }
 0x3a9   :  { %v1117_v44 = vpop.f32.mrb[16].mxu0 }
 0x3aa   :  { %v1118_v37 = vadd.f32 %v4417_v25, %v1117_v44  ;;  %v2897_v46 = vpop.f32.mrb[17].mxu0 }
 0x3ac   :  { %v4514_v41 = vadd.f32 %v1118_v37, %v3953_v36 }
 0x3ae   :  { %1266 = vadd.xlane.f32.xlu0 %v4514_v41 }
 0x3d7   :  { %v1122_v57 = vpop.f32.mrb[18].mxu0 }
 0x3d8   :  { %v1123_v32 = vadd.f32 %v4417_v25, %v1122_v57  ;;  %v2900_v49 = vpop.f32.mrb[19].mxu0 }
 0x3da   :  { %v4519_v29 = vadd.f32 %v1123_v32, %v3957_v39 }
 0x3dc   :  { %1268 = vadd.xlane.f32.xlu1 %v4519_v29 }
 0x3f2   :  { %v1127_v17 = vpop.f32.mrb[20].mxu0 }
 0x3f3   :  { %v1128_v52 = vadd.f32 %v4417_v25, %v1127_v17  ;;  %v2903_v30 = vpop.f32.mrb[21].mxu0 }
 0x3f5   :  { %v4524_v60 = vadd.f32 %v1128_v52, %v3988_v14 }
 0x3f7   :  { %1270 = vadd.xlane.f32.xlu0 %v4524_v60 }
 0x3f8   :  { %v1132_v36 = vpop.f32.mrb[22].mxu0 }
 0x3f9   :  { %v1133_v50 = vadd.f32 %v4417_v25, %v1132_v36  ;;  %v2906_v0 = vpop.f32.mrb[23].mxu0 }
 0x3fb   :  { %v4529_v54 = vadd.f32 %v1133_v50, %v4003_v43  ;;  %v5523_v50 = vld [vmem:[#allocation17_spill] sm:$0xff] }
 0x3fc   :  { %v1137_v39 = vpop.f32.mrb[24].mxu0 }
 0x3fd   :  { %v1138_v4 = vadd.f32 %v4417_v25, %v1137_v39  ;;  %1272 = vadd.xlane.f32.xlu1 %v4529_v54  ;;  %v2909_v63 = vpop.f32.mrb[25].mxu0 }
 0x3ff   :  { %v4534_v20 = vadd.f32 %v1138_v4, %v3996_v33 }
 0x400   :  { %v1142_v14 = vpop.f32.mrb[26].mxu0 }
 0x401   :  { %v1143_v22 = vadd.f32 %v4417_v25, %v1142_v14  ;;  %1274 = vadd.xlane.f32.xlu0 %v4534_v20  ;;  %v2912_v9 = vpop.f32.mrb[27].mxu0 }
 0x402   :  { %v1152_v13 = vpop.f32.mrb[0].mxu1 }
 0x403   :  { %v4539_v10 = vadd.f32 %v1143_v22, %v4009_v19  ;;  %v1153_v43 = vadd.f32 %v4417_v25, %v1152_v13  ;;  %v2918_v38 = vpop.f32.mrb[1].mxu1 }
 0x404   :  { %v1147_v11 = vpop.f32.mrb[28].mxu0  ;;  %v1253_v1 = vpop.xlane.xlu1 %1252 }
 0x405   :  { %v1148_v2 = vadd.f32 %v4417_v25, %v1147_v11  ;;  %1276 = vadd.xlane.f32.xlu1 %v4539_v10  ;;  %v2915_v33 = vpop.f32.mrb[29].mxu0  ;;  %v4545_v48 = vadd.f32 %v1153_v43, %v4041_v7  ;;  %v1309_v46 = vmul.f32 0.125, %v1253_v1  ;;  %v1699_v1 = vld [vmem:[%s5483_s9] sm:$0xff] }
 0x406   :  { %v1157_v53 = vpop.f32.mrb[2].mxu1 }
 0x407   :  { %5517 = vst [vmem:[#allocation21_spill] sm:$0xff] %v4545_v48  ;;  %v4548_v61 = vadd.f32 %v1148_v2, %v4026_v42  ;;  %v1158_v47 = vadd.f32 %v4417_v25, %v1157_v53  ;;  %v2921_v19 = vpop.f32.mrb[3].mxu1  ;;  %v1251_v42 = vpop.xlane.xlu0 %1250  ;;  %v4572_v30 = vsub.f32 %v4437_v24, %v1309_v46 }
 0x408   :  { %v1308_v35 = vmul.f32 0.125, %v1251_v42 }
 0x409   :  { %5518 = vst [vmem:[#allocation22_spill] sm:$0xff] %v4548_v61  ;;  %1278 = vadd.xlane.f32.xlu0 %v4548_v61  ;;  %1280 = vadd.xlane.f32.xlu1 %v4545_v48  ;;  %v4554_v21 = vadd.f32 %v1158_v47, %v4051_v3  ;;  %v1367_v22 = vmul.f32 %v4021_v58, %v4572_v30 }
 0x40a   :  { %v1162_v34 = vpop.f32.mrb[4].mxu1  ;;  %v4564_v3 = vsub.f32 %v4427_v59, %v1308_v35 }
 0x40b   :  { %5519 = vst [vmem:[#allocation23_spill] sm:$0xff] %v4554_v21  ;;  %v1163_v31 = vadd.f32 %v4417_v25, %v1162_v34  ;;  %v2924_v12 = vpop.f32.mrb[5].mxu1  ;;  %v1255_v32 = vpop.xlane.xlu0 %1254  ;;  %v1396_v47 = vmul.f32 %v1367_v22, %v1367_v22 }
 0x40c   :  { %v1310_v36 = vmul.f32 0.125, %v1255_v32  ;;  %v1366_v39 = vmul.f32 %v4021_v58, %v4564_v3  ;;  %v1257_v4 = vpop.xlane.xlu1 %1256 }
 0x40d   :  { %v4558_v7 = vadd.f32 %v1163_v31, %v5520_v26  ;;  %1282 = vadd.xlane.f32.xlu0 %v4554_v21  ;;  %v1311_v13 = vmul.f32 0.125, %v1257_v4 }
 0x40e   :  { %v4584_v9 = vsub.f32 %v4447_v18, %v1310_v36  ;;  %v1395_v38 = vmul.f32 %v1366_v39, %v1366_v39  ;;  %v1701_v39 = vld [vmem:[%s5483_s9 + $0x10] sm:$0xff] }
 0x40f   :  { %5521 = vst [vmem:[#allocation16_spill] sm:$0xff] %v4558_v7  ;;  %1284 = vadd.xlane.f32.xlu1 %v4558_v7  ;;  %v4592_v19 = vsub.f32 %v4457_v16, %v1311_v13 }
 0x410   :  { %v1259_v11 = vpop.xlane.xlu0 %1258 }
 0x411   :  { %v1312_v34 = vmul.f32 0.125, %v1259_v11 }
 0x414   :  { %v1261_v31 = vpop.xlane.xlu1 %1260 }
 0x41c   :  { %v1265_v11 = vpop.xlane.xlu1 %1264 }
 0x445   :  { %v1167_v55 = vpop.f32.mrb[6].mxu1 }
 0x446   :  { %v1168_v44 = vadd.f32 %v4417_v25, %v1167_v55  ;;  %v2927_v37 = vpop.f32.mrb[7].mxu1  ;;  %v1700_v55 = vld [vmem:[%s5483_s9 + $0x8] sm:$0xff] }
 0x447   :  { %v4608_v37 = vsub.f32 %v4467_v8, %v1312_v34 }
 0x448   :  { %v4567_v57 = vadd.f32 %v1168_v44, %v4167_v15  ;;  %v3221_v44 = vpack.c.bf16 %v1700_v55, %v1699_v1 }
 0x449   :  { %v1172_v49 = vpop.f32.mrb[8].mxu1 }
 0x44a   :  { %5522 = vst [vmem:[#allocation24_spill] sm:$0xff] %v4567_v57  ;;  %v1173_v17 = vadd.f32 %v4417_v25, %v1172_v49  ;;  %1286 = vadd.xlane.f32.xlu0 %v4567_v57  ;;  %v2930_v52 = vpop.f32.mrb[9].mxu1  ;;  %v1369_v49 = vmul.f32 %v4021_v58, %v4592_v19  ;;  %3222 = vmatpush3.bf16.msra.mxu1 %v3221_v44 }
 0x44c   :  { %v4575_v0 = vadd.f32 %v1173_v17, %v5523_v50  ;;  %v1263_v17 = vpop.xlane.xlu0 %1262  ;;  %v1398_v13 = vmul.f32 %v1369_v49, %v1369_v49  ;;  %v1706_v49 = vld [vmem:[%s5483_s9 + $0x38] sm:$0xff] }
 0x44d   :  { %v1177_v15 = vpop.f32.mrb[10].mxu1 }
 0x44e   :  { %5524 = vst [vmem:[#allocation17_spill] sm:$0xff] %v4575_v0  ;;  %v1178_v63 = vadd.f32 %v4417_v25, %v1177_v15  ;;  %1288 = vadd.xlane.f32.xlu1 %v4575_v0  ;;  %v2933_v14 = vpop.f32.mrb[11].mxu1  ;;  %v5528_v15 = vmov 0.0|0.0  }
 0x44f   :  { %3223 = vmatprep.subr.bf16.mxu1 %v5528_v15  ;;  %v1314_v14 = vmul.f32 0.125, %v1263_v17 }
 0x450   :  { %v4587_v43 = vadd.f32 %v1178_v63, %v4174_v28  ;;  %v1368_v28 = vmul.f32 %v4021_v58, %v4584_v9  ;;  %v1267_v1 = vpop.xlane.xlu0 %1266 }
 0x451   :  { %v1182_v2 = vpop.f32.mrb[12].mxu1 }
 0x452   :  { %5525 = vst [vmem:[#allocation25_spill] sm:$0xff] %v4587_v43  ;;  %v1183_v33 = vadd.f32 %v4417_v25, %v1182_v2  ;;  %1290 = vadd.xlane.f32.xlu0 %v4587_v43  ;;  %v2936_v53 = vpop.f32.mrb[13].mxu1  ;;  %1424 = vadd.xlane.f32.xlu1 %v1395_v38  ;;  %v1397_v32 = vmul.f32 %v1368_v28, %v1368_v28 }
 0x453   :  { %v1370_v38 = vmul.f32 %v4021_v58, %v4608_v37  ;;  %v4644_v28 = vsub.f32 %v4487_v56, %v1314_v14 }
 0x454   :  { %v4595_v12 = vadd.f32 %v1183_v33, %v4179_v40  ;;  %v1313_v40 = vmul.f32 0.125, %v1261_v31 }
 0x455   :  { %v1187_v26 = vpop.f32.mrb[14].mxu1 }
 0x456   :  { %5526 = vst [vmem:[#allocation26_spill] sm:$0xff] %v4595_v12  ;;  %v1188_v42 = vadd.f32 %v4417_v25, %v1187_v26  ;;  %1292 = vadd.xlane.f32.xlu0 %v4595_v12  ;;  %v2939_v35 = vpop.f32.mrb[15].mxu1  ;;  %1426 = vadd.xlane.f32.xlu1 %v1396_v47  ;;  %v4624_v4 = vsub.f32 %v4477_v5, %v1313_v40  ;;  %v1703_v47 = vld [vmem:[%s5483_s9 + $0x20] sm:$0xff]  ;;  %v1315_v26 = vmul.f32 0.125, %v1265_v11 }
 0x457   :  { %v1399_v35 = vmul.f32 %v1370_v38, %v1370_v38 }
 0x458   :  { %v4611_v46 = vadd.f32 %v1188_v42, %v4185_v6  ;;  %v1702_v6 = vld [vmem:[%s5483_s9 + $0x18] sm:$0xff]  ;;  %v1371_v34 = vmul.f32 %v4021_v58, %v4624_v4 }
 0x459   :  { %v1192_v52 = vpop.f32.mrb[16].mxu1  ;;  %v3224_v63 = vpack.c.bf16 %v1702_v6, %v1701_v39  ;;  %v1372_v39 = vmul.f32 %v4021_v58, %v4644_v28 }
 0x45a   :  { %5527 = vst [vmem:[#allocation27_spill] sm:$0xff] %v4611_v46  ;;  %v1193_v36 = vadd.f32 %v4417_v25, %v1192_v52  ;;  %1294 = vadd.xlane.f32.xlu0 %v4611_v46  ;;  %v2942_v50 = vpop.f32.mrb[17].mxu1  ;;  %1428 = vadd.xlane.f32.xlu1 %v1397_v32  ;;  %v1705_v32 = vld [vmem:[%s5483_s9 + $0x30] sm:$0xff]  ;;  %v4659_v52 = vsub.f32 %v4497_v62, %v1315_v26 }
 0x45b   :  { %3225 = vmatpush3.bf16.msra.mxu1 %v3224_v63  ;;  %v3230_v17 = vpack.c.bf16 %v1706_v49, %v1705_v32  ;;  %v5532_v32 = vld [vmem:[#allocation19_spill] sm:$0xff] }
 0x45c   :  { %v4628_v22 = vadd.f32 %v1193_v36, %v4191_v45  ;;  %v1704_v45 = vld [vmem:[%s5483_s9 + $0x28] sm:$0xff]  ;;  %3226 = vmatprep.subr.bf16.mxu1 %v5528_v15  ;;  %v1316_v36 = vmul.f32 0.125, %v1267_v1  ;;  %v1709_v1 = vld [vmem:[%s5483_s9 + $0x50] sm:$0xff] }
 0x45d   :  { %v1197_v2 = vpop.f32.mrb[18].mxu1  ;;  %v3227_v31 = vpack.c.bf16 %v1704_v45, %v1703_v47  ;;  %v1373_v47 = vmul.f32 %v4021_v58, %v4659_v52 }
 0x45e   :  { %5529 = vst [vmem:[#allocation28_spill] sm:$0xff] %v4628_v22  ;;  %v1198_v33 = vadd.f32 %v4417_v25, %v1197_v2  ;;  %1296 = vadd.xlane.f32.xlu0 %v4628_v22  ;;  %v2945_v53 = vpop.f32.mrb[19].mxu1  ;;  %1430 = vadd.xlane.f32.xlu1 %v1398_v13  ;;  %v1707_v13 = vld [vmem:[%s5483_s9 + $0x40] sm:$0xff]  ;;  %v4676_v11 = vsub.f32 %v4514_v41, %v1316_v36 }
 0x45f   :  { %3228 = vmatpush3.bf16.msra.mxu1 %v3227_v31  ;;  %v5531_v2 = vld [vmem:[#allocation18_spill] sm:$0xff]  ;;  %v1401_v53 = vmul.f32 %v1372_v39, %v1372_v39 }
 0x460   :  { %v4647_v42 = vadd.f32 %v1198_v33, %v4197_v27  ;;  %v1400_v27 = vmul.f32 %v1371_v34, %v1371_v34  ;;  %3229 = vmatprep.subr.bf16.mxu1 %v5528_v15 }
 0x461   :  { %v1202_v55 = vpop.f32.mrb[20].mxu1 }
 0x462   :  { %5530 = vst [vmem:[#allocation29_spill] sm:$0xff] %v4647_v42  ;;  %v1203_v40 = vadd.f32 %v4417_v25, %v1202_v55  ;;  %1298 = vadd.xlane.f32.xlu0 %v4647_v42  ;;  %v2948_v44 = vpop.f32.mrb[21].mxu1  ;;  %1432 = vadd.xlane.f32.xlu1 %v1399_v35  ;;  %v1710_v55 = vld [vmem:[%s5483_s9 + $0x58] sm:$0xff] }
 0x463   :  { %3231 = vmatpush3.bf16.msra.mxu1 %v3230_v17  ;;  %v1374_v17 = vmul.f32 %v4021_v58, %v4676_v11 }
 0x464   :  { %v4662_v50 = vadd.f32 %v1203_v40, %v4203_v51  ;;  %v1708_v51 = vld [vmem:[%s5483_s9 + $0x48] sm:$0xff]  ;;  %3232 = vmatprep.subr.bf16.mxu1 %v5528_v15  ;;  %v3236_v40 = vpack.c.bf16 %v1710_v55, %v1709_v1 }
 0x465   :  { %v1207_v6 = vpop.f32.mrb[22].mxu1  ;;  %v3233_v38 = vpack.c.bf16 %v1708_v51, %v1707_v13  ;;  %v5533_v51 = vld [vmem:[#allocation20_spill] sm:$0xff] }
 0x466   :  { %v1208_v63 = vadd.f32 %v4417_v25, %v1207_v6  ;;  %1300 = vadd.xlane.f32.xlu0 %v4662_v50  ;;  %v2951_v14 = vpop.f32.mrb[23].mxu1  ;;  %1434 = vadd.xlane.f32.xlu1 %v1400_v27  ;;  %v1402_v27 = vmul.f32 %v1373_v47, %v1373_v47  ;;  %v1714_v47 = vld [vmem:[%s5483_s9 + $0x78] sm:$0xff] }
 0x467   :  { %3234 = vmatpush3.bf16.msra.mxu1 %v3233_v38  ;;  %v1712_v14 = vld [vmem:[%s5483_s9 + $0x68] sm:$0xff] }
 0x468   :  { %v4679_v33 = vadd.f32 %v1208_v63, %v5531_v2  ;;  %3235 = vmatprep.subr.bf16.mxu1 %v5528_v15  ;;  %v1711_v63 = vld [vmem:[%s5483_s9 + $0x60] sm:$0xff]  ;;  %v1403_v2 = vmul.f32 %v1374_v17, %v1374_v17 }
 0x469   :  { %v1269_v45 = vpop.xlane.xlu1 %1268  ;;  %v1212_v34 = vpop.f32.mrb[24].mxu1  ;;  %v3239_v13 = vpack.c.bf16 %v1712_v14, %v1711_v63 }
 0x46a   :  { %v1317_v31 = vmul.f32 0.125, %v1269_v45  ;;  %v1213_v26 = vadd.f32 %v4417_v25, %v1212_v34  ;;  %1302 = vadd.xlane.f32.xlu0 %v4679_v33  ;;  %v2954_v35 = vpop.f32.mrb[25].mxu1  ;;  %1436 = vadd.xlane.f32.xlu1 %v1401_v53  ;;  %v1713_v53 = vld [vmem:[%s5483_s9 + $0x70] sm:$0xff] }
 0x46b   :  { %3237 = vmatpush3.bf16.msra.mxu1 %v3236_v40  ;;  %v3242_v45 = vpack.c.bf16 %v1714_v47, %v1713_v53 }
 0x46c   :  { %v4693_v44 = vsub.f32 %v4519_v29, %v1317_v31  ;;  %v4696_v49 = vadd.f32 %v1213_v26, %v5532_v32  ;;  %3238 = vmatprep.subr.bf16.mxu1 %v5528_v15 }
 0x46d   :  { %v1217_v36 = vpop.f32.mrb[26].mxu1 }
 0x46e   :  { %v1218_v39 = vadd.f32 %v4417_v25, %v1217_v36  ;;  %1304 = vadd.xlane.f32.xlu0 %v4696_v49  ;;  %v2957_v6 = vpop.f32.mrb[27].mxu1  ;;  %1438 = vadd.xlane.f32.xlu1 %v1402_v27  ;;  %v1375_v25 = vmul.f32 %v4021_v58, %v4693_v44 }
 0x46f   :  { %3240 = vmatpush3.bf16.msra.mxu1 %v3239_v13 }
 0x470   :  { %v4710_v38 = vadd.f32 %v1218_v39, %v5533_v51  ;;  %3241 = vmatprep.subr.bf16.mxu1 %v5528_v15  ;;  %v1404_v34 = vmul.f32 %v1375_v25, %v1375_v25 }
 0x472   :  { %1306 = vadd.xlane.f32.xlu0 %v4710_v38  ;;  %1440 = vadd.xlane.f32.xlu1 %v1403_v2 }
 0x473   :  { %3243 = vmatpush3.bf16.msra.mxu1 %v3242_v45 }
 0x476   :  { %1442 = vadd.xlane.f32.xlu0 %v1404_v34 }
 0x484   :  { %v1271_v31 = vpop.xlane.xlu0 %1270 }
 0x485   :  { %v1318_v26 = vmul.f32 0.125, %v1271_v31 }
 0x487   :  { %v4723_v35 = vsub.f32 %v4524_v60, %v1318_v26 }
 0x489   :  { %v1376_v1 = vmul.f32 %v4021_v58, %v4723_v35 }
 0x48a   :  { %v1273_v55 = vpop.xlane.xlu1 %1272 }
 0x48b   :  { %v1319_v40 = vmul.f32 0.125, %v1273_v55  ;;  %v1405_v32 = vmul.f32 %v1376_v1, %v1376_v1 }
 0x48d   :  { %v4728_v27 = vsub.f32 %v4529_v54, %v1319_v40  ;;  %1444 = vadd.xlane.f32.xlu1 %v1405_v32 }
 0x48e   :  { %v1275_v17 = vpop.xlane.xlu0 %1274 }
 0x48f   :  { %v1320_v36 = vmul.f32 0.125, %v1275_v17  ;;  %v1377_v39 = vmul.f32 %v4021_v58, %v4728_v27 }
 0x491   :  { %v4733_v6 = vsub.f32 %v4534_v20, %v1320_v36  ;;  %v1406_v63 = vmul.f32 %v1377_v39, %v1377_v39 }
 0x492   :  { %v1277_v14 = vpop.xlane.xlu1 %1276 }
 0x493   :  { %v1321_v13 = vmul.f32 0.125, %v1277_v14  ;;  %1446 = vadd.xlane.f32.xlu0 %v1406_v63  ;;  %v1378_v51 = vmul.f32 %v4021_v58, %v4733_v6 }
 0x495   :  { %v4738_v2 = vsub.f32 %v4539_v10, %v1321_v13  ;;  %v1407_v25 = vmul.f32 %v1378_v51, %v1378_v51 }
 0x496   :  { %v1281_v53 = vpop.xlane.xlu1 %1280  ;;  %v1279_v47 = vpop.xlane.xlu0 %1278 }
 0x497   :  { %v1323_v45 = vmul.f32 0.125, %v1281_v53  ;;  %v1322_v34 = vmul.f32 0.125, %v1279_v47  ;;  %1448 = vadd.xlane.f32.xlu1 %v1407_v25  ;;  %v1379_v31 = vmul.f32 %v4021_v58, %v4738_v2 }
 0x499   :  { %v4743_v26 = vsub.f32 %v4545_v48, %v1323_v45  ;;  %v4746_v1 = vsub.f32 %v4548_v61, %v1322_v34  ;;  %v1408_v55 = vmul.f32 %v1379_v31, %v1379_v31 }
 0x49a   :  { %v1283_v40 = vpop.xlane.xlu0 %1282 }
 0x49b   :  { %v1324_v32 = vmul.f32 0.125, %v1283_v40  ;;  %1450 = vadd.xlane.f32.xlu0 %v1408_v55  ;;  %v1381_v17 = vmul.f32 %v4021_v58, %v4743_v26  ;;  %v1380_v36 = vmul.f32 %v4021_v58, %v4746_v1 }
 0x49c   :  { %v1285_v39 = vpop.xlane.xlu1 %1284 }
 0x49d   :  { %v4753_v63 = vsub.f32 %v4554_v21, %v1324_v32  ;;  %v1325_v14 = vmul.f32 0.125, %v1285_v39  ;;  %v1410_v13 = vmul.f32 %v1381_v17, %v1381_v17  ;;  %v1409_v51 = vmul.f32 %v1380_v36, %v1380_v36 }
 0x49f   :  { %v4756_v25 = vsub.f32 %v4558_v7, %v1325_v14  ;;  %1454 = vadd.xlane.f32.xlu0 %v1410_v13  ;;  %1452 = vadd.xlane.f32.xlu1 %v1409_v51  ;;  %v1382_v53 = vmul.f32 %v4021_v58, %v4753_v63 }
 0x4a1   :  { %v1411_v47 = vmul.f32 %v1382_v53, %v1382_v53  ;;  %v1383_v45 = vmul.f32 %v4021_v58, %v4756_v25 }
 0x4a3   :  { %1456 = vadd.xlane.f32.xlu1 %v1411_v47  ;;  %v1412_v34 = vmul.f32 %v1383_v45, %v1383_v45 }
 0x4a5   :  { %1458 = vadd.xlane.f32.xlu0 %v1412_v34 }
 0x4d7   :  { %v1287_v31 = vpop.xlane.xlu0 %1286 }
 0x4d8   :  { %v1326_v55 = vmul.f32 0.125, %v1287_v31 }
 0x4da   :  { %v4763_v40 = vsub.f32 %v4567_v57, %v1326_v55 }
 0x4db   :  { %v1289_v32 = vpop.xlane.xlu1 %1288 }
 0x4dc   :  { %v1327_v17 = vmul.f32 0.125, %v1289_v32  ;;  %v1384_v36 = vmul.f32 %v4021_v58, %v4763_v40 }
 0x4de   :  { %v4768_v39 = vsub.f32 %v4575_v0, %v1327_v17  ;;  %v1413_v14 = vmul.f32 %v1384_v36, %v1384_v36 }
 0x4df   :  { %v1425_v13 = vpop.xlane.xlu1 %1424  ;;  %v1291_v51 = vpop.xlane.xlu0 %1290 }
 0x4e0   :  { %v1482_v53 = vmul.f32 0.125, %v1425_v13  ;;  %v1328_v47 = vmul.f32 0.125, %v1291_v51  ;;  %1460 = vadd.xlane.f32.xlu1 %v1413_v14  ;;  %v1385_v45 = vmul.f32 %v4021_v58, %v4768_v39 }
 0x4e2   :  { %v1511_v34 = vadd.f32 1e-05, %v1482_v53  ;;  %v4773_v31 = vsub.f32 %v4587_v43, %v1328_v47  ;;  %v1414_v55 = vmul.f32 %v1385_v45, %v1385_v45 }
 0x4e3   :  { %v1427_v32 = vpop.xlane.xlu1 %1426  ;;  %v1293_v15 = vpop.xlane.xlu0 %1292 }
 0x4e4   :  { %3365 = vrsqrt.f32 %v1511_v34  ;;  %v1483_v57 = vmul.f32 0.125, %v1427_v32  ;;  %v1329_v17 = vmul.f32 0.125, %v1293_v15  ;;  %1462 = vadd.xlane.f32.xlu0 %v1414_v55  ;;  %v1386_v36 = vmul.f32 %v4021_v58, %v4773_v31 }
 0x4e6   :  { %v1512_v13 = vadd.f32 1e-05, %v1483_v57  ;;  %v4778_v14 = vsub.f32 %v4595_v12, %v1329_v17  ;;  %v1415_v51 = vmul.f32 %v1386_v36, %v1386_v36 }
 0x4e7   :  { %v1429_v0 = vpop.xlane.xlu1 %1428  ;;  %v1295_v53 = vpop.xlane.xlu0 %1294 }
 0x4e8   :  { %3367 = vrsqrt.f32 %v1512_v13  ;;  %v1484_v47 = vmul.f32 0.125, %v1429_v0  ;;  %v1330_v43 = vmul.f32 0.125, %v1295_v53  ;;  %1464 = vadd.xlane.f32.xlu1 %v1415_v51  ;;  %v1387_v45 = vmul.f32 %v4021_v58, %v4778_v14 }
 0x4ea   :  { %v1513_v34 = vadd.f32 1e-05, %v1484_v47  ;;  %v4783_v15 = vsub.f32 %v4611_v46, %v1330_v43  ;;  %v1416_v55 = vmul.f32 %v1387_v45, %v1387_v45  ;;  %v4793_v43 = vld [vmem:[%s5481_s7] ss:$0 sm:$0xff] }
 0x4eb   :  { %v1431_v32 = vpop.xlane.xlu1 %1430  ;;  %v1297_v57 = vpop.xlane.xlu0 %1296 }
 0x4ec   :  { %3369 = vrsqrt.f32 %v1513_v34  ;;  %v1485_v17 = vmul.f32 0.125, %v1431_v32  ;;  %v1331_v12 = vmul.f32 0.125, %v1297_v57  ;;  %1466 = vadd.xlane.f32.xlu0 %v1416_v55  ;;  %v1388_v36 = vmul.f32 %v4021_v58, %v4783_v15 }
 0x4ee   :  { %v3366_v0 = vpop.eup %3365  ;;  %v1514_v13 = vadd.f32 1e-05, %v1485_v17  ;;  %v4788_v51 = vsub.f32 %v4628_v22, %v1331_v12  ;;  %v1417_v53 = vmul.f32 %v1388_v36, %v1388_v36  ;;  %v4801_v12 = vld [vmem:[%s5482_s8] ss:$0 sm:$0xff] }
 0x4ef   :  { %v1569_v47 = vmul.f32 %v3366_v0, %v4564_v3  ;;  %v1433_v45 = vpop.xlane.xlu1 %1432  ;;  %v1299_v34 = vpop.xlane.xlu0 %1298 }
 0x4f0   :  { %3371 = vrsqrt.f32 %v1514_v13  ;;  %v1486_v55 = vmul.f32 0.125, %v1433_v45  ;;  %v1332_v32 = vmul.f32 0.125, %v1299_v34  ;;  %1468 = vadd.xlane.f32.xlu1 %v1417_v53  ;;  %v1389_v57 = vmul.f32 %v4021_v58, %v4788_v51 }
 0x4f1   :  { %v1605_v17 = vmul.f32 %v4793_v43, %v1569_v47 }
 0x4f2   :  { %v3368_v36 = vpop.eup %3367  ;;  %v1515_v22 = vadd.f32 1e-05, %v1486_v55  ;;  %v4805_v3 = vsub.f32 %v4647_v42, %v1332_v32  ;;  %v1418_v0 = vmul.f32 %v1389_v57, %v1389_v57 }
 0x4f3   :  { %v1435_v13 = vpop.xlane.xlu1 %1434  ;;  %v1301_v45 = vpop.xlane.xlu0 %1300  ;;  %v1641_v53 = vadd.f32 %v4801_v12, %v1605_v17  ;;  %v1570_v34 = vmul.f32 %v3368_v36, %v4572_v30 }
 0x4f4   :  { %3373 = vrsqrt.f32 %v1515_v22  ;;  %v1487_v46 = vmul.f32 0.125, %v1435_v13  ;;  %v1333_v7 = vmul.f32 0.125, %v1301_v45  ;;  %1470 = vadd.xlane.f32.xlu0 %v1418_v0  ;;  %v1390_v21 = vmul.f32 %v4021_v58, %v4805_v3 }
 0x4f5   :  { %v1670_v47 = vmax.f32 %v1641_v53, 0.0  ;;  %v1606_v55 = vmul.f32 %v4793_v43, %v1570_v34 }
 0x4f6   :  { %v3370_v48 = vpop.eup %3369  ;;  %v1516_v32 = vadd.f32 1e-05, %v1487_v46  ;;  %v4813_v57 = vsub.f32 %v4662_v50, %v1333_v7  ;;  %v1419_v42 = vmul.f32 %v1390_v21, %v1390_v21 }
 0x4f7   :  { %2991 = vmatmul.mubr.f32.vlgmr.msra.gmra.mrb[28].mxu1 %v1670_v47  ;;  %v1437_v17 = vpop.xlane.xlu1 %1436  ;;  %v1303_v61 = vpop.xlane.xlu0 %1302  ;;  %v1642_v30 = vadd.f32 %v4801_v12, %v1606_v55  ;;  %v1571_v22 = vmul.f32 %v3370_v48, %v4584_v9 }
 0x4f8   :  { %3375 = vrsqrt.f32 %v1516_v32  ;;  %v1488_v36 = vmul.f32 0.125, %v1437_v17  ;;  %v1334_v0 = vmul.f32 0.125, %v1303_v61  ;;  %1472 = vadd.xlane.f32.xlu1 %v1419_v42  ;;  %2993 = vmatprep.mubr.msk.f32.mxu1 %vm3632_vm1, %v5516_v23  ;;  %v1391_v46 = vmul.f32 %v4021_v58, %v4813_v57 }
 0x4f9   :  { %v1671_v7 = vmax.f32 %v1642_v30, 0.0  ;;  %v1607_v21 = vmul.f32 %v4793_v43, %v1571_v22 }
 0x4fa   :  { %v3372_v13 = vpop.eup %3371  ;;  %v1517_v45 = vadd.f32 1e-05, %v1488_v36  ;;  %v4823_v53 = vsub.f32 %v4679_v33, %v1334_v0  ;;  %v1420_v34 = vmul.f32 %v1391_v46, %v1391_v46 }
 0x4fb   :  { %2994 = vmatmul.mubr.f32.gmra.mrb[30].mxu1 %v1671_v7  ;;  %v1439_v48 = vpop.xlane.xlu1 %1438  ;;  %v1305_v9 = vpop.xlane.xlu0 %1304  ;;  %v1643_v61 = vadd.f32 %v4801_v12, %v1607_v21  ;;  %v1572_v42 = vmul.f32 %v3372_v13, %v4592_v19 }
 0x4fc   :  { %3377 = vrsqrt.f32 %v1517_v45  ;;  %v1489_v47 = vmul.f32 0.125, %v1439_v48  ;;  %v1335_v55 = vmul.f32 0.125, %v1305_v9  ;;  %1474 = vadd.xlane.f32.xlu0 %v1420_v34  ;;  %2996 = vmatprep.mubr.msk.f32.mxu1 %vm3632_vm1, %v5516_v23  ;;  %v1392_v32 = vmul.f32 %v4021_v58, %v4823_v53 }
 0x4fd   :  { %v1672_v17 = vmax.f32 %v1643_v61, 0.0  ;;  %v1608_v30 = vmul.f32 %v4793_v43, %v1572_v42 }
 0x4fe   :  { %v3374_v22 = vpop.eup %3373  ;;  %v1518_v36 = vadd.f32 1e-05, %v1489_v47  ;;  %v4833_v0 = vsub.f32 %v4696_v49, %v1335_v55  ;;  %v1421_v46 = vmul.f32 %v1392_v32, %v1392_v32 }
 0x4ff   :  { %2997 = vmatmul.mubr.f32.gmra.mrb[32].mxu1 %v1672_v17  ;;  %v1441_v19 = vpop.xlane.xlu1 %1440  ;;  %v1307_v7 = vpop.xlane.xlu0 %1306  ;;  %v1644_v21 = vadd.f32 %v4801_v12, %v1608_v30  ;;  %v1573_v13 = vmul.f32 %v3374_v22, %v4608_v37 }
 0x500   :  { %3379 = vrsqrt.f32 %v1518_v36  ;;  %v1490_v45 = vmul.f32 0.125, %v1441_v19  ;;  %v1336_v34 = vmul.f32 0.125, %v1307_v7  ;;  %1476 = vadd.xlane.f32.xlu1 %v1421_v46  ;;  %2999 = vmatprep.mubr.msk.f32.mxu1 %vm3632_vm1, %v5516_v23  ;;  %v1393_v48 = vmul.f32 %v4021_v58, %v4833_v0 }
 0x501   :  { %v1673_v9 = vmax.f32 %v1644_v21, 0.0  ;;  %v1609_v61 = vmul.f32 %v4793_v43, %v1573_v13 }
 0x502   :  { %v3376_v42 = vpop.eup %3375  ;;  %v1519_v47 = vadd.f32 1e-05, %v1490_v45  ;;  %v4843_v55 = vsub.f32 %v4710_v38, %v1336_v34  ;;  %v1422_v32 = vmul.f32 %v1393_v48, %v1393_v48 }
 0x503   :  { %3000 = vmatmul.mubr.f32.gmra.mrb[34].mxu1 %v1673_v9  ;;  %v1443_v37 = vpop.xlane.xlu0 %1442  ;;  %v1645_v17 = vadd.f32 %v4801_v12, %v1609_v61  ;;  %v1574_v30 = vmul.f32 %v3376_v42, %v4624_v4 }
 0x504   :  { %3381 = vrsqrt.f32 %v1519_v47  ;;  %v1491_v22 = vmul.f32 0.125, %v1443_v37  ;;  %1478 = vadd.xlane.f32.xlu0 %v1422_v32  ;;  %3002 = vmatprep.mubr.msk.f32.mxu1 %vm3632_vm1, %v5516_v23  ;;  %v1394_v36 = vmul.f32 %v4021_v58, %v4843_v55 }
 0x505   :  { %v1674_v46 = vmax.f32 %v1645_v17, 0.0  ;;  %v1610_v19 = vmul.f32 %v4793_v43, %v1574_v30 }
 0x506   :  { %v3378_v7 = vpop.eup %3377  ;;  %v1520_v21 = vadd.f32 1e-05, %v1491_v22  ;;  %v1423_v13 = vmul.f32 %v1394_v36, %v1394_v36 }
 0x507   :  { %3003 = vmatmul.mubr.f32.gmra.mrb[36].mxu1 %v1674_v46  ;;  %v1646_v45 = vadd.f32 %v4801_v12, %v1610_v19  ;;  %v1575_v4 = vmul.f32 %v3378_v7, %v4644_v28 }
 0x508   :  { %3383 = vrsqrt.f32 %v1520_v21  ;;  %1480 = vadd.xlane.f32.xlu1 %v1423_v13  ;;  %3005 = vmatprep.mubr.msk.f32.mxu1 %vm3632_vm1, %v5516_v23 }
 0x509   :  { %v1675_v34 = vmax.f32 %v1646_v45, 0.0  ;;  %v1611_v48 = vmul.f32 %v4793_v43, %v1575_v4 }
 0x50a   :  { %v3380_v9 = vpop.eup %3379 }
 0x50b   :  { %3006 = vmatmul.mubr.f32.gmra.mrb[38].mxu1 %v1675_v34  ;;  %v1647_v61 = vadd.f32 %v4801_v12, %v1611_v48  ;;  %v1576_v42 = vmul.f32 %v3380_v9, %v4659_v52 }
 0x50c   :  { %3008 = vmatprep.mubr.msk.f32.mxu1 %vm3632_vm1, %v5516_v23 }
 0x50d   :  { %v1676_v47 = vmax.f32 %v1647_v61, 0.0  ;;  %v1612_v28 = vmul.f32 %v4793_v43, %v1576_v42 }
 0x50e   :  { %v3382_v32 = vpop.eup %3381 }
 0x50f   :  { %3009 = vmatmul.mubr.f32.gmra.mrb[40].mxu1 %v1676_v47  ;;  %v1648_v37 = vadd.f32 %v4801_v12, %v1612_v28  ;;  %v1577_v17 = vmul.f32 %v3382_v32, %v4676_v11 }
 0x510   :  { %3011 = vmatprep.mubr.msk.f32.mxu1 %vm3632_vm1, %v5516_v23 }
 0x511   :  { %v1677_v30 = vmax.f32 %v1648_v37, 0.0  ;;  %v1613_v22 = vmul.f32 %v4793_v43, %v1577_v17 }
 0x512   :  { %v3384_v36 = vpop.eup %3383 }
 0x513   :  { %3012 = vmatmul.mubr.f32.gmra.mrb[42].mxu1 %v1677_v30  ;;  %v1649_v52 = vadd.f32 %v4801_v12, %v1613_v22  ;;  %v1578_v46 = vmul.f32 %v3384_v36, %v4693_v44 }
 0x514   :  { %3014 = vmatprep.mubr.msk.f32.mxu1 %vm3632_vm1, %v5516_v23 }
 0x515   :  { %v1678_v19 = vmax.f32 %v1649_v52, 0.0  ;;  %v1614_v7 = vmul.f32 %v4793_v43, %v1578_v46 }
 0x517   :  { %3015 = vmatmul.mubr.f32.gmra.mrb[44].mxu1 %v1678_v19  ;;  %v1650_v11 = vadd.f32 %v4801_v12, %v1614_v7 }
 0x518   :  { %3017 = vmatprep.mubr.msk.f32.mxu1 %vm3632_vm1, %v5516_v23 }
 0x519   :  { %v1679_v21 = vmax.f32 %v1650_v11, 0.0 }
 0x51a   :  { %v1445_v13 = vpop.xlane.xlu1 %1444 }
 0x51b   :  { %v1492_v45 = vmul.f32 0.125, %v1445_v13  ;;  %3018 = vmatmul.mubr.f32.gmra.mrb[46].mxu1 %v1679_v21 }
 0x51c   :  { %3020 = vmatprep.mubr.msk.f32.mxu1 %vm3632_vm1, %v5516_v23 }
 0x51d   :  { %v1521_v44 = vadd.f32 1e-05, %v1492_v45 }
 0x51f   :  { %3385 = vrsqrt.f32 %v1521_v44 }
 0x520   :  { %v1447_v4 = vpop.xlane.xlu0 %1446 }
 0x521   :  { %v1493_v34 = vmul.f32 0.125, %v1447_v4 }
 0x523   :  { %v1522_v48 = vadd.f32 1e-05, %v1493_v34 }
 0x524   :  { %v1449_v9 = vpop.xlane.xlu1 %1448 }
 0x525   :  { %3387 = vrsqrt.f32 %v1522_v48  ;;  %v1494_v61 = vmul.f32 0.125, %v1449_v9 }
 0x527   :  { %v1523_v42 = vadd.f32 1e-05, %v1494_v61 }
 0x528   :  { %v1451_v47 = vpop.xlane.xlu0 %1450 }
 0x529   :  { %v3386_v28 = vpop.eup %3385  ;;  %3389 = vrsqrt.f32 %v1523_v42  ;;  %v1495_v32 = vmul.f32 0.125, %v1451_v47 }
 0x52a   :  { %v1579_v37 = vmul.f32 %v3386_v28, %v4723_v35 }
 0x52b   :  { %v1524_v17 = vadd.f32 1e-05, %v1495_v32 }
 0x52c   :  { %v1453_v30 = vpop.xlane.xlu1 %1452  ;;  %v1455_v22 = vpop.xlane.xlu0 %1454  ;;  %v1615_v36 = vmul.f32 %v4793_v43, %v1579_v37 }
 0x52d   :  { %3391 = vrsqrt.f32 %v1524_v17  ;;  %v1496_v52 = vmul.f32 0.125, %v1453_v30  ;;  %v1497_v46 = vmul.f32 0.125, %v1455_v22 }
 0x52e   :  { %v1651_v19 = vadd.f32 %v4801_v12, %v1615_v36 }
 0x52f   :  { %v3388_v7 = vpop.eup %3387  ;;  %v1525_v11 = vadd.f32 1e-05, %v1496_v52  ;;  %v1526_v21 = vadd.f32 1e-05, %v1497_v46 }
 0x530   :  { %v1457_v13 = vpop.xlane.xlu1 %1456  ;;  %v1680_v45 = vmax.f32 %v1651_v19, 0.0  ;;  %v1580_v44 = vmul.f32 %v3388_v7, %v4728_v27 }
 0x531   :  { %3393 = vrsqrt.f32 %v1525_v11  ;;  %v1498_v4 = vmul.f32 0.125, %v1457_v13 }
 0x532   :  { %3395 = vrsqrt.f32 %v1526_v21  ;;  %3021 = vmatmul.mubr.f32.gmra.mrb[48].mxu1 %v1680_v45  ;;  %v1459_v35 = vpop.xlane.xlu0 %1458  ;;  %v1616_v34 = vmul.f32 %v4793_v43, %v1580_v44 }
 0x533   :  { %v3390_v48 = vpop.eup %3389  ;;  %v1527_v9 = vadd.f32 1e-05, %v1498_v4  ;;  %v1499_v61 = vmul.f32 0.125, %v1459_v35  ;;  %3023 = vmatprep.mubr.msk.f32.mxu1 %vm3632_vm1, %v5516_v23 }
 0x534   :  { %v1652_v42 = vadd.f32 %v4801_v12, %v1616_v34  ;;  %v1581_v47 = vmul.f32 %v3390_v48, %v4733_v6 }
 0x535   :  { %3397 = vrsqrt.f32 %v1527_v9  ;;  %v1528_v28 = vadd.f32 1e-05, %v1499_v61 }
 0x536   :  { %v1681_v27 = vmax.f32 %v1652_v42, 0.0  ;;  %v1617_v32 = vmul.f32 %v4793_v43, %v1581_v47 }
 0x537   :  { %v3392_v37 = vpop.eup %3391  ;;  %3399 = vrsqrt.f32 %v1528_v28 }
 0x538   :  { %3024 = vmatmul.mubr.f32.gmra.mrb[50].mxu1 %v1681_v27  ;;  %v1653_v17 = vadd.f32 %v4801_v12, %v1617_v32  ;;  %v1582_v30 = vmul.f32 %v3392_v37, %v4738_v2 }
 0x539   :  { %3026 = vmatprep.mubr.msk.f32.mxu1 %vm3632_vm1, %v5516_v23 }
 0x53a   :  { %v1682_v22 = vmax.f32 %v1653_v17, 0.0  ;;  %v1618_v36 = vmul.f32 %v4793_v43, %v1582_v30 }
 0x53b   :  { %v3394_v52 = vpop.eup %3393 }
 0x53c   :  { %v3396_v6 = vpop.eup %3395  ;;  %3027 = vmatmul.mubr.f32.gmra.mrb[52].mxu1 %v1682_v22  ;;  %v1654_v46 = vadd.f32 %v4801_v12, %v1618_v36  ;;  %v1583_v19 = vmul.f32 %v3394_v52, %v4746_v1 }
 0x53d   :  { %3029 = vmatprep.mubr.msk.f32.mxu1 %vm3632_vm1, %v5516_v23  ;;  %v1584_v7 = vmul.f32 %v3396_v6, %v4743_v26 }
 0x53e   :  { %v1683_v11 = vmax.f32 %v1654_v46, 0.0  ;;  %v1619_v2 = vmul.f32 %v4793_v43, %v1583_v19 }
 0x53f   :  { %v3398_v21 = vpop.eup %3397  ;;  %v1620_v13 = vmul.f32 %v4793_v43, %v1584_v7 }
 0x540   :  { %3030 = vmatmul.mubr.f32.gmra.mrb[54].mxu1 %v1683_v11  ;;  %v1655_v45 = vadd.f32 %v4801_v12, %v1619_v2  ;;  %v1585_v44 = vmul.f32 %v3398_v21, %v4753_v63 }
 0x541   :  { %v3400_v4 = vpop.eup %3399  ;;  %3032 = vmatprep.mubr.msk.f32.mxu1 %vm3632_vm1, %v5516_v23  ;;  %v1656_v35 = vadd.f32 %v4801_v12, %v1620_v13 }
 0x542   :  { %v1684_v1 = vmax.f32 %v1655_v45, 0.0  ;;  %v1621_v26 = vmul.f32 %v4793_v43, %v1585_v44  ;;  %v1586_v34 = vmul.f32 %v3400_v4, %v4756_v25 }
 0x543   :  { %v1685_v48 = vmax.f32 %v1656_v35, 0.0 }
 0x544   :  { %3033 = vmatmul.mubr.f32.gmra.mrb[56].mxu1 %v1684_v1  ;;  %v1657_v9 = vadd.f32 %v4801_v12, %v1621_v26  ;;  %v1622_v63 = vmul.f32 %v4793_v43, %v1586_v34 }
 0x545   :  { %3035 = vmatprep.mubr.msk.f32.mxu1 %vm3632_vm1, %v5516_v23 }
 0x546   :  { %v1686_v61 = vmax.f32 %v1657_v9, 0.0  ;;  %v1658_v42 = vadd.f32 %v4801_v12, %v1622_v63 }
 0x548   :  { %3036 = vmatmul.mubr.f32.gmra.mrb[58].mxu1 %v1685_v48  ;;  %v1687_v25 = vmax.f32 %v1658_v42, 0.0 }
 0x549   :  { %3038 = vmatprep.mubr.msk.f32.mxu1 %vm3632_vm1, %v5516_v23 }
 0x54c   :  { %3039 = vmatmul.mubr.f32.gmra.mrb[60].mxu1 %v1686_v61 }
 0x54d   :  { %3041 = vmatprep.mubr.msk.f32.mxu1 %vm3632_vm1, %v5516_v23 }
 0x550   :  { %3042 = vmatmul.mubr.f32.gmra.mrb[62].mxu1 %v1687_v25 }
 0x551   :  { %3044 = vmatprep.mubr.msk.f32.mxu1 %vm3632_vm1, %v5516_v23 }
 0x56d   :  { %v1461_v47 = vpop.xlane.xlu1 %1460 }
 0x56e   :  { %v1500_v28 = vmul.f32 0.125, %v1461_v47 }
 0x570   :  { %v1529_v27 = vadd.f32 1e-05, %v1500_v28 }
 0x571   :  { %v1463_v32 = vpop.xlane.xlu0 %1462 }
 0x572   :  { %3401 = vrsqrt.f32 %v1529_v27  ;;  %v1501_v37 = vmul.f32 0.125, %v1463_v32 }
 0x574   :  { %v1530_v17 = vadd.f32 1e-05, %v1501_v37 }
 0x575   :  { %v1465_v30 = vpop.xlane.xlu1 %1464 }
 0x576   :  { %3403 = vrsqrt.f32 %v1530_v17  ;;  %v1502_v22 = vmul.f32 0.125, %v1465_v30 }
 0x578   :  { %v1531_v36 = vadd.f32 1e-05, %v1502_v22 }
 0x579   :  { %v1467_v52 = vpop.xlane.xlu0 %1466 }
 0x57a   :  { %3405 = vrsqrt.f32 %v1531_v36  ;;  %v1503_v6 = vmul.f32 0.125, %v1467_v52 }
 0x57c   :  { %v3402_v46 = vpop.eup %3401  ;;  %v1532_v19 = vadd.f32 1e-05, %v1503_v6 }
 0x57d   :  { %v1469_v7 = vpop.xlane.xlu1 %1468  ;;  %v1587_v11 = vmul.f32 %v3402_v46, %v4763_v40 }
 0x57e   :  { %3407 = vrsqrt.f32 %v1532_v19  ;;  %v1504_v2 = vmul.f32 0.125, %v1469_v7 }
 0x57f   :  { %v1623_v21 = vmul.f32 %v4793_v43, %v1587_v11 }
 0x580   :  { %v3404_v13 = vpop.eup %3403  ;;  %v1533_v45 = vadd.f32 1e-05, %v1504_v2 }
 0x581   :  { %v1471_v44 = vpop.xlane.xlu0 %1470  ;;  %v1659_v4 = vadd.f32 %v4801_v12, %v1623_v21  ;;  %v1588_v1 = vmul.f32 %v3404_v13, %v4768_v39 }
 0x582   :  { %3409 = vrsqrt.f32 %v1533_v45  ;;  %v1505_v35 = vmul.f32 0.125, %v1471_v44 }
 0x583   :  { %v1688_v26 = vmax.f32 %v1659_v4, 0.0  ;;  %v1624_v34 = vmul.f32 %v4793_v43, %v1588_v1 }
 0x584   :  { %v3406_v48 = vpop.eup %3405  ;;  %v1534_v9 = vadd.f32 1e-05, %v1505_v35 }
 0x585   :  { %v1473_v63 = vpop.xlane.xlu1 %1472  ;;  %3045 = vmatmul.mubr.f32.gmra.mrb[64].mxu1 %v1688_v26  ;;  %v1660_v40 = vadd.f32 %v4801_v12, %v1624_v34  ;;  %v1589_v61 = vmul.f32 %v3406_v48, %v4773_v31 }
 0x586   :  { %3411 = vrsqrt.f32 %v1534_v9  ;;  %v1506_v42 = vmul.f32 0.125, %v1473_v63  ;;  %3047 = vmatprep.mubr.msk.f32.mxu1 %vm3632_vm1, %v5516_v23 }
 0x587   :  { %v1689_v25 = vmax.f32 %v1660_v40, 0.0  ;;  %v1625_v39 = vmul.f32 %v4793_v43, %v1589_v61 }
 0x588   :  { %v3408_v47 = vpop.eup %3407  ;;  %v1535_v28 = vadd.f32 1e-05, %v1506_v42 }
 0x589   :  { %3048 = vmatmul.mubr.f32.gmra.mrb[66].mxu1 %v1689_v25  ;;  %v1475_v27 = vpop.xlane.xlu0 %1474  ;;  %v1661_v32 = vadd.f32 %v4801_v12, %v1625_v39  ;;  %v1590_v37 = vmul.f32 %v3408_v47, %v4778_v14 }
 0x58a   :  { %3413 = vrsqrt.f32 %v1535_v28  ;;  %v1507_v17 = vmul.f32 0.125, %v1475_v27  ;;  %3050 = vmatprep.mubr.msk.f32.mxu1 %vm3632_vm1, %v5516_v23 }
 0x58b   :  { %v1690_v31 = vmax.f32 %v1661_v32, 0.0  ;;  %v1626_v30 = vmul.f32 %v4793_v43, %v1590_v37 }
 0x58c   :  { %v3410_v22 = vpop.eup %3409  ;;  %v1536_v36 = vadd.f32 1e-05, %v1507_v17 }
 0x58d   :  { %v1477_v52 = vpop.xlane.xlu1 %1476  ;;  %3051 = vmatmul.mubr.f32.gmra.mrb[68].mxu1 %v1690_v31  ;;  %v1662_v6 = vadd.f32 %v4801_v12, %v1626_v30  ;;  %v1591_v46 = vmul.f32 %v3410_v22, %v4783_v15 }
 0x58e   :  { %3415 = vrsqrt.f32 %v1536_v36  ;;  %v1508_v19 = vmul.f32 0.125, %v1477_v52  ;;  %3053 = vmatprep.mubr.msk.f32.mxu1 %vm3632_vm1, %v5516_v23 }
 0x58f   :  { %v1691_v14 = vmax.f32 %v1662_v6, 0.0  ;;  %v1627_v7 = vmul.f32 %v4793_v43, %v1591_v46 }
 0x590   :  { %v3412_v11 = vpop.eup %3411  ;;  %v1537_v2 = vadd.f32 1e-05, %v1508_v19 }
 0x591   :  { %3054 = vmatmul.mubr.f32.gmra.mrb[70].mxu1 %v1691_v14  ;;  %v1479_v21 = vpop.xlane.xlu0 %1478  ;;  %v1663_v13 = vadd.f32 %v4801_v12, %v1627_v7  ;;  %v1592_v45 = vmul.f32 %v3412_v11, %v4788_v51  ;;  %v4973_v14 = vld [vmem:[%s5484_s10] ss:$0 sm:$0xff] }
 0x592   :  { %3417 = vrsqrt.f32 %v1537_v2  ;;  %v1509_v44 = vmul.f32 0.125, %v1479_v21  ;;  %3056 = vmatprep.mubr.msk.f32.mxu1 %vm3632_vm1, %v5516_v23 }
 0x593   :  { %v1692_v15 = vmax.f32 %v1663_v13, 0.0  ;;  %v1628_v4 = vmul.f32 %v4793_v43, %v1592_v45 }
 0x594   :  { %v3414_v1 = vpop.eup %3413  ;;  %v1538_v35 = vadd.f32 1e-05, %v1509_v44 }
 0x595   :  { %v1481_v26 = vpop.xlane.xlu1 %1480  ;;  %3057 = vmatmul.mubr.f32.gmra.mrb[72].mxu1 %v1692_v15  ;;  %v1664_v34 = vadd.f32 %v4801_v12, %v1628_v4  ;;  %v1593_v48 = vmul.f32 %v3414_v1, %v4805_v3 }
 0x596   :  { %3419 = vrsqrt.f32 %v1538_v35  ;;  %v1510_v9 = vmul.f32 0.125, %v1481_v26  ;;  %3059 = vmatprep.mubr.msk.f32.mxu1 %vm3632_vm1, %v5516_v23 }
 0x597   :  { %v1693_v51 = vmax.f32 %v1664_v34, 0.0  ;;  %v1629_v63 = vmul.f32 %v4793_v43, %v1593_v48 }
 0x598   :  { %v3416_v40 = vpop.eup %3415  ;;  %v1539_v61 = vadd.f32 1e-05, %v1510_v9 }
 0x599   :  { %3060 = vmatmul.mubr.f32.gmra.mrb[74].mxu1 %v1693_v51  ;;  %v1665_v42 = vadd.f32 %v4801_v12, %v1629_v63  ;;  %v1594_v25 = vmul.f32 %v3416_v40, %v4813_v57 }
 0x59a   :  { %3421 = vrsqrt.f32 %v1539_v61  ;;  %3062 = vmatprep.mubr.msk.f32.mxu1 %vm3632_vm1, %v5516_v23 }
 0x59b   :  { %v1694_v3 = vmax.f32 %v1665_v42, 0.0  ;;  %v1630_v39 = vmul.f32 %v4793_v43, %v1594_v25 }
 0x59c   :  { %v3418_v47 = vpop.eup %3417 }
 0x59d   :  { %3063 = vmatmul.mubr.f32.gmra.mrb[76].mxu1 %v1694_v3  ;;  %v1666_v28 = vadd.f32 %v4801_v12, %v1630_v39  ;;  %v1595_v27 = vmul.f32 %v3418_v47, %v4823_v53 }
 0x59e   :  { %3065 = vmatprep.mubr.msk.f32.mxu1 %vm3632_vm1, %v5516_v23 }
 0x59f   :  { %v1695_v32 = vmax.f32 %v1666_v28, 0.0  ;;  %v1631_v37 = vmul.f32 %v4793_v43, %v1595_v27 }
 0x5a0   :  { %v3420_v57 = vpop.eup %3419 }
 0x5a1   :  { %3066 = vmatmul.mubr.f32.gmra.mrb[78].mxu1 %v1695_v32  ;;  %v1667_v17 = vadd.f32 %v4801_v12, %v1631_v37  ;;  %v1596_v31 = vmul.f32 %v3420_v57, %v4833_v0 }
 0x5a2   :  { %3068 = vmatprep.mubr.msk.f32.mxu1 %vm3632_vm1, %v5516_v23 }
 0x5a3   :  { %v1696_v30 = vmax.f32 %v1667_v17, 0.0  ;;  %v1632_v22 = vmul.f32 %v4793_v43, %v1596_v31 }
 0x5a4   :  { %v3422_v36 = vpop.eup %3421 }
 0x5a5   :  { %3069 = vmatmul.mubr.f32.gmra.mrb[80].mxu1 %v1696_v30  ;;  %v1668_v53 = vadd.f32 %v4801_v12, %v1632_v22  ;;  %v1597_v52 = vmul.f32 %v3422_v36, %v4843_v55 }
 0x5a6   :  { %3071 = vmatprep.mubr.msk.f32.mxu1 %vm3632_vm1, %v5516_v23 }
 0x5a7   :  { %v1697_v6 = vmax.f32 %v1668_v53, 0.0  ;;  %v1633_v46 = vmul.f32 %v4793_v43, %v1597_v52 }
 0x5a9   :  { %3072 = vmatmul.mubr.f32.gmra.mrb[82].mxu1 %v1697_v6  ;;  %v1669_v0 = vadd.f32 %v4801_v12, %v1633_v46 }
 0x5aa   :  { %3074 = vmatprep.mubr.msk.f32.mxu1 %vm3632_vm1, %v5516_v23 }
 0x5ab   :  { %v1698_v19 = vmax.f32 %v1669_v0, 0.0 }
 0x5ad   :  { %3075 = vmatmul.mubr.f32.gmra.mrb[84].mxu1 %v1698_v19 }
 0x5ca   :  { %v1788_v55 = vpop.f32.mrb[28].mxu1 }
 0x5cb   :  { %v1789_v7 = vadd.f32 %v4973_v14, %v1788_v55  ;;  %v2992_v11 = vpop.f32.mrb[29].mxu1 }
 0x5cd   :  { %v4977_v2 = vadd.f32 %v1789_v7, %v4427_v59 }
 0x5ce   :  { %v1793_v43 = vpop.f32.mrb[30].mxu1 }
 0x5cf   :  { %v1794_v12 = vadd.f32 %v4973_v14, %v1793_v43  ;;  %v2995_v21 = vpop.f32.mrb[31].mxu1  ;;  %1961 = vadd.xlane.f32.xlu0 %v4977_v2 }
 0x5d1   :  { %v4982_v13 = vadd.f32 %v1794_v12, %v4437_v24  ;;  %v5534_v12 = vld [vmem:[#allocation22_spill] sm:$0xff] }
 0x5d2   :  { %v1798_v45 = vpop.f32.mrb[32].mxu1 }
 0x5d3   :  { %v1799_v44 = vadd.f32 %v4973_v14, %v1798_v45  ;;  %v2998_v15 = vpop.f32.mrb[33].mxu1  ;;  %1963 = vadd.xlane.f32.xlu1 %v4982_v13 }
 0x5d4   :  { %v5535_v15 = vld [vmem:[#allocation21_spill] sm:$0xff] }
 0x5d5   :  { %v4987_v4 = vadd.f32 %v1799_v44, %v4447_v18 }
 0x5d6   :  { %v1803_v59 = vpop.f32.mrb[34].mxu1 }
 0x5d7   :  { %v1804_v1 = vadd.f32 %v4973_v14, %v1803_v59  ;;  %v3001_v35 = vpop.f32.mrb[35].mxu1  ;;  %1965 = vadd.xlane.f32.xlu0 %v4987_v4 }
 0x5d9   :  { %v4992_v26 = vadd.f32 %v1804_v1, %v4457_v16 }
 0x5da   :  { %v1808_v24 = vpop.f32.mrb[36].mxu1 }
 0x5db   :  { %v1809_v34 = vadd.f32 %v4973_v14, %v1808_v24  ;;  %v3004_v48 = vpop.f32.mrb[37].mxu1  ;;  %1967 = vadd.xlane.f32.xlu1 %v4992_v26  ;;  %v5536_v24 = vld [vmem:[#allocation23_spill] sm:$0xff] }
 0x5dd   :  { %v4997_v9 = vadd.f32 %v1809_v34, %v4467_v8 }
 0x5de   :  { %v1813_v18 = vpop.f32.mrb[38].mxu1 }
 0x5df   :  { %v1814_v51 = vadd.f32 %v4973_v14, %v1813_v18  ;;  %v3007_v63 = vpop.f32.mrb[39].mxu1  ;;  %1969 = vadd.xlane.f32.xlu0 %v4997_v9 }
 0x5e0   :  { %v5537_v63 = vld [vmem:[#allocation16_spill] sm:$0xff] }
 0x5e1   :  { %v5002_v40 = vadd.f32 %v1814_v51, %v4477_v5 }
 0x5e2   :  { %v1818_v16 = vpop.f32.mrb[40].mxu1 }
 0x5e3   :  { %v1819_v61 = vadd.f32 %v4973_v14, %v1818_v16  ;;  %v3010_v42 = vpop.f32.mrb[41].mxu1  ;;  %1971 = vadd.xlane.f32.xlu1 %v5002_v40 }
 0x5e5   :  { %v5007_v25 = vadd.f32 %v1819_v61, %v4487_v56 }
 0x5e6   :  { %v1823_v8 = vpop.f32.mrb[42].mxu1 }
 0x5e7   :  { %v1824_v3 = vadd.f32 %v4973_v14, %v1823_v8  ;;  %v3013_v39 = vpop.f32.mrb[43].mxu1  ;;  %1973 = vadd.xlane.f32.xlu0 %v5007_v25 }
 0x5e9   :  { %v5012_v47 = vadd.f32 %v1824_v3, %v4497_v62  ;;  %v5538_v3 = vld [vmem:[#allocation24_spill] sm:$0xff] }
 0x5ea   :  { %v1828_v5 = vpop.f32.mrb[44].mxu1 }
 0x5eb   :  { %v1829_v28 = vadd.f32 %v4973_v14, %v1828_v5  ;;  %v3016_v27 = vpop.f32.mrb[45].mxu1  ;;  %1975 = vadd.xlane.f32.xlu1 %v5012_v47 }
 0x5ed   :  { %v5017_v32 = vadd.f32 %v1829_v28, %v4514_v41 }
 0x5ee   :  { %v1833_v56 = vpop.f32.mrb[46].mxu1 }
 0x5ef   :  { %v1834_v37 = vadd.f32 %v4973_v14, %v1833_v56  ;;  %1977 = vadd.xlane.f32.xlu0 %v5017_v32  ;;  %v3019_v57 = vpop.f32.mrb[47].mxu1 }
 0x5f0   :  { %v5539_v57 = vld [vmem:[#allocation17_spill] sm:$0xff] }
 0x5f1   :  { %v5022_v17 = vadd.f32 %v1834_v37, %v4519_v29 }
 0x5f3   :  { %1979 = vadd.xlane.f32.xlu1 %v5022_v17 }
 0x605   :  { %v1838_v62 = vpop.f32.mrb[48].mxu1 }
 0x606   :  { %v1839_v31 = vadd.f32 %v4973_v14, %v1838_v62  ;;  %v3022_v30 = vpop.f32.mrb[49].mxu1 }
 0x608   :  { %v5027_v22 = vadd.f32 %v1839_v31, %v4524_v60 }
 0x60a   :  { %1981 = vadd.xlane.f32.xlu0 %v5027_v22 }
 0x60b   :  { %v1843_v41 = vpop.f32.mrb[50].mxu1 }
 0x60c   :  { %v1844_v36 = vadd.f32 %v4973_v14, %v1843_v41  ;;  %v3025_v53 = vpop.f32.mrb[51].mxu1 }
 0x60e   :  { %v5032_v52 = vadd.f32 %v1844_v36, %v4529_v54 }
 0x60f   :  { %v1848_v29 = vpop.f32.mrb[52].mxu1 }
 0x610   :  { %v1849_v6 = vadd.f32 %v4973_v14, %v1848_v29  ;;  %1983 = vadd.xlane.f32.xlu1 %v5032_v52  ;;  %v3028_v46 = vpop.f32.mrb[53].mxu1 }
 0x612   :  { %v5037_v0 = vadd.f32 %v1849_v6, %v4534_v20 }
 0x613   :  { %v1853_v60 = vpop.f32.mrb[54].mxu1 }
 0x614   :  { %v1854_v19 = vadd.f32 %v4973_v14, %v1853_v60  ;;  %1985 = vadd.xlane.f32.xlu0 %v5037_v0  ;;  %v3031_v55 = vpop.f32.mrb[55].mxu1  ;;  %v5540_v60 = vld [vmem:[#allocation25_spill] sm:$0xff] }
 0x616   :  { %v5042_v7 = vadd.f32 %v1854_v19, %v4539_v10 }
 0x617   :  { %v1858_v54 = vpop.f32.mrb[56].mxu1 }
 0x618   :  { %v1859_v11 = vadd.f32 %v4973_v14, %v1858_v54  ;;  %1987 = vadd.xlane.f32.xlu1 %v5042_v7  ;;  %v3034_v43 = vpop.f32.mrb[57].mxu1 }
 0x61a   :  { %v5047_v21 = vadd.f32 %v1859_v11, %v5534_v12 }
 0x61b   :  { %v1863_v20 = vpop.f32.mrb[58].mxu1 }
 0x61c   :  { %v1864_v45 = vadd.f32 %v4973_v14, %v1863_v20  ;;  %1989 = vadd.xlane.f32.xlu0 %v5047_v21  ;;  %v3037_v44 = vpop.f32.mrb[59].mxu1 }
 0x61e   :  { %v5052_v59 = vadd.f32 %v1864_v45, %v5535_v15  ;;  %v5541_v45 = vld [vmem:[#allocation26_spill] sm:$0xff] }
 0x61f   :  { %v1868_v10 = vpop.f32.mrb[60].mxu1 }
 0x620   :  { %v1869_v1 = vadd.f32 %v4973_v14, %v1868_v10  ;;  %1991 = vadd.xlane.f32.xlu1 %v5052_v59  ;;  %v3040_v35 = vpop.f32.mrb[61].mxu1 }
 0x622   :  { %v5057_v34 = vadd.f32 %v1869_v1, %v5536_v24 }
 0x623   :  { %v1873_v48 = vpop.f32.mrb[62].mxu1 }
 0x624   :  { %v1874_v18 = vadd.f32 %v4973_v14, %v1873_v48  ;;  %1993 = vadd.xlane.f32.xlu0 %v5057_v34  ;;  %v3043_v51 = vpop.f32.mrb[63].mxu1 }
 0x625   :  { %v2410_v51 = vld [vmem:[#allocation10] sm:$0xff] }
 0x626   :  { %v5062_v16 = vadd.f32 %v1874_v18, %v5537_v63  ;;  %v2411_v63 = vld [vmem:[#allocation10 + $0x8] sm:$0xff] }
 0x628   :  { %1995 = vadd.xlane.f32.xlu1 %v5062_v16 }
 0x658   :  { %v1878_v61 = vpop.f32.mrb[64].mxu1 }
 0x659   :  { %v1879_v42 = vadd.f32 %v4973_v14, %v1878_v61  ;;  %v3046_v8 = vpop.f32.mrb[65].mxu1  ;;  %v3245_v61 = vpack.c.bf16 %v2411_v63, %v2410_v51 }
 0x65b   :  { %v5067_v39 = vadd.f32 %v1879_v42, %v5538_v3  ;;  %3246 = vmatpush3.bf16.msra.mxu0 %v3245_v61 }
 0x65c   :  { %v1883_v5 = vpop.f32.mrb[66].mxu1  ;;  %v1962_v28 = vpop.xlane.xlu0 %1961 }
 0x65d   :  { %v1884_v27 = vadd.f32 %v4973_v14, %v1883_v5  ;;  %v2019_v56 = vmul.f32 0.125, %v1962_v28  ;;  %1997 = vadd.xlane.f32.xlu0 %v5067_v39  ;;  %v3049_v37 = vpop.f32.mrb[67].mxu1 }
 0x65f   :  { %v5072_v62 = vadd.f32 %v1884_v27, %v5539_v57  ;;  %v5075_v31 = vsub.f32 %v4977_v2, %v2019_v56 }
 0x660   :  { %v1964_v30 = vpop.xlane.xlu1 %1963  ;;  %v1888_v41 = vpop.f32.mrb[68].mxu1 }
 0x661   :  { %v2020_v36 = vmul.f32 0.125, %v1964_v30  ;;  %v1889_v53 = vadd.f32 %v4973_v14, %v1888_v41  ;;  %1999 = vadd.xlane.f32.xlu1 %v5072_v62  ;;  %v3052_v29 = vpop.f32.mrb[69].mxu1  ;;  %v2077_v6 = vmul.f32 %v4021_v58, %v5075_v31  ;;  %v2412_v30 = vld [vmem:[#allocation10 + $0x10] sm:$0xff]  ;;  %v5543_v41 = vmov 0.0|0.0  }
 0x662   :  { %3247 = vmatprep.subr.bf16.mxu0 %v5543_v41 }
 0x663   :  { %v5082_v46 = vsub.f32 %v4982_v13, %v2020_v36  ;;  %v5085_v19 = vadd.f32 %v1889_v53, %v5540_v60  ;;  %v2106_v55 = vmul.f32 %v2077_v6, %v2077_v6  ;;  %v5544_v53 = vld [vmem:[#allocation28_spill] sm:$0xff] }
 0x664   :  { %v1893_v2 = vpop.f32.mrb[70].mxu1  ;;  %v1966_v54 = vpop.xlane.xlu0 %1965 }
 0x665   :  { %v1894_v11 = vadd.f32 %v4973_v14, %v1893_v2  ;;  %v2021_v43 = vmul.f32 0.125, %v1966_v54  ;;  %2001 = vadd.xlane.f32.xlu0 %v5085_v19  ;;  %v3055_v12 = vpop.f32.mrb[71].mxu1  ;;  %2135 = vadd.xlane.f32.xlu1 %v2106_v55  ;;  %v2078_v20 = vmul.f32 %v4021_v58, %v5082_v46 }
 0x667   :  { %v5092_v44 = vadd.f32 %v1894_v11, %v5541_v45  ;;  %v5095_v13 = vsub.f32 %v4987_v4, %v2021_v43  ;;  %v2107_v15 = vmul.f32 %v2078_v20, %v2078_v20  ;;  %v5542_v4 = vld [vmem:[#allocation27_spill] sm:$0xff]  ;;  %v2415_v45 = vld [vmem:[#allocation10 + $0x28] sm:$0xff] }
 0x668   :  { %v1968_v10 = vpop.xlane.xlu1 %1967  ;;  %v1898_v1 = vpop.f32.mrb[72].mxu1  ;;  %v2414_v20 = vld [vmem:[#allocation10 + $0x20] sm:$0xff] }
 0x669   :  { %v2022_v35 = vmul.f32 0.125, %v1968_v10  ;;  %v1899_v24 = vadd.f32 %v4973_v14, %v1898_v1  ;;  %2003 = vadd.xlane.f32.xlu0 %v5092_v44  ;;  %v3058_v48 = vpop.f32.mrb[73].mxu1  ;;  %2137 = vadd.xlane.f32.xlu1 %v2107_v15  ;;  %v2079_v18 = vmul.f32 %v4021_v58, %v5095_v13  ;;  %v5545_v10 = vld [vmem:[#allocation29_spill] sm:$0xff] }
 0x66b   :  { %v5102_v42 = vsub.f32 %v4992_v26, %v2022_v35  ;;  %v5105_v8 = vadd.f32 %v1899_v24, %v5542_v4  ;;  %v2108_v3 = vmul.f32 %v2079_v18, %v2079_v18  ;;  %v2413_v26 = vld [vmem:[#allocation10 + $0x18] sm:$0xff]  ;;  %v2416_v4 = vld [vmem:[#allocation10 + $0x30] sm:$0xff] }
 0x66c   :  { %v1903_v5 = vpop.f32.mrb[74].mxu1  ;;  %v1970_v28 = vpop.xlane.xlu0 %1969  ;;  %v3248_v36 = vpack.c.bf16 %v2413_v26, %v2412_v30 }
 0x66d   :  { %v1904_v27 = vadd.f32 %v4973_v14, %v1903_v5  ;;  %v2023_v56 = vmul.f32 0.125, %v1970_v28  ;;  %2005 = vadd.xlane.f32.xlu0 %v5105_v8  ;;  %v3061_v37 = vpop.f32.mrb[75].mxu1  ;;  %2139 = vadd.xlane.f32.xlu1 %v2108_v3  ;;  %v2080_v57 = vmul.f32 %v4021_v58, %v5102_v42 }
 0x66e   :  { %3249 = vmatpush3.bf16.msra.mxu0 %v3248_v36 }
 0x66f   :  { %v5113_v29 = vadd.f32 %v1904_v27, %v5544_v53  ;;  %v5116_v6 = vsub.f32 %v4997_v9, %v2023_v56  ;;  %v2109_v60 = vmul.f32 %v2080_v57, %v2080_v57  ;;  %3250 = vmatprep.subr.bf16.mxu0 %v5543_v41  ;;  %v3251_v9 = vpack.c.bf16 %v2415_v45, %v2414_v20  ;;  %v2418_v53 = vld [vmem:[#allocation10 + $0x40] sm:$0xff] }
 0x670   :  { %v1972_v55 = vpop.xlane.xlu1 %1971  ;;  %v1908_v2 = vpop.f32.mrb[76].mxu1 }
 0x671   :  { %v2024_v54 = vmul.f32 0.125, %v1972_v55  ;;  %v1909_v11 = vadd.f32 %v4973_v14, %v1908_v2  ;;  %2007 = vadd.xlane.f32.xlu0 %v5113_v29  ;;  %v3064_v43 = vpop.f32.mrb[77].mxu1  ;;  %2141 = vadd.xlane.f32.xlu1 %v2109_v60  ;;  %v2081_v12 = vmul.f32 %v4021_v58, %v5116_v6 }
 0x672   :  { %3252 = vmatpush3.bf16.msra.mxu0 %v3251_v9  ;;  %v2420_v9 = vld [vmem:[#allocation10 + $0x50] sm:$0xff] }
 0x673   :  { %v5124_v15 = vsub.f32 %v5002_v40, %v2024_v54  ;;  %v5127_v1 = vadd.f32 %v1909_v11, %v5545_v10  ;;  %v2110_v35 = vmul.f32 %v2081_v12, %v2081_v12  ;;  %v2417_v40 = vld [vmem:[#allocation10 + $0x38] sm:$0xff]  ;;  %3253 = vmatprep.subr.bf16.mxu0 %v5543_v41 }
 0x674   :  { %v1913_v24 = vpop.f32.mrb[78].mxu1  ;;  %v1974_v48 = vpop.xlane.xlu0 %1973  ;;  %v3254_v3 = vpack.c.bf16 %v2417_v40, %v2416_v4  ;;  %v2422_v40 = vld [vmem:[#allocation10 + $0x60] sm:$0xff] }
 0x675   :  { %v1914_v18 = vadd.f32 %v4973_v14, %v1913_v24  ;;  %v2025_v51 = vmul.f32 0.125, %v1974_v48  ;;  %2009 = vadd.xlane.f32.xlu0 %v5127_v1  ;;  %v3067_v63 = vpop.f32.mrb[79].mxu1  ;;  %2143 = vadd.xlane.f32.xlu1 %v2110_v35  ;;  %v2082_v61 = vmul.f32 %v4021_v58, %v5124_v15 }
 0x676   :  { %3255 = vmatpush3.bf16.msra.mxu0 %v3254_v3 }
 0x677   :  { %v5135_v5 = vadd.f32 %v1914_v18, %v4662_v50  ;;  %v5138_v28 = vsub.f32 %v5007_v25, %v2025_v51  ;;  %v2111_v27 = vmul.f32 %v2082_v61, %v2082_v61  ;;  %v2419_v50 = vld [vmem:[#allocation10 + $0x48] sm:$0xff]  ;;  %3256 = vmatprep.subr.bf16.mxu0 %v5543_v41 }
 0x678   :  { %v1976_v56 = vpop.xlane.xlu1 %1975  ;;  %v1918_v37 = vpop.f32.mrb[80].mxu1  ;;  %v3257_v25 = vpack.c.bf16 %v2419_v50, %v2418_v53 }
 0x679   :  { %v2026_v57 = vmul.f32 0.125, %v1976_v56  ;;  %v1919_v30 = vadd.f32 %v4973_v14, %v1918_v37  ;;  %2011 = vadd.xlane.f32.xlu0 %v5135_v5  ;;  %v3070_v26 = vpop.f32.mrb[81].mxu1  ;;  %2145 = vadd.xlane.f32.xlu1 %v2111_v27  ;;  %v2083_v36 = vmul.f32 %v4021_v58, %v5138_v28  ;;  %v2424_v37 = vld [vmem:[#allocation10 + $0x70] sm:$0xff] }
 0x67a   :  { %3258 = vmatpush3.bf16.msra.mxu0 %v3257_v25 }
 0x67b   :  { %v5146_v60 = vsub.f32 %v5012_v47, %v2026_v57  ;;  %v5149_v55 = vadd.f32 %v1919_v30, %v4679_v33  ;;  %v2112_v2 = vmul.f32 %v2083_v36, %v2083_v36  ;;  %v2421_v47 = vld [vmem:[#allocation10 + $0x58] sm:$0xff]  ;;  %3259 = vmatprep.subr.bf16.mxu0 %v5543_v41 }
 0x67c   :  { %v1923_v54 = vpop.f32.mrb[82].mxu1  ;;  %v1978_v11 = vpop.xlane.xlu0 %1977  ;;  %v3260_v33 = vpack.c.bf16 %v2421_v47, %v2420_v9  ;;  %v2425_v57 = vld [vmem:[#allocation10 + $0x78] sm:$0xff] }
 0x67d   :  { %v1924_v43 = vadd.f32 %v4973_v14, %v1923_v54  ;;  %v2027_v12 = vmul.f32 0.125, %v1978_v11  ;;  %2013 = vadd.xlane.f32.xlu0 %v5149_v55  ;;  %v3073_v20 = vpop.f32.mrb[83].mxu1  ;;  %2147 = vadd.xlane.f32.xlu1 %v2112_v2  ;;  %v2084_v45 = vmul.f32 %v4021_v58, %v5146_v60  ;;  %v3266_v30 = vpack.c.bf16 %v2425_v57, %v2424_v37 }
 0x67e   :  { %3261 = vmatpush3.bf16.msra.mxu0 %v3260_v33 }
 0x67f   :  { %v5157_v10 = vadd.f32 %v1924_v43, %v4696_v49  ;;  %v5160_v35 = vsub.f32 %v5017_v32, %v2027_v12  ;;  %v2113_v24 = vmul.f32 %v2084_v45, %v2084_v45  ;;  %v2423_v49 = vld [vmem:[#allocation10 + $0x68] sm:$0xff]  ;;  %3262 = vmatprep.subr.bf16.mxu0 %v5543_v41 }
 0x680   :  { %v1980_v48 = vpop.xlane.xlu1 %1979  ;;  %v1928_v18 = vpop.f32.mrb[84].mxu1  ;;  %v3263_v32 = vpack.c.bf16 %v2423_v49, %v2422_v40 }
 0x681   :  { %v2028_v51 = vmul.f32 0.125, %v1980_v48  ;;  %v1929_v63 = vadd.f32 %v4973_v14, %v1928_v18  ;;  %2015 = vadd.xlane.f32.xlu0 %v5157_v10  ;;  %v3076_v61 = vpop.f32.mrb[85].mxu1  ;;  %2149 = vadd.xlane.f32.xlu1 %v2113_v24  ;;  %v2085_v4 = vmul.f32 %v4021_v58, %v5160_v35 }
 0x682   :  { %3264 = vmatpush3.bf16.msra.mxu0 %v3263_v32 }
 0x683   :  { %v5168_v3 = vsub.f32 %v5022_v17, %v2028_v51  ;;  %v5171_v27 = vadd.f32 %v1929_v63, %v4710_v38  ;;  %v2114_v56 = vmul.f32 %v2085_v4, %v2085_v4  ;;  %3265 = vmatprep.subr.bf16.mxu0 %v5543_v41 }
 0x685   :  { %2017 = vadd.xlane.f32.xlu0 %v5171_v27  ;;  %2151 = vadd.xlane.f32.xlu1 %v2114_v56  ;;  %v2086_v14 = vmul.f32 %v4021_v58, %v5168_v3 }
 0x686   :  { %3267 = vmatpush3.bf16.msra.mxu0 %v3266_v30 }
 0x687   :  { %v2115_v26 = vmul.f32 %v2086_v14, %v2086_v14 }
 0x689   :  { %2153 = vadd.xlane.f32.xlu0 %v2115_v26 }
 0x697   :  { %v1982_v17 = vpop.xlane.xlu0 %1981 }
 0x698   :  { %v2029_v36 = vmul.f32 0.125, %v1982_v17 }
 0x69a   :  { %v5178_v38 = vsub.f32 %v5027_v22, %v2029_v36 }
 0x69c   :  { %v2087_v53 = vmul.f32 %v4021_v58, %v5178_v38 }
 0x69d   :  { %v1984_v50 = vpop.xlane.xlu1 %1983 }
 0x69e   :  { %v2030_v25 = vmul.f32 0.125, %v1984_v50  ;;  %v2116_v2 = vmul.f32 %v2087_v53, %v2087_v53 }
 0x6a0   :  { %v5183_v54 = vsub.f32 %v5032_v52, %v2030_v25  ;;  %2155 = vadd.xlane.f32.xlu1 %v2116_v2 }
 0x6a1   :  { %v1986_v41 = vpop.xlane.xlu0 %1985 }
 0x6a2   :  { %v2031_v11 = vmul.f32 0.125, %v1986_v41  ;;  %v2088_v43 = vmul.f32 %v4021_v58, %v5183_v54 }
 0x6a4   :  { %v5188_v12 = vsub.f32 %v5037_v0, %v2031_v11  ;;  %v2117_v22 = vmul.f32 %v2088_v43, %v2088_v43 }
 0x6a5   :  { %v1988_v20 = vpop.xlane.xlu1 %1987 }
 0x6a6   :  { %v2032_v45 = vmul.f32 0.125, %v1988_v20  ;;  %2157 = vadd.xlane.f32.xlu0 %v2117_v22  ;;  %v2089_v9 = vmul.f32 %v4021_v58, %v5188_v12 }
 0x6a8   :  { %v5193_v47 = vsub.f32 %v5042_v7, %v2032_v45  ;;  %v2118_v52 = vmul.f32 %v2089_v9, %v2089_v9 }
 0x6a9   :  { %v1990_v33 = vpop.xlane.xlu0 %1989 }
 0x6aa   :  { %v2033_v24 = vmul.f32 0.125, %v1990_v33  ;;  %2159 = vadd.xlane.f32.xlu1 %v2118_v52  ;;  %v2090_v48 = vmul.f32 %v4021_v58, %v5193_v47 }
 0x6ac   :  { %v5198_v0 = vsub.f32 %v5047_v21, %v2033_v24  ;;  %v2119_v18 = vmul.f32 %v2090_v48, %v2090_v48 }
 0x6ad   :  { %v1992_v51 = vpop.xlane.xlu1 %1991 }
 0x6ae   :  { %v2034_v63 = vmul.f32 0.125, %v1992_v51  ;;  %2161 = vadd.xlane.f32.xlu0 %v2119_v18  ;;  %v2091_v61 = vmul.f32 %v4021_v58, %v5198_v0 }
 0x6b0   :  { %v5203_v7 = vsub.f32 %v5052_v59, %v2034_v63  ;;  %v2120_v4 = vmul.f32 %v2091_v61, %v2091_v61 }
 0x6b1   :  { %v1994_v40 = vpop.xlane.xlu0 %1993 }
 0x6b2   :  { %v2035_v49 = vmul.f32 0.125, %v1994_v40  ;;  %2163 = vadd.xlane.f32.xlu1 %v2120_v4  ;;  %v2092_v32 = vmul.f32 %v4021_v58, %v5203_v7 }
 0x6b4   :  { %v5208_v21 = vsub.f32 %v5057_v34, %v2035_v49  ;;  %v2121_v56 = vmul.f32 %v2092_v32, %v2092_v32 }
 0x6b5   :  { %v1996_v14 = vpop.xlane.xlu1 %1995 }
 0x6b6   :  { %v2036_v37 = vmul.f32 0.125, %v1996_v14  ;;  %2165 = vadd.xlane.f32.xlu0 %v2121_v56  ;;  %v2093_v57 = vmul.f32 %v4021_v58, %v5208_v21 }
 0x6b8   :  { %v5213_v59 = vsub.f32 %v5062_v16, %v2036_v37  ;;  %v2122_v30 = vmul.f32 %v2093_v57, %v2093_v57 }
 0x6ba   :  { %2167 = vadd.xlane.f32.xlu1 %v2122_v30  ;;  %v2094_v26 = vmul.f32 %v4021_v58, %v5213_v59 }
 0x6bc   :  { %v2123_v17 = vmul.f32 %v2094_v26, %v2094_v26 }
 0x6be   :  { %2169 = vadd.xlane.f32.xlu0 %v2123_v17 }
 0x6ea   :  { %v1998_v36 = vpop.xlane.xlu0 %1997 }
 0x6eb   :  { %v2037_v34 = vmul.f32 0.125, %v1998_v36 }
 0x6ed   :  { %v5218_v53 = vsub.f32 %v5067_v39, %v2037_v34 }
 0x6ee   :  { %v2000_v50 = vpop.xlane.xlu1 %1999 }
 0x6ef   :  { %v2038_v25 = vmul.f32 0.125, %v2000_v50  ;;  %v2095_v2 = vmul.f32 %v4021_v58, %v5218_v53 }
 0x6f1   :  { %v5223_v16 = vsub.f32 %v5072_v62, %v2038_v25  ;;  %v2124_v41 = vmul.f32 %v2095_v2, %v2095_v2 }
 0x6f2   :  { %v2136_v11 = vpop.xlane.xlu1 %2135  ;;  %v2002_v43 = vpop.xlane.xlu0 %2001 }
 0x6f3   :  { %v2193_v22 = vmul.f32 0.125, %v2136_v11  ;;  %v2039_v20 = vmul.f32 0.125, %v2002_v43  ;;  %2171 = vadd.xlane.f32.xlu1 %v2124_v41  ;;  %v2096_v45 = vmul.f32 %v4021_v58, %v5223_v16 }
 0x6f5   :  { %v2222_v9 = vadd.f32 1e-05, %v2193_v22  ;;  %v5228_v39 = vsub.f32 %v5085_v19, %v2039_v20  ;;  %v2125_v52 = vmul.f32 %v2096_v45, %v2096_v45 }
 0x6f6   :  { %v2138_v33 = vpop.xlane.xlu1 %2137  ;;  %v2004_v24 = vpop.xlane.xlu0 %2003 }
 0x6f7   :  { %3423 = vrsqrt.f32 %v2222_v9  ;;  %v2194_v48 = vmul.f32 0.125, %v2138_v33  ;;  %v2040_v62 = vmul.f32 0.125, %v2004_v24  ;;  %2173 = vadd.xlane.f32.xlu0 %v2125_v52  ;;  %v2097_v18 = vmul.f32 %v4021_v58, %v5228_v39 }
 0x6f9   :  { %v2223_v51 = vadd.f32 1e-05, %v2194_v48  ;;  %v5233_v63 = vsub.f32 %v5092_v44, %v2040_v62  ;;  %v2126_v61 = vmul.f32 %v2097_v18, %v2097_v18 }
 0x6fa   :  { %v2140_v4 = vpop.xlane.xlu1 %2139  ;;  %v2006_v40 = vpop.xlane.xlu0 %2005 }
 0x6fb   :  { %3425 = vrsqrt.f32 %v2223_v51  ;;  %v2195_v19 = vmul.f32 0.125, %v2140_v4  ;;  %v2041_v49 = vmul.f32 0.125, %v2006_v40  ;;  %2175 = vadd.xlane.f32.xlu1 %v2126_v61  ;;  %v2098_v32 = vmul.f32 %v4021_v58, %v5233_v63 }
 0x6fd   :  { %v2224_v56 = vadd.f32 1e-05, %v2195_v19  ;;  %v5238_v14 = vsub.f32 %v5105_v8, %v2041_v49  ;;  %v2127_v37 = vmul.f32 %v2098_v32, %v2098_v32  ;;  %v5248_v8 = vld [vmem:[%s5485_s11] ss:$0 sm:$0xff] }
 0x6fe   :  { %v2142_v57 = vpop.xlane.xlu1 %2141  ;;  %v2008_v30 = vpop.xlane.xlu0 %2007 }
 0x6ff   :  { %3427 = vrsqrt.f32 %v2224_v56  ;;  %v2196_v44 = vmul.f32 0.125, %v2142_v57  ;;  %v2042_v26 = vmul.f32 0.125, %v2008_v30  ;;  %2177 = vadd.xlane.f32.xlu0 %v2127_v37  ;;  %v2099_v17 = vmul.f32 %v4021_v58, %v5238_v14 }
 0x701   :  { %v3424_v36 = vpop.eup %3423  ;;  %v2225_v34 = vadd.f32 1e-05, %v2196_v44  ;;  %v5243_v50 = vsub.f32 %v5113_v29, %v2042_v26  ;;  %v2128_v25 = vmul.f32 %v2099_v17, %v2099_v17  ;;  %v5256_v29 = vld [vmem:[%s5486_s12] ss:$0 sm:$0xff] }
 0x702   :  { %v2280_v2 = vmul.f32 %v3424_v36, %v5075_v31  ;;  %v2144_v41 = vpop.xlane.xlu1 %2143  ;;  %v2010_v11 = vpop.xlane.xlu0 %2009 }
 0x703   :  { %3429 = vrsqrt.f32 %v2225_v34  ;;  %v2197_v43 = vmul.f32 0.125, %v2144_v41  ;;  %v2043_v22 = vmul.f32 0.125, %v2010_v11  ;;  %2179 = vadd.xlane.f32.xlu1 %v2128_v25  ;;  %v2100_v20 = vmul.f32 %v4021_v58, %v5243_v50 }
 0x704   :  { %v2316_v45 = vmul.f32 %v5248_v8, %v2280_v2 }
 0x705   :  { %v3426_v9 = vpop.eup %3425  ;;  %v2226_v52 = vadd.f32 1e-05, %v2197_v43  ;;  %v5260_v31 = vsub.f32 %v5127_v1, %v2043_v22  ;;  %v2129_v33 = vmul.f32 %v2100_v20, %v2100_v20 }
 0x706   :  { %v2146_v24 = vpop.xlane.xlu1 %2145  ;;  %v2012_v48 = vpop.xlane.xlu0 %2011  ;;  %v2352_v62 = vadd.f32 %v5256_v29, %v2316_v45  ;;  %v2281_v18 = vmul.f32 %v3426_v9, %v5082_v46 }
 0x707   :  { %3431 = vrsqrt.f32 %v2226_v52  ;;  %v2198_v51 = vmul.f32 0.125, %v2146_v24  ;;  %v2044_v61 = vmul.f32 0.125, %v2012_v48  ;;  %2181 = vadd.xlane.f32.xlu0 %v2129_v33  ;;  %v2101_v4 = vmul.f32 %v4021_v58, %v5260_v31 }
 0x708   :  { %v2381_v40 = vmax.f32 %v2352_v62, 0.0  ;;  %v2317_v19 = vmul.f32 %v5248_v8, %v2281_v18 }
 0x709   :  { %v3428_v49 = vpop.eup %3427  ;;  %v2227_v1 = vadd.f32 1e-05, %v2198_v51  ;;  %v5268_v32 = vsub.f32 %v5135_v5, %v2044_v61  ;;  %v2130_v56 = vmul.f32 %v2101_v4, %v2101_v4 }
 0x70a   :  { %3110 = vmatmul.mubr.f32.vlgmr.msra.gmra.mrb[30].mxu0 %v2381_v40  ;;  %v2148_v37 = vpop.xlane.xlu1 %2147  ;;  %v2014_v57 = vpop.xlane.xlu0 %2013  ;;  %v2353_v46 = vadd.f32 %v5256_v29, %v2317_v19  ;;  %v2282_v30 = vmul.f32 %v3428_v49, %v5095_v13 }
 0x70b   :  { %3433 = vrsqrt.f32 %v2227_v1  ;;  %v2199_v44 = vmul.f32 0.125, %v2148_v37  ;;  %v2045_v26 = vmul.f32 0.125, %v2014_v57  ;;  %2183 = vadd.xlane.f32.xlu1 %v2130_v56  ;;  %3112 = vmatprep.mubr.msk.f32.mxu0 %vm3632_vm1, %v5516_v23  ;;  %v2102_v17 = vmul.f32 %v4021_v58, %v5268_v32 }
 0x70c   :  { %v2382_v5 = vmax.f32 %v2353_v46, 0.0  ;;  %v2318_v36 = vmul.f32 %v5248_v8, %v2282_v30 }
 0x70d   :  { %v3430_v34 = vpop.eup %3429  ;;  %v2228_v25 = vadd.f32 1e-05, %v2199_v44  ;;  %v5278_v2 = vsub.f32 %v5149_v55, %v2045_v26  ;;  %v2131_v41 = vmul.f32 %v2102_v17, %v2102_v17 }
 0x70e   :  { %3113 = vmatmul.mubr.f32.gmra.mrb[32].mxu0 %v2382_v5  ;;  %v2150_v13 = vpop.xlane.xlu1 %2149  ;;  %v2016_v11 = vpop.xlane.xlu0 %2015  ;;  %v2354_v43 = vadd.f32 %v5256_v29, %v2318_v36  ;;  %v2283_v22 = vmul.f32 %v3430_v34, %v5102_v42 }
 0x70f   :  { %3435 = vrsqrt.f32 %v2228_v25  ;;  %v2200_v20 = vmul.f32 0.125, %v2150_v13  ;;  %v2046_v45 = vmul.f32 0.125, %v2016_v11  ;;  %2185 = vadd.xlane.f32.xlu0 %v2131_v41  ;;  %3115 = vmatprep.mubr.msk.f32.mxu0 %vm3632_vm1, %v5516_v23  ;;  %v2103_v9 = vmul.f32 %v4021_v58, %v5278_v2 }
 0x710   :  { %v2383_v55 = vmax.f32 %v2354_v43, 0.0  ;;  %v2319_v52 = vmul.f32 %v5248_v8, %v2283_v22 }
 0x711   :  { %v3432_v33 = vpop.eup %3431  ;;  %v2229_v24 = vadd.f32 1e-05, %v2200_v20  ;;  %v5288_v48 = vsub.f32 %v5157_v10, %v2046_v45  ;;  %v2132_v62 = vmul.f32 %v2103_v9, %v2103_v9 }
 0x712   :  { %3116 = vmatmul.mubr.f32.gmra.mrb[34].mxu0 %v2383_v55  ;;  %v2152_v42 = vpop.xlane.xlu1 %2151  ;;  %v2018_v18 = vpop.xlane.xlu0 %2017  ;;  %v2355_v51 = vadd.f32 %v5256_v29, %v2319_v52  ;;  %v2284_v61 = vmul.f32 %v3432_v33, %v5116_v6 }
 0x713   :  { %3437 = vrsqrt.f32 %v2229_v24  ;;  %v2201_v4 = vmul.f32 0.125, %v2152_v42  ;;  %v2047_v40 = vmul.f32 0.125, %v2018_v18  ;;  %2187 = vadd.xlane.f32.xlu1 %v2132_v62  ;;  %3118 = vmatprep.mubr.msk.f32.mxu0 %vm3632_vm1, %v5516_v23  ;;  %v2104_v19 = vmul.f32 %v4021_v58, %v5288_v48 }
 0x714   :  { %v2384_v10 = vmax.f32 %v2355_v51, 0.0  ;;  %v2320_v49 = vmul.f32 %v5248_v8, %v2284_v61 }
 0x715   :  { %v3434_v1 = vpop.eup %3433  ;;  %v2230_v56 = vadd.f32 1e-05, %v2201_v4  ;;  %v5298_v37 = vsub.f32 %v5171_v27, %v2047_v40  ;;  %v2133_v57 = vmul.f32 %v2104_v19, %v2104_v19 }
 0x716   :  { %3119 = vmatmul.mubr.f32.gmra.mrb[36].mxu0 %v2384_v10  ;;  %v2154_v6 = vpop.xlane.xlu0 %2153  ;;  %v2356_v46 = vadd.f32 %v5256_v29, %v2320_v49  ;;  %v2285_v30 = vmul.f32 %v3434_v1, %v5124_v15 }
 0x717   :  { %3439 = vrsqrt.f32 %v2230_v56  ;;  %v2202_v44 = vmul.f32 0.125, %v2154_v6  ;;  %2189 = vadd.xlane.f32.xlu0 %v2133_v57  ;;  %3121 = vmatprep.mubr.msk.f32.mxu0 %vm3632_vm1, %v5516_v23  ;;  %v2105_v26 = vmul.f32 %v4021_v58, %v5298_v37 }
 0x718   :  { %v2385_v17 = vmax.f32 %v2356_v46, 0.0  ;;  %v2321_v27 = vmul.f32 %v5248_v8, %v2285_v30 }
 0x719   :  { %v3436_v5 = vpop.eup %3435  ;;  %v2231_v36 = vadd.f32 1e-05, %v2202_v44  ;;  %v2134_v34 = vmul.f32 %v2105_v26, %v2105_v26 }
 0x71a   :  { %3122 = vmatmul.mubr.f32.gmra.mrb[38].mxu0 %v2385_v17  ;;  %v2357_v25 = vadd.f32 %v5256_v29, %v2321_v27  ;;  %v2286_v15 = vmul.f32 %v3436_v5, %v5138_v28 }
 0x71b   :  { %3441 = vrsqrt.f32 %v2231_v36  ;;  %2191 = vadd.xlane.f32.xlu1 %v2134_v34  ;;  %3124 = vmatprep.mubr.msk.f32.mxu0 %vm3632_vm1, %v5516_v23 }
 0x71c   :  { %v2386_v41 = vmax.f32 %v2357_v25, 0.0  ;;  %v2322_v13 = vmul.f32 %v5248_v8, %v2286_v15 }
 0x71d   :  { %v3438_v58 = vpop.eup %3437 }
 0x71e   :  { %3125 = vmatmul.mubr.f32.gmra.mrb[40].mxu0 %v2386_v41  ;;  %v2358_v11 = vadd.f32 %v5256_v29, %v2322_v13  ;;  %v2287_v43 = vmul.f32 %v3438_v58, %v5146_v60 }
 0x71f   :  { %3127 = vmatprep.mubr.msk.f32.mxu0 %vm3632_vm1, %v5516_v23 }
 0x720   :  { %v2387_v22 = vmax.f32 %v2358_v11, 0.0  ;;  %v2323_v28 = vmul.f32 %v5248_v8, %v2287_v43 }
 0x721   :  { %v3440_v20 = vpop.eup %3439 }
 0x722   :  { %3128 = vmatmul.mubr.f32.gmra.mrb[42].mxu0 %v2387_v22  ;;  %v2359_v45 = vadd.f32 %v5256_v29, %v2323_v28  ;;  %v2288_v9 = vmul.f32 %v3440_v20, %v5160_v35 }
 0x723   :  { %3130 = vmatprep.mubr.msk.f32.mxu0 %vm3632_vm1, %v5516_v23 }
 0x724   :  { %v2388_v55 = vmax.f32 %v2359_v45, 0.0  ;;  %v2324_v52 = vmul.f32 %v5248_v8, %v2288_v9 }
 0x725   :  { %v3442_v33 = vpop.eup %3441 }
 0x726   :  { %3131 = vmatmul.mubr.f32.gmra.mrb[44].mxu0 %v2388_v55  ;;  %v2360_v60 = vadd.f32 %v5256_v29, %v2324_v52  ;;  %v2289_v24 = vmul.f32 %v3442_v33, %v5168_v3 }
 0x727   :  { %3133 = vmatprep.mubr.msk.f32.mxu0 %vm3632_vm1, %v5516_v23 }
 0x728   :  { %v2389_v62 = vmax.f32 %v2360_v60, 0.0  ;;  %v2325_v42 = vmul.f32 %v5248_v8, %v2289_v24 }
 0x72a   :  { %3134 = vmatmul.mubr.f32.gmra.mrb[46].mxu0 %v2389_v62  ;;  %v2361_v35 = vadd.f32 %v5256_v29, %v2325_v42 }
 0x72b   :  { %3136 = vmatprep.mubr.msk.f32.mxu0 %vm3632_vm1, %v5516_v23 }
 0x72c   :  { %v2390_v18 = vmax.f32 %v2361_v35, 0.0 }
 0x72d   :  { %v2156_v51 = vpop.xlane.xlu1 %2155 }
 0x72e   :  { %v2203_v61 = vmul.f32 0.125, %v2156_v51  ;;  %3137 = vmatmul.mubr.f32.gmra.mrb[48].mxu0 %v2390_v18 }
 0x72f   :  { %3139 = vmatprep.mubr.msk.f32.mxu0 %vm3632_vm1, %v5516_v23 }
 0x730   :  { %v2232_v3 = vadd.f32 1e-05, %v2203_v61 }
 0x732   :  { %3443 = vrsqrt.f32 %v2232_v3 }
 0x733   :  { %v2158_v4 = vpop.xlane.xlu0 %2157 }
 0x734   :  { %v2204_v40 = vmul.f32 0.125, %v2158_v4 }
 0x736   :  { %v2233_v19 = vadd.f32 1e-05, %v2204_v40 }
 0x737   :  { %v2160_v10 = vpop.xlane.xlu1 %2159 }
 0x738   :  { %3445 = vrsqrt.f32 %v2233_v19  ;;  %v2205_v49 = vmul.f32 0.125, %v2160_v10 }
 0x73a   :  { %v2234_v1 = vadd.f32 1e-05, %v2205_v49 }
 0x73b   :  { %v2162_v56 = vpop.xlane.xlu0 %2161 }
 0x73c   :  { %v3444_v57 = vpop.eup %3443  ;;  %3447 = vrsqrt.f32 %v2234_v1  ;;  %v2206_v6 = vmul.f32 0.125, %v2162_v56 }
 0x73d   :  { %v2290_v46 = vmul.f32 %v3444_v57, %v5178_v38 }
 0x73e   :  { %v2235_v30 = vadd.f32 1e-05, %v2206_v6 }
 0x73f   :  { %v2164_v44 = vpop.xlane.xlu1 %2163  ;;  %v2326_v26 = vmul.f32 %v5248_v8, %v2290_v46 }
 0x740   :  { %3449 = vrsqrt.f32 %v2235_v30  ;;  %v2207_v17 = vmul.f32 0.125, %v2164_v44 }
 0x741   :  { %v2362_v27 = vadd.f32 %v5256_v29, %v2326_v26 }
 0x742   :  { %v3446_v5 = vpop.eup %3445  ;;  %v2236_v36 = vadd.f32 1e-05, %v2207_v17 }
 0x743   :  { %v2166_v34 = vpop.xlane.xlu0 %2165  ;;  %v2391_v25 = vmax.f32 %v2362_v27, 0.0  ;;  %v2291_v15 = vmul.f32 %v3446_v5, %v5183_v54 }
 0x744   :  { %3451 = vrsqrt.f32 %v2236_v36  ;;  %v2208_v41 = vmul.f32 0.125, %v2166_v34 }
 0x745   :  { %3140 = vmatmul.mubr.f32.gmra.mrb[50].mxu0 %v2391_v25  ;;  %v2327_v13 = vmul.f32 %v5248_v8, %v2291_v15 }
 0x746   :  { %v3448_v38 = vpop.eup %3447  ;;  %v2237_v58 = vadd.f32 1e-05, %v2208_v41  ;;  %3142 = vmatprep.mubr.msk.f32.mxu0 %vm3632_vm1, %v5516_v23 }
 0x747   :  { %v2168_v11 = vpop.xlane.xlu1 %2167  ;;  %v2363_v43 = vadd.f32 %v5256_v29, %v2327_v13  ;;  %v2292_v22 = vmul.f32 %v3448_v38, %v5188_v12 }
 0x748   :  { %3453 = vrsqrt.f32 %v2237_v58  ;;  %v2209_v28 = vmul.f32 0.125, %v2168_v11 }
 0x749   :  { %v2392_v20 = vmax.f32 %v2363_v43, 0.0  ;;  %v2328_v54 = vmul.f32 %v5248_v8, %v2292_v22 }
 0x74a   :  { %v3450_v45 = vpop.eup %3449  ;;  %v2238_v9 = vadd.f32 1e-05, %v2209_v28 }
 0x74b   :  { %3143 = vmatmul.mubr.f32.gmra.mrb[52].mxu0 %v2392_v20  ;;  %v2170_v55 = vpop.xlane.xlu0 %2169  ;;  %v2364_v52 = vadd.f32 %v5256_v29, %v2328_v54  ;;  %v2293_v33 = vmul.f32 %v3450_v45, %v5193_v47 }
 0x74c   :  { %3455 = vrsqrt.f32 %v2238_v9  ;;  %v2210_v60 = vmul.f32 0.125, %v2170_v55  ;;  %3145 = vmatprep.mubr.msk.f32.mxu0 %vm3632_vm1, %v5516_v23 }
 0x74d   :  { %v2393_v24 = vmax.f32 %v2364_v52, 0.0  ;;  %v2329_v12 = vmul.f32 %v5248_v8, %v2293_v33 }
 0x74e   :  { %v3452_v62 = vpop.eup %3451  ;;  %v2239_v42 = vadd.f32 1e-05, %v2210_v60 }
 0x74f   :  { %3146 = vmatmul.mubr.f32.gmra.mrb[54].mxu0 %v2393_v24  ;;  %v2365_v35 = vadd.f32 %v5256_v29, %v2329_v12  ;;  %v2294_v18 = vmul.f32 %v3452_v62, %v5198_v0 }
 0x750   :  { %3457 = vrsqrt.f32 %v2239_v42  ;;  %3148 = vmatprep.mubr.msk.f32.mxu0 %vm3632_vm1, %v5516_v23 }
 0x751   :  { %v2394_v47 = vmax.f32 %v2365_v35, 0.0  ;;  %v2330_v51 = vmul.f32 %v5248_v8, %v2294_v18 }
 0x752   :  { %v3454_v61 = vpop.eup %3453 }
 0x753   :  { %3149 = vmatmul.mubr.f32.gmra.mrb[56].mxu0 %v2394_v47  ;;  %v2366_v3 = vadd.f32 %v5256_v29, %v2330_v51  ;;  %v2295_v4 = vmul.f32 %v3454_v61, %v5203_v7 }
 0x754   :  { %3151 = vmatprep.mubr.msk.f32.mxu0 %vm3632_vm1, %v5516_v23 }
 0x755   :  { %v2395_v40 = vmax.f32 %v2366_v3, 0.0  ;;  %v2331_v19 = vmul.f32 %v5248_v8, %v2295_v4 }
 0x756   :  { %v3456_v0 = vpop.eup %3455 }
 0x757   :  { %3152 = vmatmul.mubr.f32.gmra.mrb[58].mxu0 %v2395_v40  ;;  %v2367_v10 = vadd.f32 %v5256_v29, %v2331_v19  ;;  %v2296_v49 = vmul.f32 %v3456_v0, %v5208_v21 }
 0x758   :  { %3154 = vmatprep.mubr.msk.f32.mxu0 %vm3632_vm1, %v5516_v23 }
 0x759   :  { %v2396_v1 = vmax.f32 %v2367_v10, 0.0  ;;  %v2332_v56 = vmul.f32 %v5248_v8, %v2296_v49 }
 0x75a   :  { %v3458_v57 = vpop.eup %3457 }
 0x75b   :  { %3155 = vmatmul.mubr.f32.gmra.mrb[60].mxu0 %v2396_v1  ;;  %v2368_v7 = vadd.f32 %v5256_v29, %v2332_v56  ;;  %v2297_v6 = vmul.f32 %v3458_v57, %v5213_v59 }
 0x75c   :  { %3157 = vmatprep.mubr.msk.f32.mxu0 %vm3632_vm1, %v5516_v23 }
 0x75d   :  { %v2397_v46 = vmax.f32 %v2368_v7, 0.0  ;;  %v2333_v30 = vmul.f32 %v5248_v8, %v2297_v6 }
 0x75f   :  { %3158 = vmatmul.mubr.f32.gmra.mrb[62].mxu0 %v2397_v46  ;;  %v2369_v21 = vadd.f32 %v5256_v29, %v2333_v30 }
 0x760   :  { %3160 = vmatprep.mubr.msk.f32.mxu0 %vm3632_vm1, %v5516_v23 }
 0x761   :  { %v2398_v44 = vmax.f32 %v2369_v21, 0.0 }
 0x763   :  { %3161 = vmatmul.mubr.f32.gmra.mrb[64].mxu0 %v2398_v44 }
 0x764   :  { %3163 = vmatprep.mubr.msk.f32.mxu0 %vm3632_vm1, %v5516_v23 }
 0x780   :  { %v2172_v26 = vpop.xlane.xlu1 %2171 }
 0x781   :  { %v2211_v17 = vmul.f32 0.125, %v2172_v26 }
 0x783   :  { %v2240_v59 = vadd.f32 1e-05, %v2211_v17 }
 0x784   :  { %v2174_v27 = vpop.xlane.xlu0 %2173 }
 0x785   :  { %3459 = vrsqrt.f32 %v2240_v59  ;;  %v2212_v5 = vmul.f32 0.125, %v2174_v27 }
 0x787   :  { %v2241_v36 = vadd.f32 1e-05, %v2212_v5 }
 0x788   :  { %v2176_v34 = vpop.xlane.xlu1 %2175 }
 0x789   :  { %3461 = vrsqrt.f32 %v2241_v36  ;;  %v2213_v25 = vmul.f32 0.125, %v2176_v34 }
 0x78b   :  { %v2242_v15 = vadd.f32 1e-05, %v2213_v25 }
 0x78c   :  { %v2178_v41 = vpop.xlane.xlu0 %2177 }
 0x78d   :  { %3463 = vrsqrt.f32 %v2242_v15  ;;  %v2214_v13 = vmul.f32 0.125, %v2178_v41 }
 0x78f   :  { %v3460_v38 = vpop.eup %3459  ;;  %v2243_v58 = vadd.f32 1e-05, %v2214_v13 }
 0x790   :  { %v2180_v11 = vpop.xlane.xlu1 %2179  ;;  %v2298_v43 = vmul.f32 %v3460_v38, %v5218_v53 }
 0x791   :  { %3465 = vrsqrt.f32 %v2243_v58  ;;  %v2215_v22 = vmul.f32 0.125, %v2180_v11 }
 0x792   :  { %v2334_v28 = vmul.f32 %v5248_v8, %v2298_v43 }
 0x793   :  { %v3462_v20 = vpop.eup %3461  ;;  %v2244_v54 = vadd.f32 1e-05, %v2215_v22 }
 0x794   :  { %v2182_v45 = vpop.xlane.xlu0 %2181  ;;  %v2370_v9 = vadd.f32 %v5256_v29, %v2334_v28  ;;  %v2299_v55 = vmul.f32 %v3462_v20, %v5223_v16 }
 0x795   :  { %3467 = vrsqrt.f32 %v2244_v54  ;;  %v2216_v52 = vmul.f32 0.125, %v2182_v45 }
 0x796   :  { %v2399_v33 = vmax.f32 %v2370_v9, 0.0  ;;  %v2335_v60 = vmul.f32 %v5248_v8, %v2299_v55 }
 0x797   :  { %v3464_v24 = vpop.eup %3463  ;;  %v2245_v12 = vadd.f32 1e-05, %v2216_v52 }
 0x798   :  { %v2184_v62 = vpop.xlane.xlu1 %2183  ;;  %3164 = vmatmul.mubr.f32.gmra.mrb[66].mxu0 %v2399_v33  ;;  %v2371_v53 = vadd.f32 %v5256_v29, %v2335_v60  ;;  %v2300_v42 = vmul.f32 %v3464_v24, %v5228_v39 }
 0x799   :  { %3469 = vrsqrt.f32 %v2245_v12  ;;  %v2217_v35 = vmul.f32 0.125, %v2184_v62  ;;  %3166 = vmatprep.mubr.msk.f32.mxu0 %vm3632_vm1, %v5516_v23 }
 0x79a   :  { %v2400_v18 = vmax.f32 %v2371_v53, 0.0  ;;  %v2336_v16 = vmul.f32 %v5248_v8, %v2300_v42  ;;  %v5428_v53 = vld [vmem:[%s5488_s14] ss:$0 sm:$0xff]  ;;  %s3633_s14 = smov [#allocation11]  }
 0x79b   :  { %v3466_v47 = vpop.eup %3465  ;;  %v2246_v51 = vadd.f32 1e-05, %v2217_v35  ;;  %s2677_s3 = sshll.u32 %s3633_s14, 4  ;;  %s2678_s3 = int_to_ptr.vmem [resolvable:$true] %s2677_s3 }
 0x79c   :  { %3167 = vmatmul.mubr.f32.gmra.mrb[68].mxu0 %v2400_v18  ;;  %v2186_v61 = vpop.xlane.xlu0 %2185  ;;  %v2372_v3 = vadd.f32 %v5256_v29, %v2336_v16  ;;  %v2301_v4 = vmul.f32 %v3466_v47, %v5233_v63  ;;  %s3591_s19 = scalar_lea.vmem %s2678_s3, 3712  ;;  %p3596_p13 = scmp.lt.s32.totalorder %s2678_s3, %s2678_s3 }
 0x79d   :  { %3471 = vrsqrt.f32 %v2246_v51  ;;  %v2218_v40 = vmul.f32 0.125, %v2186_v61  ;;  %3169 = vmatprep.mubr.msk.f32.mxu0 %vm3632_vm1, %v5516_v23  ;;  %p3592_p12 = scmp.ne.s32.totalorder %s2678_s3, %s3591_s19  ;;  %p3597_p0 = scmp.lt.s32.totalorder %s3591_s19, %s3591_s19 }
 0x79e   :  { %v2401_v39 = vmax.f32 %v2372_v3, 0.0  ;;  %v2337_v19 = vmul.f32 %v5248_v8, %v2301_v4 }
 0x79f   :  { %v3468_v0 = vpop.eup %3467  ;;  %v2247_v10 = vadd.f32 1e-05, %v2218_v40  ;;  %p3598_p1 = por %p3597_p0, %p3596_p13 }
 0x7a0   :  { %v2188_v49 = vpop.xlane.xlu1 %2187  ;;  %3170 = vmatmul.mubr.f32.gmra.mrb[70].mxu0 %v2401_v39  ;;  %v2373_v1 = vadd.f32 %v5256_v29, %v2337_v19  ;;  %v2302_v56 = vmul.f32 %v3468_v0, %v5238_v14 }
 0x7a1   :  { %3473 = vrsqrt.f32 %v2247_v10  ;;  %v2219_v57 = vmul.f32 0.125, %v2188_v49  ;;  %3172 = vmatprep.mubr.msk.f32.mxu0 %vm3632_vm1, %v5516_v23  ;;  %p3599_p2 = pnand %p3598_p1, %p3592_p12 }
 0x7a2   :  { %v2402_v63 = vmax.f32 %v2373_v1, 0.0  ;;  %v2338_v7 = vmul.f32 %v5248_v8, %v2302_v56 }
 0x7a3   :  { %v3470_v6 = vpop.eup %3469  ;;  %v2248_v46 = vadd.f32 1e-05, %v2219_v57 }
 0x7a4   :  { %3173 = vmatmul.mubr.f32.gmra.mrb[72].mxu0 %v2402_v63  ;;  %v2190_v30 = vpop.xlane.xlu0 %2189  ;;  %v2374_v21 = vadd.f32 %v5256_v29, %v2338_v7  ;;  %v2303_v44 = vmul.f32 %v3470_v6, %v5243_v50 }
 0x7a5   :  { %3475 = vrsqrt.f32 %v2248_v46  ;;  %v2220_v26 = vmul.f32 0.125, %v2190_v30  ;;  %3175 = vmatprep.mubr.msk.f32.mxu0 %vm3632_vm1, %v5516_v23 }
 0x7a6   :  { %v2403_v14 = vmax.f32 %v2374_v21, 0.0  ;;  %v2339_v17 = vmul.f32 %v5248_v8, %v2303_v44 }
 0x7a7   :  { %v3472_v59 = vpop.eup %3471  ;;  %v2249_v27 = vadd.f32 1e-05, %v2220_v26 }
 0x7a8   :  { %v2192_v5 = vpop.xlane.xlu1 %2191  ;;  %3176 = vmatmul.mubr.f32.gmra.mrb[74].mxu0 %v2403_v14  ;;  %v2375_v36 = vadd.f32 %v5256_v29, %v2339_v17  ;;  %v2304_v34 = vmul.f32 %v3472_v59, %v5260_v31 }
 0x7a9   :  { %3477 = vrsqrt.f32 %v2249_v27  ;;  %v2221_v25 = vmul.f32 0.125, %v2192_v5  ;;  %3178 = vmatprep.mubr.msk.f32.mxu0 %vm3632_vm1, %v5516_v23 }
 0x7aa   :  { %v2404_v50 = vmax.f32 %v2375_v36, 0.0  ;;  %v2340_v15 = vmul.f32 %v5248_v8, %v2304_v34 }
 0x7ab   :  { %v3474_v41 = vpop.eup %3473  ;;  %v2250_v13 = vadd.f32 1e-05, %v2221_v25 }
 0x7ac   :  { %3179 = vmatmul.mubr.f32.gmra.mrb[76].mxu0 %v2404_v50  ;;  %v2376_v38 = vadd.f32 %v5256_v29, %v2340_v15  ;;  %v2305_v58 = vmul.f32 %v3474_v41, %v5268_v32 }
 0x7ad   :  { %3479 = vrsqrt.f32 %v2250_v13  ;;  %3181 = vmatprep.mubr.msk.f32.mxu0 %vm3632_vm1, %v5516_v23 }
 0x7ae   :  { %v2405_v31 = vmax.f32 %v2376_v38, 0.0  ;;  %v2341_v11 = vmul.f32 %v5248_v8, %v2305_v58 }
 0x7af   :  { %v3476_v43 = vpop.eup %3475 }
 0x7b0   :  { %3182 = vmatmul.mubr.f32.gmra.mrb[78].mxu0 %v2405_v31  ;;  %v2377_v22 = vadd.f32 %v5256_v29, %v2341_v11  ;;  %v2306_v28 = vmul.f32 %v3476_v43, %v5278_v2 }
 0x7b1   :  { %3184 = vmatprep.mubr.msk.f32.mxu0 %vm3632_vm1, %v5516_v23 }
 0x7b2   :  { %v2406_v20 = vmax.f32 %v2377_v22, 0.0  ;;  %v2342_v54 = vmul.f32 %v5248_v8, %v2306_v28 }
 0x7b3   :  { %v3478_v32 = vpop.eup %3477 }
 0x7b4   :  { %3185 = vmatmul.mubr.f32.gmra.mrb[80].mxu0 %v2406_v20  ;;  %v2378_v45 = vadd.f32 %v5256_v29, %v2342_v54  ;;  %v2307_v9 = vmul.f32 %v3478_v32, %v5288_v48 }
 0x7b5   :  { %3187 = vmatprep.mubr.msk.f32.mxu0 %vm3632_vm1, %v5516_v23 }
 0x7b6   :  { %v2407_v55 = vmax.f32 %v2378_v45, 0.0  ;;  %v2343_v52 = vmul.f32 %v5248_v8, %v2307_v9 }
 0x7b7   :  { %v3480_v33 = vpop.eup %3479 }
 0x7b8   :  { %3188 = vmatmul.mubr.f32.gmra.mrb[82].mxu0 %v2407_v55  ;;  %v2379_v2 = vadd.f32 %v5256_v29, %v2343_v52  ;;  %v2308_v60 = vmul.f32 %v3480_v33, %v5298_v37 }
 0x7b9   :  { %3190 = vmatprep.mubr.msk.f32.mxu0 %vm3632_vm1, %v5516_v23 }
 0x7ba   :  { %v2408_v24 = vmax.f32 %v2379_v2, 0.0  ;;  %v2344_v12 = vmul.f32 %v5248_v8, %v2308_v60 }
 0x7bc   :  { %3191 = vmatmul.mubr.f32.gmra.mrb[84].mxu0 %v2408_v24  ;;  %v2380_v48 = vadd.f32 %v5256_v29, %v2344_v12 }
 0x7bd   :  { %3193 = vmatprep.mubr.msk.f32.mxu0 %vm3632_vm1, %v5516_v23 }
 0x7be   :  { %v2409_v62 = vmax.f32 %v2380_v48, 0.0 }
 0x7c0   :  { %3194 = vmatmul.mubr.f32.gmra.mrb[86].mxu0 %v2409_v62 }
 0x7dd   :  { %v2499_v37 = vpop.f32.mrb[30].mxu0 }
 0x7de   :  { %v2500_v42 = vadd.f32 %v5428_v53, %v2499_v37  ;;  %v3111_v35 = vpop.f32.mrb[31].mxu0 }
 0x7e0   :  { %2643 = vst [vmem:[#allocation11] sm:$0xff] %v2500_v42 }
 0x7e1   :  { %v2504_v18 = vpop.f32.mrb[32].mxu0 }
 0x7e2   :  { %v2505_v8 = vadd.f32 %v5428_v53, %v2504_v18  ;;  %v3114_v16 = vpop.f32.mrb[33].mxu0 }
 0x7e4   :  { %2644 = vst [vmem:[#allocation11 + $0x8] sm:$0xff] %v2505_v8 }
 0x7e5   :  { %v2509_v29 = vpop.f32.mrb[34].mxu0 }
 0x7e6   :  { %v2510_v23 = vadd.f32 %v5428_v53, %v2509_v29  ;;  %v3117_v47 = vpop.f32.mrb[35].mxu0 }
 0x7e8   :  { %2645 = vst [vmem:[#allocation11 + $0x10] sm:$0xff] %v2510_v23 }
 0x7e9   :  { %v2514_v51 = vpop.f32.mrb[36].mxu0 }
 0x7ea   :  { %v2515_v61 = vadd.f32 %v5428_v53, %v2514_v51  ;;  %v3120_v3 = vpop.f32.mrb[37].mxu0 }
 0x7ec   :  { %2646 = vst [vmem:[#allocation11 + $0x18] sm:$0xff] %v2515_v61 }
 0x7ed   :  { %v2519_v4 = vpop.f32.mrb[38].mxu0 }
 0x7ee   :  { %v2520_v40 = vadd.f32 %v5428_v53, %v2519_v4  ;;  %v3123_v39 = vpop.f32.mrb[39].mxu0 }
 0x7f0   :  { %2647 = vst [vmem:[#allocation11 + $0x20] sm:$0xff] %v2520_v40 }
 0x7f1   :  { %v2524_v19 = vpop.f32.mrb[40].mxu0 }
 0x7f2   :  { %v2525_v0 = vadd.f32 %v5428_v53, %v2524_v19  ;;  %v3126_v10 = vpop.f32.mrb[41].mxu0 }
 0x7f4   :  { %2648 = vst [vmem:[#allocation11 + $0x28] sm:$0xff] %v2525_v0 }
 0x7f5   :  { %v2529_v49 = vpop.f32.mrb[42].mxu0 }
 0x7f6   :  { %v2530_v1 = vadd.f32 %v5428_v53, %v2529_v49  ;;  %v3129_v56 = vpop.f32.mrb[43].mxu0 }
 0x7f8   :  { %2649 = vst [vmem:[#allocation11 + $0x30] sm:$0xff] %v2530_v1 }
 0x7f9   :  { %v2534_v57 = vpop.f32.mrb[44].mxu0 }
 0x7fa   :  { %v2535_v63 = vadd.f32 %v5428_v53, %v2534_v57  ;;  %v3132_v7 = vpop.f32.mrb[45].mxu0 }
 0x7fc   :  { %2650 = vst [vmem:[#allocation11 + $0x38] sm:$0xff] %v2535_v63 }
 0x7fd   :  { %v2539_v6 = vpop.f32.mrb[46].mxu0 }
 0x7fe   :  { %v2540_v46 = vadd.f32 %v5428_v53, %v2539_v6  ;;  %v3135_v30 = vpop.f32.mrb[47].mxu0 }
 0x800   :  { %2651 = vst [vmem:[#allocation11 + $0x40] sm:$0xff] %v2540_v46 }
 0x801   :  { %v2544_v21 = vpop.f32.mrb[48].mxu0 }
 0x802   :  { %v2545_v44 = vadd.f32 %v5428_v53, %v2544_v21  ;;  %v3138_v26 = vpop.f32.mrb[49].mxu0 }
 0x804   :  { %2652 = vst [vmem:[#allocation11 + $0x48] sm:$0xff] %v2545_v44 }
 0x818   :  { %v2549_v14 = vpop.f32.mrb[50].mxu0 }
 0x819   :  { %v2550_v17 = vadd.f32 %v5428_v53, %v2549_v14  ;;  %v3141_v59 = vpop.f32.mrb[51].mxu0 }
 0x81b   :  { %2653 = vst [vmem:[#allocation11 + $0x50] sm:$0xff] %v2550_v17 }
 0x81e   :  { %v2554_v27 = vpop.f32.mrb[52].mxu0 }
 0x81f   :  { %v2555_v5 = vadd.f32 %v5428_v53, %v2554_v27  ;;  %v3144_v36 = vpop.f32.mrb[53].mxu0 }
 0x821   :  { %2654 = vst [vmem:[#allocation11 + $0x58] sm:$0xff] %v2555_v5 }
 0x822   :  { %v2559_v34 = vpop.f32.mrb[54].mxu0 }
 0x823   :  { %v2560_v25 = vadd.f32 %v5428_v53, %v2559_v34  ;;  %v3147_v50 = vpop.f32.mrb[55].mxu0 }
 0x825   :  { %2655 = vst [vmem:[#allocation11 + $0x60] sm:$0xff] %v2560_v25 }
 0x826   :  { %v2564_v15 = vpop.f32.mrb[56].mxu0 }
 0x827   :  { %v2565_v41 = vadd.f32 %v5428_v53, %v2564_v15  ;;  %v3150_v13 = vpop.f32.mrb[57].mxu0 }
 0x829   :  { %2656 = vst [vmem:[#allocation11 + $0x68] sm:$0xff] %v2565_v41 }
 0x82a   :  { %v2569_v38 = vpop.f32.mrb[58].mxu0 }
 0x82b   :  { %v2570_v58 = vadd.f32 %v5428_v53, %v2569_v38  ;;  %v3153_v31 = vpop.f32.mrb[59].mxu0 }
 0x82d   :  { %2657 = vst [vmem:[#allocation11 + $0x70] sm:$0xff] %v2570_v58 }
 0x82e   :  { %v2574_v11 = vpop.f32.mrb[60].mxu0 }
 0x82f   :  { %v2575_v43 = vadd.f32 %v5428_v53, %v2574_v11  ;;  %v3156_v22 = vpop.f32.mrb[61].mxu0 }
 0x831   :  { %2658 = vst [vmem:[#allocation11 + $0x78] sm:$0xff] %v2575_v43 }
 0x832   :  { %v2579_v28 = vpop.f32.mrb[62].mxu0 }
 0x833   :  { %v2580_v20 = vadd.f32 %v5428_v53, %v2579_v28  ;;  %v3159_v54 = vpop.f32.mrb[63].mxu0 }
 0x835   :  { %2659 = vst [vmem:[#allocation11 + $0x80] sm:$0xff] %v2580_v20 }
 0x836   :  { %v2584_v32 = vpop.f32.mrb[64].mxu0 }
 0x837   :  { %v2585_v45 = vadd.f32 %v5428_v53, %v2584_v32  ;;  %v3162_v9 = vpop.f32.mrb[65].mxu0 }
 0x839   :  { %2660 = vst [vmem:[#allocation11 + $0x88] sm:$0xff] %v2585_v45 }
 0x86b   :  { %v2589_v55 = vpop.f32.mrb[66].mxu0 }
 0x86c   :  { %v2590_v52 = vadd.f32 %v5428_v53, %v2589_v55  ;;  %v3165_v33 = vpop.f32.mrb[67].mxu0 }
 0x86e   :  { %2661 = vst [vmem:[#allocation11 + $0x90] sm:$0xff] %v2590_v52 }
 0x86f   :  { %v2594_v2 = vpop.f32.mrb[68].mxu0 }
 0x870   :  { %v2595_v60 = vadd.f32 %v5428_v53, %v2594_v2  ;;  %v3168_v24 = vpop.f32.mrb[69].mxu0 }
 0x872   :  { %2662 = vst [vmem:[#allocation11 + $0x98] sm:$0xff] %v2595_v60 }
 0x873   :  { %v2599_v12 = vpop.f32.mrb[70].mxu0 }
 0x874   :  { %v2600_v48 = vadd.f32 %v5428_v53, %v2599_v12  ;;  %v3171_v62 = vpop.f32.mrb[71].mxu0 }
 0x876   :  { %2663 = vst [vmem:[#allocation11 + $0xa0] sm:$0xff] %v2600_v48 }
 0x877   :  { %v2604_v37 = vpop.f32.mrb[72].mxu0 }
 0x878   :  { %v2605_v42 = vadd.f32 %v5428_v53, %v2604_v37  ;;  %v3174_v35 = vpop.f32.mrb[73].mxu0 }
 0x87a   :  { %2664 = vst [vmem:[#allocation11 + $0xa8] sm:$0xff] %v2605_v42 }
 0x87b   :  { %v2609_v18 = vpop.f32.mrb[74].mxu0 }
 0x87c   :  { %v2610_v8 = vadd.f32 %v5428_v53, %v2609_v18  ;;  %v3177_v16 = vpop.f32.mrb[75].mxu0 }
 0x87e   :  { %2665 = vst [vmem:[#allocation11 + $0xb0] sm:$0xff] %v2610_v8 }
 0x87f   :  { %v2614_v29 = vpop.f32.mrb[76].mxu0 }
 0x880   :  { %v2615_v23 = vadd.f32 %v5428_v53, %v2614_v29  ;;  %v3180_v47 = vpop.f32.mrb[77].mxu0 }
 0x882   :  { %2666 = vst [vmem:[#allocation11 + $0xb8] sm:$0xff] %v2615_v23 }
 0x883   :  { %v2619_v51 = vpop.f32.mrb[78].mxu0 }
 0x884   :  { %v2620_v61 = vadd.f32 %v5428_v53, %v2619_v51  ;;  %v3183_v3 = vpop.f32.mrb[79].mxu0 }
 0x886   :  { %2667 = vst [vmem:[#allocation11 + $0xc0] sm:$0xff] %v2620_v61 }
 0x887   :  { %v2624_v4 = vpop.f32.mrb[80].mxu0 }
 0x888   :  { %v2625_v40 = vadd.f32 %v5428_v53, %v2624_v4  ;;  %v3186_v39 = vpop.f32.mrb[81].mxu0 }
 0x88a   :  { %2668 = vst [vmem:[#allocation11 + $0xc8] sm:$0xff] %v2625_v40 }
 0x88b   :  { %v2629_v19 = vpop.f32.mrb[82].mxu0 }
 0x88c   :  { %v2630_v0 = vadd.f32 %v5428_v53, %v2629_v19  ;;  %v3189_v10 = vpop.f32.mrb[83].mxu0 }
 0x88e   :  { %2669 = vst [vmem:[#allocation11 + $0xd0] sm:$0xff] %v2630_v0 }
 0x88f   :  { %v2634_v49 = vpop.f32.mrb[84].mxu0 }
 0x890   :  { %v2635_v1 = vadd.f32 %v5428_v53, %v2634_v49  ;;  %v3192_v56 = vpop.f32.mrb[85].mxu0 }
 0x892   :  { %2670 = vst [vmem:[#allocation11 + $0xd8] sm:$0xff] %v2635_v1 }
 0x893   :  { %v2639_v57 = vpop.f32.mrb[86].mxu0 }
 0x894   :  { %v2640_v63 = vadd.f32 %v5428_v53, %v2639_v57  ;;  %v3195_v7 = vpop.f32.mrb[87].mxu0 }
 0x896   :  { %2671 = vst [vmem:[#allocation11 + $0xe0] sm:$0xff] %v2640_v63 }
 0x897   :  { %3602 = shalt.err (!%p3599_p2)
}
 0x898   :  { %s3603_s5 = scalar_lea.hbm %s5489_s15, 3712 }
 0x899   :  { %p3604_p3 = scmp.ne.s32.totalorder %s5489_s15, %s3603_s5  ;;  %p3607_p4 = scmp.lt.u32.totalorder %s3603_s5, %s5489_s15 }
 0x89b   :  { %p3609_p5 = pnand %p3607_p4, %p3604_p3 }
 0x89d   :  { %3612 = shalt.err (!%p3609_p5)
}
 0x89e   :  { %2683 = dma.vmem_to_hbm [thread:$0]  %s2678_s3, 3712, %s5489_s15, [#allocation4], %s3626_s4, %s3626_s4, %s3627_s17  }
 0x89f   :  { %3619 = dma.done.wait [#allocation4], 3712  }
 0x8a0   :  { %3620 = vsyncadd [#allocation4], 4294963584 }
 0x8a1   :  { %2687 = vsyncpa [#allocation3], 1 }
 0x8a2   :  { %2688 = vsyncpa [#allocation6], 1 }
 0x8a3   :  { %2689 = vsyncpa [#allocation9], 1 }
 0x8a4   :  { %2690 = vsyncpa [#allocation4], 1 }

</bundles_post_ra>
